<compile_context>
chip_gen: v5e
topology: v5e:2x2
jax: 0.10.0
libtpu: 0.0.40
codegen_flags: <defaults>
</compile_context>

<pallas_src>
import numpy as np

import jax
import jax.numpy as jnp
from jax.experimental import pallas as pl
from jax.experimental.pallas import tpu as pltpu

BN_EPS = 1e-5
LANE = 128


# --------------------------------------------------------------------------
# In-kernel helpers
# --------------------------------------------------------------------------
def _bn_fold(y, mix, count, gamma, beta):
    """Training-mode BN folded to a per-(packed)lane scale/shift.

    y is [rows, N*C] (images packed along lanes).  `mix` is the constant
    [N*C, N*C] 0/1 matrix that sums a per-lane statistic across the image
    blocks of the same channel (single tiny MXU push), keeping everything in
    packed layout.  Padded (all-zero) rows contribute nothing to the sums;
    `count` is the number of VALID rows per channel (N * spatial)."""
    s = jnp.sum(y, axis=0, keepdims=True)
    ss = jnp.sum(y * y, axis=0, keepdims=True)
    s = jnp.dot(s, mix, preferred_element_type=jnp.float32)
    ss = jnp.dot(ss, mix, preferred_element_type=jnp.float32)
    inv = 1.0 / float(count)
    mean = s * inv
    var = jnp.maximum(ss * inv - mean * mean, 0.0)   # clamp one-pass cancellation
    scale = gamma * jax.lax.rsqrt(var + BN_EPS)
    shift = beta - mean * scale
    return scale, shift


# --------------------------------------------------------------------------
# Fused Pallas kernel (whole network, grid=(1,), everything stays in VMEM)
# --------------------------------------------------------------------------
def _fused_call(p1, w1bd, w2bd, w3bd, g2, g3, mix1, mix2, mix3,
                fc1bd, fc2bd, consts, *, n, r1, r2v, r3v, tap2, tap3):
    NC1 = w1bd.shape[1]      # n * 11
    NC2 = w2bd.shape[2]      # n * 22
    NC3 = w3bd.shape[2]      # n * 44
    NHID = fc1bd.shape[1]    # n * 22
    OUTW = fc2bd.shape[1]    # n * 128  (lane-dense output)

    def kernel(p1_ref, w1_ref, w2_ref, w3_ref, g2_ref, g3_ref,
               m1_ref, m2_ref, m3_ref, fc1_ref, fc2_ref, c_ref, o_ref):
        c = c_ref[...]                                   # [16, n*128] constants
        gamma1, beta1 = c[0:1, :NC1], c[1:2, :NC1]
        gamma2, beta2 = c[2:3, :NC2], c[3:4, :NC2]
        gamma3, beta3 = c[4:5, :NC3], c[5:6, :NC3]
        fcb1 = c[6:7, :NHID]
        fcb2 = c[7:8, :OUTW]
        avg_row = c[8:9, :tap3]                          # 1/9 over 9 valid rows

        # ---- stage 1: filter bank + conv1, whole batch in ONE matmul ------
        y1 = jnp.dot(p1_ref[...], w1_ref[...],
                     preferred_element_type=jnp.float32)            # [r1, NC1]
        scale1, shift1 = _bn_fold(y1, m1_ref[...], n * r1, gamma1, beta1)
        a1 = jnp.maximum(y1 * scale1 + shift1, 0.0)

        # ---- stage 2: one big gather matmul + 9 per-tap conv matmuls ------
        p2 = jnp.dot(g2_ref[...].astype(jnp.float32), a1,
                     preferred_element_type=jnp.float32)            # [9*tap2, NC1]
        y2 = jnp.dot(p2[0:tap2], w2_ref[0], preferred_element_type=jnp.float32)
        for t in range(1, 9):                                        # [tap2, NC2]
            y2 = y2 + jnp.dot(p2[t * tap2:(t + 1) * tap2], w2_ref[t],
                              preferred_element_type=jnp.float32)
        scale2, shift2 = _bn_fold(y2, m2_ref[...], n * r2v, gamma2, beta2)
        a2 = jnp.maximum(y2 * scale2 + shift2, 0.0)

        # ---- stage 3 -------------------------------------------------------
        p3 = jnp.dot(g3_ref[...].astype(jnp.float32), a2,
                     preferred_element_type=jnp.float32)            # [9*tap3, NC2]
        y3 = jnp.dot(p3[0:tap3], w3_ref[0], preferred_element_type=jnp.float32)
        for t in range(1, 9):                                        # [tap3, NC3]
            y3 = y3 + jnp.dot(p3[t * tap3:(t + 1) * tap3], w3_ref[t],
                              preferred_element_type=jnp.float32)
        scale3, shift3 = _bn_fold(y3, m3_ref[...], n * r3v, gamma3, beta3)
        a3 = jnp.maximum(y3 * scale3 + shift3, 0.0)

        # ---- head: AvgPool(3,3) as a constant averaging row + low-rank FC --
        pooled = jnp.dot(avg_row, a3, preferred_element_type=jnp.float32)  # [1, NC3]
        h = jnp.dot(pooled, fc1_ref[...], preferred_element_type=jnp.float32) + fcb1
        out = jnp.dot(h, fc2_ref[...], preferred_element_type=jnp.float32) + fcb2
        o_ref[...] = out                                             # [1, n*128]

    def full(a):
        return pl.BlockSpec(a.shape, lambda i, _nd=a.ndim: (0,) * _nd)

    return pl.pallas_call(
        kernel,
        out_shape=jax.ShapeDtypeStruct((1, OUTW), jnp.float32),
        grid=(1,),
        in_specs=[full(p1), full(w1bd), full(w2bd), full(w3bd), full(g2),
                  full(g3), full(mix1), full(mix2), full(mix3),
                  full(fc1bd), full(fc2bd), full(consts)],
        out_specs=pl.BlockSpec((1, OUTW), lambda i: (0, 0)),
        compiler_params=pltpu.CompilerParams(
            dimension_semantics=("arbitrary",)),
    )(p1, w1bd, w2bd, w3bd, g2, g3, mix1, mix2, mix3, fc1bd, fc2bd, consts)


# --------------------------------------------------------------------------
# Host-side constant construction (numpy for 0/1 matrices, jnp for weights)
# --------------------------------------------------------------------------
def im2col_nhwc(x, k, stride):
    """[N,H,W,C] -> [N, Ho*Wo, k*k*C]; rows (ho,wo), cols (tap, channel)."""
    N, H, W, C = x.shape
    Ho = (H - k) // stride + 1
    Wo = (W - k) // stride + 1
    slabs = []
    for i in range(k):
        for j in range(k):
            slabs.append(x[:, i:i + stride * (Ho - 1) + 1:stride,
                             j:j + stride * (Wo - 1) + 1:stride, :])
    p = jnp.stack(slabs, axis=3)                      # [N, Ho, Wo, 9, C]
    return p.reshape(N, Ho * Wo, k * k * C), (Ho, Wo)


def make_gather_big(hin, win, ho, wo, tap_pad, ncols, stride=2):
    """[9*tap_pad, ncols] 0/1 gather: row t*tap_pad+(a*wo+b) picks input row
    (stride*a+i)*win+(stride*b+j) for tap t=3i+j.  Pad rows stay all-zero."""
    g = np.zeros((9 * tap_pad, ncols), np.float32)
    for i in range(3):
        for j in range(3):
            t = 3 * i + j
            for a in range(ho):
                for b in range(wo):
                    g[t * tap_pad + a * wo + b,
                      (stride * a + i) * win + (stride * b + j)] = 1.0
    return g


def make_mix(c, n):
    """[n*c, n*c] 0/1 matrix summing per-lane stats across image blocks."""
    m = np.zeros((n * c, n * c), np.float32)
    eye = np.eye(c, dtype=np.float32)
    for a in range(n):
        for b in range(n):
            m[a * c:(a + 1) * c, b * c:(b + 1) * c] = eye
    return jnp.asarray(m)


def fold_ds_conv(dw, pw):
    """Depthwise [Cin,3,3] + pointwise [Cout,Cin] -> per-tap [9, Cin, Cout].
    Biases dropped: exactly cancelled by training-mode BN."""
    d = jnp.transpose(dw, (1, 2, 0)).reshape(9, dw.shape[0])         # [(i,j), Cin]
    return d[:, :, None] * jnp.transpose(pw)[None, :, :]             # [9, Cin, Cout]


def fixed_filter_bank():
    sobel_x = [[-1, 0, 1], [-2, 0, 2], [-1, 0, 1]]
    sobel_y = [[-1, -2, -1], [0, 0, 0], [1, 2, 1]]
    high_pass = [[-1, -1, -1], [-1, 8, -1], [-1, -1, -1]]
    laplacian = [[0, 1, 0], [1, -4, 1], [0, 1, 0]]
    sharpen = [[0, -1, 0], [-1, 5, -1], [0, -1, 0]]
    k = np.stack([np.asarray(f, np.float32) for f in
                  (sobel_x, sobel_y, high_pass, laplacian, sharpen)], axis=-1)  # [3,3,5]
    return jnp.asarray(np.repeat(k.reshape(9, 1, 5), 3, axis=1))                # [9,3,5]


def blockdiag_imgs(w, n):
    """[..., ci, co] -> [..., n*ci, n*co] per-image block-diagonal weights."""
    ci, co = w.shape[-2], w.shape[-1]
    out = jnp.zeros(w.shape[:-2] + (n * ci, n * co), w.dtype)
    for k in range(n):
        out = out.at[..., k * ci:(k + 1) * ci, k * co:(k + 1) * co].set(w)
    return out


def fc2_lane_blocks(fcw2, n, lane=LANE):
    """[hid,out] -> [n*hid, n*lane]: image k's logits land in lanes [k*128, k*128+out)."""
    hid, outp = fcw2.shape
    w = jnp.zeros((n * hid, n * lane), fcw2.dtype)
    for k in range(n):
        w = w.at[k * hid:(k + 1) * hid, k * lane:k * lane + outp].set(fcw2)
    return w


def pack_consts(p, n, tap3, lane=LANE):
    """gamma/beta (packed per image), fc biases and the pooling row in one array."""
    c = jnp.zeros((16, n * lane), jnp.float32)
    tile = lambda v: jnp.tile(v, (n,))
    c = c.at[0, :n * 11].set(tile(p["g1"])).at[1, :n * 11].set(tile(p["bt1"]))
    c = c.at[2, :n * 22].set(tile(p["g2"])).at[3, :n * 22].set(tile(p["bt2"]))
    c = c.at[4, :n * 44].set(tile(p["g3"])).at[5, :n * 44].set(tile(p["bt3"]))
    c = c.at[6, :n * 22].set(tile(p["fcb1"]))
    for k in range(n):
        c = c.at[7, k * lane:k * lane + p["fcb2"].shape[0]].set(p["fcb2"])
    c = c.at[8, :9].set(jnp.full((9,), 1.0 / 9.0, jnp.float32))   # avg-pool row
    return c


def make_params(key):
    ks = jax.random.split(key, 12)
    nrm = lambda k, s, scale=0.1: (scale * jax.random.normal(k, s)).astype(jnp.float32)
    p = {}
    # conv1: DepthwiseSeparableConv(3 -> 6)  (biases kept for faithfulness; they
    # are exactly cancelled by training-mode BN so the kernel does not use them)
    p["dw1"], p["db1"] = nrm(ks[0], (3, 3, 3)), nrm(ks[1], (3,))
    p["pw1"], p["pb1"] = nrm(ks[2], (6, 3)), nrm(ks[3], (6,))
    # conv2: 11 -> 22
    p["dw2"], p["db2"] = nrm(ks[4], (11, 3, 3)), nrm(ks[5], (11,))
    p["pw2"], p["pb2"] = nrm(ks[6], (22, 11)), nrm(ks[7], (22,))
    # conv3: 22 -> 44
    p["dw3"], p["db3"] = nrm(ks[8], (22, 3, 3)), nrm(ks[9], (22,))
    p["pw3"], p["pb3"] = nrm(ks[10], (44, 22)), nrm(ks[11], (44,))
    # BatchNorm affine (PyTorch defaults)
    p["g1"], p["bt1"] = jnp.ones((11,), jnp.float32), jnp.zeros((11,), jnp.float32)
    p["g2"], p["bt2"] = jnp.ones((22,), jnp.float32), jnp.zeros((22,), jnp.float32)
    p["g3"], p["bt3"] = jnp.ones((44,), jnp.float32), jnp.zeros((44,), jnp.float32)
    # LowRankClassifier(44, 100, 22)
    ks2 = jax.random.split(ks[0], 4)
    p["fcw1"], p["fcb1"] = nrm(ks2[0], (44, 22)), nrm(ks2[1], (22,))
    p["fcw2"], p["fcb2"] = nrm(ks2[2], (22, 100)), nrm(ks2[3], (100,))
    return p


@jax.jit
def model_5k_forward(x_nchw, p):
    x = jnp.transpose(x_nchw, (0, 2, 3, 1)).astype(jnp.float32)   # NCHW -> NHWC
    n = x.shape[0]

    p1, (h1, w1s) = im2col_nhwc(x, 3, 2)                 # [N, 225, 27]
    r1 = h1 * w1s
    h2, w2s = (h1 - 3) // 2 + 1, (w1s - 3) // 2 + 1       # 7, 7
    h3, w3s = (h2 - 3) // 2 + 1, (w2s - 3) // 2 + 1       # 3, 3
    assert h3 == 3 and w3s == 3, "AvgPool2d((3,3)) expects a 3x3 final feature map"
    r2v, r3v = h2 * w2s, h3 * w3s                         # 49, 9 (valid rows)
    tap2 = ((r2v + 7) // 8) * 8                           # 56 (sublane-aligned)
    tap3 = ((r3v + 7) // 8) * 8                           # 16

    # images packed into the lane dimension: [rows, N*C]
    p1_packed = jnp.transpose(p1, (1, 0, 2)).reshape(r1, n * 27)

    # 0/1 gather matrices (bf16 is exact for 0/1, halves the only big DMA)
    g2 = jnp.asarray(make_gather_big(h1, w1s, h2, w2s, tap2, r1), jnp.bfloat16)
    g3 = jnp.asarray(make_gather_big(h2, w2s, h3, w3s, tap3, tap2), jnp.bfloat16)

    # folded conv weights, per-image block-diagonal (biases cancelled by BN)
    w1 = jnp.concatenate([fixed_filter_bank(),
                          fold_ds_conv(p["dw1"], p["pw1"])], axis=-1).reshape(27, 11)
    w1bd = blockdiag_imgs(w1, n)                                  # [n*27, n*11]
    w2bd = blockdiag_imgs(fold_ds_conv(p["dw2"], p["pw2"]), n)    # [9, n*11, n*22]
    w3bd = blockdiag_imgs(fold_ds_conv(p["dw3"], p["pw3"]), n)    # [9, n*22, n*44]

    mix1, mix2, mix3 = make_mix(11, n), make_mix(22, n), make_mix(44, n)

    fc1bd = blockdiag_imgs(p["fcw1"], n)                          # [n*44, n*22]
    fc2bd = fc2_lane_blocks(p["fcw2"], n)                         # [n*22, n*128]
    consts = pack_consts(p, n, tap3)

    out = _fused_call(p1_packed, w1bd, w2bd, w3bd, g2, g3, mix1, mix2, mix3,
                      fc1bd, fc2bd, consts,
                      n=n, r1=r1, r2v=r2v, r3v=r3v, tap2=tap2, tap3=tap3)
    return out.reshape(n, LANE)[:, :p["fcw2"].shape[1]]           # [N, 100]


# TODO(synk): BatchNorm running-statistics updates (training-mode side effect
# in PyTorch) are not replicated; only the forward output is computed.

if __name__ == "__main__":
    key = jax.random.PRNGKey(0)
    pkey, xkey = jax.random.split(key)
    params = make_params(pkey)
    # CIFAR-shaped input: 3 channels, 32x32 (3 stride-2 convs + 3x3 pool valid)
    x = jax.random.normal(xkey, (2, 3, 32, 32), dtype=jnp.float32)
    out = model_5k_forward(x, params)
    jax.block_until_ready(out)
    assert out.shape == (2, 100), out.shape
    print("KERNEL_OK")
</pallas_src>

<mosaic_0001>
module attributes {stable_mosaic.version = 11 : i64} {
  func.func @kernel(%arg0: i32, %arg1: memref<225x54xf32, #tpu.memory_space<vmem>>, %arg2: memref<54x22xf32, #tpu.memory_space<vmem>>, %arg3: memref<9x22x44xf32, #tpu.memory_space<vmem>>, %arg4: memref<9x44x88xf32, #tpu.memory_space<vmem>>, %arg5: memref<504x225xbf16, #tpu.memory_space<vmem>>, %arg6: memref<144x56xbf16, #tpu.memory_space<vmem>>, %arg7: memref<22x22xf32, #tpu.memory_space<vmem>>, %arg8: memref<44x44xf32, #tpu.memory_space<vmem>>, %arg9: memref<88x88xf32, #tpu.memory_space<vmem>>, %arg10: memref<88x44xf32, #tpu.memory_space<vmem>>, %arg11: memref<44x256xf32, #tpu.memory_space<vmem>>, %arg12: memref<16x256xf32, #tpu.memory_space<vmem>>, %arg13: memref<1x256xf32, #tpu.memory_space<vmem>>) attributes {dimension_semantics = [#tpu.dimension_semantics<arbitrary>], iteration_bounds = array<i64: 1>, scalar_prefetch = 0 : i64, scratch_operands = 0 : i64, tpu.core_type = #tpu.core_type<tc>, window_params = [{pipeline_mode = #tpu.pipeline_mode<synchronous>, transform_indices = @transform_0, window_bounds = array<i64: 225, 54>}, {pipeline_mode = #tpu.pipeline_mode<synchronous>, transform_indices = @transform_1, window_bounds = array<i64: 54, 22>}, {pipeline_mode = #tpu.pipeline_mode<synchronous>, transform_indices = @transform_2, window_bounds = array<i64: 9, 22, 44>}, {pipeline_mode = #tpu.pipeline_mode<synchronous>, transform_indices = @transform_3, window_bounds = array<i64: 9, 44, 88>}, {pipeline_mode = #tpu.pipeline_mode<synchronous>, transform_indices = @transform_4, window_bounds = array<i64: 504, 225>}, {pipeline_mode = #tpu.pipeline_mode<synchronous>, transform_indices = @transform_5, window_bounds = array<i64: 144, 56>}, {pipeline_mode = #tpu.pipeline_mode<synchronous>, transform_indices = @transform_6, window_bounds = array<i64: 22, 22>}, {pipeline_mode = #tpu.pipeline_mode<synchronous>, transform_indices = @transform_7, window_bounds = array<i64: 44, 44>}, {pipeline_mode = #tpu.pipeline_mode<synchronous>, transform_indices = @transform_8, window_bounds = array<i64: 88, 88>}, {pipeline_mode = #tpu.pipeline_mode<synchronous>, transform_indices = @transform_9, window_bounds = array<i64: 88, 44>}, {pipeline_mode = #tpu.pipeline_mode<synchronous>, transform_indices = @transform_10, window_bounds = array<i64: 44, 256>}, {pipeline_mode = #tpu.pipeline_mode<synchronous>, transform_indices = @transform_11, window_bounds = array<i64: 16, 256>}, {pipeline_mode = #tpu.pipeline_mode<synchronous>, transform_indices = @transform_12, window_bounds = array<i64: 1, 256>}]} {
    %c0 = arith.constant 0 : index
    %c0_0 = arith.constant 0 : index
    %0 = vector.load %arg12[%c0, %c0_0] : memref<16x256xf32, #tpu.memory_space<vmem>>, vector<16x256xf32>
    %1 = vector.extract_strided_slice %0 {offsets = [0, 0], sizes = [1, 22], strides = [1, 1]} : vector<16x256xf32> to vector<1x22xf32>
    %2 = vector.extract_strided_slice %0 {offsets = [1, 0], sizes = [1, 22], strides = [1, 1]} : vector<16x256xf32> to vector<1x22xf32>
    %3 = vector.extract_strided_slice %0 {offsets = [2, 0], sizes = [1, 44], strides = [1, 1]} : vector<16x256xf32> to vector<1x44xf32>
    %4 = vector.extract_strided_slice %0 {offsets = [3, 0], sizes = [1, 44], strides = [1, 1]} : vector<16x256xf32> to vector<1x44xf32>
    %5 = vector.extract_strided_slice %0 {offsets = [4, 0], sizes = [1, 88], strides = [1, 1]} : vector<16x256xf32> to vector<1x88xf32>
    %6 = vector.extract_strided_slice %0 {offsets = [5, 0], sizes = [1, 88], strides = [1, 1]} : vector<16x256xf32> to vector<1x88xf32>
    %7 = vector.extract_strided_slice %0 {offsets = [6, 0], sizes = [1, 44], strides = [1, 1]} : vector<16x256xf32> to vector<1x44xf32>
    %8 = vector.extract_strided_slice %0 {offsets = [7, 0], sizes = [1, 256], strides = [1, 1]} : vector<16x256xf32> to vector<1x256xf32>
    %9 = vector.extract_strided_slice %0 {offsets = [8, 0], sizes = [1, 16], strides = [1, 1]} : vector<16x256xf32> to vector<1x16xf32>
    %c0_1 = arith.constant 0 : index
    %c0_2 = arith.constant 0 : index
    %10 = vector.load %arg1[%c0_1, %c0_2] : memref<225x54xf32, #tpu.memory_space<vmem>>, vector<225x54xf32>
    %c0_3 = arith.constant 0 : index
    %c0_4 = arith.constant 0 : index
    %11 = vector.load %arg2[%c0_3, %c0_4] : memref<54x22xf32, #tpu.memory_space<vmem>>, vector<54x22xf32>
    %cst = arith.constant dense<0.000000e+00> : vector<225x22xf32>
    %12 = tpu.matmul %10, %11, %cst {dimension_numbers = #tpu.dot_dimension_numbers<[1], [0], [0], [1], [0, 0, 1, 1], [], []>} : vector<225x54xf32>, vector<54x22xf32>, vector<225x22xf32> -> vector<225x22xf32>
    %c0_5 = arith.constant 0 : index
    %c0_6 = arith.constant 0 : index
    %13 = vector.load %arg7[%c0_5, %c0_6] : memref<22x22xf32, #tpu.memory_space<vmem>>, vector<22x22xf32>
    %cst_7 = arith.constant dense<0.000000e+00> : vector<22xf32>
    %14 = vector.multi_reduction <add>, %12, %cst_7 [0] : vector<225x22xf32> to vector<22xf32>
    %15 = vector.shape_cast %14 : vector<22xf32> to vector<1x22xf32>
    %16 = arith.mulf %12, %12 : vector<225x22xf32>
    %cst_8 = arith.constant dense<0.000000e+00> : vector<22xf32>
    %17 = vector.multi_reduction <add>, %16, %cst_8 [0] : vector<225x22xf32> to vector<22xf32>
    %18 = vector.shape_cast %17 : vector<22xf32> to vector<1x22xf32>
    %cst_9 = arith.constant dense<0.000000e+00> : vector<1x22xf32>
    %19 = tpu.matmul %15, %13, %cst_9 {dimension_numbers = #tpu.dot_dimension_numbers<[1], [0], [0], [1], [0, 0, 1, 1], [], []>} : vector<1x22xf32>, vector<22x22xf32>, vector<1x22xf32> -> vector<1x22xf32>
    %cst_10 = arith.constant dense<0.000000e+00> : vector<1x22xf32>
    %20 = tpu.matmul %18, %13, %cst_10 {dimension_numbers = #tpu.dot_dimension_numbers<[1], [0], [0], [1], [0, 0, 1, 1], [], []>} : vector<1x22xf32>, vector<22x22xf32>, vector<1x22xf32> -> vector<1x22xf32>
    %cst_11 = arith.constant 0.00222222228 : f32
    %21 = vector.broadcast %cst_11 : f32 to vector<1x22xf32>
    %22 = arith.mulf %19, %21 : vector<1x22xf32>
    %cst_12 = arith.constant 0.00222222228 : f32
    %23 = vector.broadcast %cst_12 : f32 to vector<1x22xf32>
    %24 = arith.mulf %20, %23 : vector<1x22xf32>
    %25 = arith.mulf %22, %22 : vector<1x22xf32>
    %26 = arith.subf %24, %25 : vector<1x22xf32>
    %cst_13 = arith.constant 0.000000e+00 : f32
    %27 = vector.broadcast %cst_13 : f32 to vector<1x22xf32>
    %28 = arith.maximumf %26, %27 : vector<1x22xf32>
    %cst_14 = arith.constant 9.99999974E-6 : f32
    %29 = vector.broadcast %cst_14 : f32 to vector<1x22xf32>
    %30 = arith.addf %28, %29 : vector<1x22xf32>
    %31 = math.rsqrt %30 : vector<1x22xf32>
    %32 = arith.mulf %1, %31 : vector<1x22xf32>
    %33 = arith.mulf %22, %32 : vector<1x22xf32>
    %34 = arith.subf %2, %33 : vector<1x22xf32>
    %35 = vector.broadcast %32 : vector<1x22xf32> to vector<225x22xf32>
    %36 = arith.mulf %12, %35 : vector<225x22xf32>
    %37 = vector.broadcast %34 : vector<1x22xf32> to vector<225x22xf32>
    %38 = arith.addf %36, %37 : vector<225x22xf32>
    %cst_15 = arith.constant 0.000000e+00 : f32
    %39 = vector.broadcast %cst_15 : f32 to vector<225x22xf32>
    %40 = arith.maximumf %38, %39 : vector<225x22xf32>
    %c0_16 = arith.constant 0 : index
    %c0_17 = arith.constant 0 : index
    %41 = vector.load %arg5[%c0_16, %c0_17] : memref<504x225xbf16, #tpu.memory_space<vmem>>, vector<504x225xbf16>
    %42 = arith.extf %41 : vector<504x225xbf16> to vector<504x225xf32>
    %cst_18 = arith.constant dense<0.000000e+00> : vector<504x22xf32>
    %43 = tpu.matmul %42, %40, %cst_18 {dimension_numbers = #tpu.dot_dimension_numbers<[1], [0], [0], [1], [0, 0, 1, 1], [], []>} : vector<504x225xf32>, vector<225x22xf32>, vector<504x22xf32> -> vector<504x22xf32>
    %44 = vector.extract_strided_slice %43 {offsets = [0, 0], sizes = [56, 22], strides = [1, 1]} : vector<504x22xf32> to vector<56x22xf32>
    %c0_19 = arith.constant 0 : index
    %c0_20 = arith.constant 0 : index
    %c0_21 = arith.constant 0 : index
    %45 = vector.load %arg3[%c0_19, %c0_20, %c0_21] : memref<9x22x44xf32, #tpu.memory_space<vmem>>, vector<1x22x44xf32>
    %46 = vector.shape_cast %45 : vector<1x22x44xf32> to vector<22x44xf32>
    %cst_22 = arith.constant dense<0.000000e+00> : vector<56x44xf32>
    %47 = tpu.matmul %44, %46, %cst_22 {dimension_numbers = #tpu.dot_dimension_numbers<[1], [0], [0], [1], [0, 0, 1, 1], [], []>} : vector<56x22xf32>, vector<22x44xf32>, vector<56x44xf32> -> vector<56x44xf32>
    %48 = vector.extract_strided_slice %43 {offsets = [56, 0], sizes = [56, 22], strides = [1, 1]} : vector<504x22xf32> to vector<56x22xf32>
    %c1 = arith.constant 1 : index
    %c0_23 = arith.constant 0 : index
    %c0_24 = arith.constant 0 : index
    %49 = vector.load %arg3[%c1, %c0_23, %c0_24] : memref<9x22x44xf32, #tpu.memory_space<vmem>>, vector<1x22x44xf32>
    %50 = vector.shape_cast %49 : vector<1x22x44xf32> to vector<22x44xf32>
    %cst_25 = arith.constant dense<0.000000e+00> : vector<56x44xf32>
    %51 = tpu.matmul %48, %50, %cst_25 {dimension_numbers = #tpu.dot_dimension_numbers<[1], [0], [0], [1], [0, 0, 1, 1], [], []>} : vector<56x22xf32>, vector<22x44xf32>, vector<56x44xf32> -> vector<56x44xf32>
    %52 = arith.addf %47, %51 : vector<56x44xf32>
    %53 = vector.extract_strided_slice %43 {offsets = [112, 0], sizes = [56, 22], strides = [1, 1]} : vector<504x22xf32> to vector<56x22xf32>
    %c2 = arith.constant 2 : index
    %c0_26 = arith.constant 0 : index
    %c0_27 = arith.constant 0 : index
    %54 = vector.load %arg3[%c2, %c0_26, %c0_27] : memref<9x22x44xf32, #tpu.memory_space<vmem>>, vector<1x22x44xf32>
    %55 = vector.shape_cast %54 : vector<1x22x44xf32> to vector<22x44xf32>
    %cst_28 = arith.constant dense<0.000000e+00> : vector<56x44xf32>
    %56 = tpu.matmul %53, %55, %cst_28 {dimension_numbers = #tpu.dot_dimension_numbers<[1], [0], [0], [1], [0, 0, 1, 1], [], []>} : vector<56x22xf32>, vector<22x44xf32>, vector<56x44xf32> -> vector<56x44xf32>
    %57 = arith.addf %52, %56 : vector<56x44xf32>
    %58 = vector.extract_strided_slice %43 {offsets = [168, 0], sizes = [56, 22], strides = [1, 1]} : vector<504x22xf32> to vector<56x22xf32>
    %c3 = arith.constant 3 : index
    %c0_29 = arith.constant 0 : index
    %c0_30 = arith.constant 0 : index
    %59 = vector.load %arg3[%c3, %c0_29, %c0_30] : memref<9x22x44xf32, #tpu.memory_space<vmem>>, vector<1x22x44xf32>
    %60 = vector.shape_cast %59 : vector<1x22x44xf32> to vector<22x44xf32>
    %cst_31 = arith.constant dense<0.000000e+00> : vector<56x44xf32>
    %61 = tpu.matmul %58, %60, %cst_31 {dimension_numbers = #tpu.dot_dimension_numbers<[1], [0], [0], [1], [0, 0, 1, 1], [], []>} : vector<56x22xf32>, vector<22x44xf32>, vector<56x44xf32> -> vector<56x44xf32>
    %62 = arith.addf %57, %61 : vector<56x44xf32>
    %63 = vector.extract_strided_slice %43 {offsets = [224, 0], sizes = [56, 22], strides = [1, 1]} : vector<504x22xf32> to vector<56x22xf32>
    %c4 = arith.constant 4 : index
    %c0_32 = arith.constant 0 : index
    %c0_33 = arith.constant 0 : index
    %64 = vector.load %arg3[%c4, %c0_32, %c0_33] : memref<9x22x44xf32, #tpu.memory_space<vmem>>, vector<1x22x44xf32>
    %65 = vector.shape_cast %64 : vector<1x22x44xf32> to vector<22x44xf32>
    %cst_34 = arith.constant dense<0.000000e+00> : vector<56x44xf32>
    %66 = tpu.matmul %63, %65, %cst_34 {dimension_numbers = #tpu.dot_dimension_numbers<[1], [0], [0], [1], [0, 0, 1, 1], [], []>} : vector<56x22xf32>, vector<22x44xf32>, vector<56x44xf32> -> vector<56x44xf32>
    %67 = arith.addf %62, %66 : vector<56x44xf32>
    %68 = vector.extract_strided_slice %43 {offsets = [280, 0], sizes = [56, 22], strides = [1, 1]} : vector<504x22xf32> to vector<56x22xf32>
    %c5 = arith.constant 5 : index
    %c0_35 = arith.constant 0 : index
    %c0_36 = arith.constant 0 : index
    %69 = vector.load %arg3[%c5, %c0_35, %c0_36] : memref<9x22x44xf32, #tpu.memory_space<vmem>>, vector<1x22x44xf32>
    %70 = vector.shape_cast %69 : vector<1x22x44xf32> to vector<22x44xf32>
    %cst_37 = arith.constant dense<0.000000e+00> : vector<56x44xf32>
    %71 = tpu.matmul %68, %70, %cst_37 {dimension_numbers = #tpu.dot_dimension_numbers<[1], [0], [0], [1], [0, 0, 1, 1], [], []>} : vector<56x22xf32>, vector<22x44xf32>, vector<56x44xf32> -> vector<56x44xf32>
    %72 = arith.addf %67, %71 : vector<56x44xf32>
    %73 = vector.extract_strided_slice %43 {offsets = [336, 0], sizes = [56, 22], strides = [1, 1]} : vector<504x22xf32> to vector<56x22xf32>
    %c6 = arith.constant 6 : index
    %c0_38 = arith.constant 0 : index
    %c0_39 = arith.constant 0 : index
    %74 = vector.load %arg3[%c6, %c0_38, %c0_39] : memref<9x22x44xf32, #tpu.memory_space<vmem>>, vector<1x22x44xf32>
    %75 = vector.shape_cast %74 : vector<1x22x44xf32> to vector<22x44xf32>
    %cst_40 = arith.constant dense<0.000000e+00> : vector<56x44xf32>
    %76 = tpu.matmul %73, %75, %cst_40 {dimension_numbers = #tpu.dot_dimension_numbers<[1], [0], [0], [1], [0, 0, 1, 1], [], []>} : vector<56x22xf32>, vector<22x44xf32>, vector<56x44xf32> -> vector<56x44xf32>
    %77 = arith.addf %72, %76 : vector<56x44xf32>
    %78 = vector.extract_strided_slice %43 {offsets = [392, 0], sizes = [56, 22], strides = [1, 1]} : vector<504x22xf32> to vector<56x22xf32>
    %c7 = arith.constant 7 : index
    %c0_41 = arith.constant 0 : index
    %c0_42 = arith.constant 0 : index
    %79 = vector.load %arg3[%c7, %c0_41, %c0_42] : memref<9x22x44xf32, #tpu.memory_space<vmem>>, vector<1x22x44xf32>
    %80 = vector.shape_cast %79 : vector<1x22x44xf32> to vector<22x44xf32>
    %cst_43 = arith.constant dense<0.000000e+00> : vector<56x44xf32>
    %81 = tpu.matmul %78, %80, %cst_43 {dimension_numbers = #tpu.dot_dimension_numbers<[1], [0], [0], [1], [0, 0, 1, 1], [], []>} : vector<56x22xf32>, vector<22x44xf32>, vector<56x44xf32> -> vector<56x44xf32>
    %82 = arith.addf %77, %81 : vector<56x44xf32>
    %83 = vector.extract_strided_slice %43 {offsets = [448, 0], sizes = [56, 22], strides = [1, 1]} : vector<504x22xf32> to vector<56x22xf32>
    %c8 = arith.constant 8 : index
    %c0_44 = arith.constant 0 : index
    %c0_45 = arith.constant 0 : index
    %84 = vector.load %arg3[%c8, %c0_44, %c0_45] : memref<9x22x44xf32, #tpu.memory_space<vmem>>, vector<1x22x44xf32>
    %85 = vector.shape_cast %84 : vector<1x22x44xf32> to vector<22x44xf32>
    %cst_46 = arith.constant dense<0.000000e+00> : vector<56x44xf32>
    %86 = tpu.matmul %83, %85, %cst_46 {dimension_numbers = #tpu.dot_dimension_numbers<[1], [0], [0], [1], [0, 0, 1, 1], [], []>} : vector<56x22xf32>, vector<22x44xf32>, vector<56x44xf32> -> vector<56x44xf32>
    %87 = arith.addf %82, %86 : vector<56x44xf32>
    %c0_47 = arith.constant 0 : index
    %c0_48 = arith.constant 0 : index
    %88 = vector.load %arg8[%c0_47, %c0_48] : memref<44x44xf32, #tpu.memory_space<vmem>>, vector<44x44xf32>
    %cst_49 = arith.constant dense<0.000000e+00> : vector<44xf32>
    %89 = vector.multi_reduction <add>, %87, %cst_49 [0] : vector<56x44xf32> to vector<44xf32>
    %90 = vector.shape_cast %89 : vector<44xf32> to vector<1x44xf32>
    %91 = arith.mulf %87, %87 : vector<56x44xf32>
    %cst_50 = arith.constant dense<0.000000e+00> : vector<44xf32>
    %92 = vector.multi_reduction <add>, %91, %cst_50 [0] : vector<56x44xf32> to vector<44xf32>
    %93 = vector.shape_cast %92 : vector<44xf32> to vector<1x44xf32>
    %cst_51 = arith.constant dense<0.000000e+00> : vector<1x44xf32>
    %94 = tpu.matmul %90, %88, %cst_51 {dimension_numbers = #tpu.dot_dimension_numbers<[1], [0], [0], [1], [0, 0, 1, 1], [], []>} : vector<1x44xf32>, vector<44x44xf32>, vector<1x44xf32> -> vector<1x44xf32>
    %cst_52 = arith.constant dense<0.000000e+00> : vector<1x44xf32>
    %95 = tpu.matmul %93, %88, %cst_52 {dimension_numbers = #tpu.dot_dimension_numbers<[1], [0], [0], [1], [0, 0, 1, 1], [], []>} : vector<1x44xf32>, vector<44x44xf32>, vector<1x44xf32> -> vector<1x44xf32>
    %cst_53 = arith.constant 0.0102040814 : f32
    %96 = vector.broadcast %cst_53 : f32 to vector<1x44xf32>
    %97 = arith.mulf %94, %96 : vector<1x44xf32>
    %cst_54 = arith.constant 0.0102040814 : f32
    %98 = vector.broadcast %cst_54 : f32 to vector<1x44xf32>
    %99 = arith.mulf %95, %98 : vector<1x44xf32>
    %100 = arith.mulf %97, %97 : vector<1x44xf32>
    %101 = arith.subf %99, %100 : vector<1x44xf32>
    %cst_55 = arith.constant 0.000000e+00 : f32
    %102 = vector.broadcast %cst_55 : f32 to vector<1x44xf32>
    %103 = arith.maximumf %101, %102 : vector<1x44xf32>
    %cst_56 = arith.constant 9.99999974E-6 : f32
    %104 = vector.broadcast %cst_56 : f32 to vector<1x44xf32>
    %105 = arith.addf %103, %104 : vector<1x44xf32>
    %106 = math.rsqrt %105 : vector<1x44xf32>
    %107 = arith.mulf %3, %106 : vector<1x44xf32>
    %108 = arith.mulf %97, %107 : vector<1x44xf32>
    %109 = arith.subf %4, %108 : vector<1x44xf32>
    %110 = vector.broadcast %107 : vector<1x44xf32> to vector<56x44xf32>
    %111 = arith.mulf %87, %110 : vector<56x44xf32>
    %112 = vector.broadcast %109 : vector<1x44xf32> to vector<56x44xf32>
    %113 = arith.addf %111, %112 : vector<56x44xf32>
    %cst_57 = arith.constant 0.000000e+00 : f32
    %114 = vector.broadcast %cst_57 : f32 to vector<56x44xf32>
    %115 = arith.maximumf %113, %114 : vector<56x44xf32>
    %c0_58 = arith.constant 0 : index
    %c0_59 = arith.constant 0 : index
    %116 = vector.load %arg6[%c0_58, %c0_59] : memref<144x56xbf16, #tpu.memory_space<vmem>>, vector<144x56xbf16>
    %117 = arith.extf %116 : vector<144x56xbf16> to vector<144x56xf32>
    %cst_60 = arith.constant dense<0.000000e+00> : vector<144x44xf32>
    %118 = tpu.matmul %117, %115, %cst_60 {dimension_numbers = #tpu.dot_dimension_numbers<[1], [0], [0], [1], [0, 0, 1, 1], [], []>} : vector<144x56xf32>, vector<56x44xf32>, vector<144x44xf32> -> vector<144x44xf32>
    %119 = vector.extract_strided_slice %118 {offsets = [0, 0], sizes = [16, 44], strides = [1, 1]} : vector<144x44xf32> to vector<16x44xf32>
    %c0_61 = arith.constant 0 : index
    %c0_62 = arith.constant 0 : index
    %c0_63 = arith.constant 0 : index
    %120 = vector.load %arg4[%c0_61, %c0_62, %c0_63] : memref<9x44x88xf32, #tpu.memory_space<vmem>>, vector<1x44x88xf32>
    %121 = vector.shape_cast %120 : vector<1x44x88xf32> to vector<44x88xf32>
    %cst_64 = arith.constant dense<0.000000e+00> : vector<16x88xf32>
    %122 = tpu.matmul %119, %121, %cst_64 {dimension_numbers = #tpu.dot_dimension_numbers<[1], [0], [0], [1], [0, 0, 1, 1], [], []>} : vector<16x44xf32>, vector<44x88xf32>, vector<16x88xf32> -> vector<16x88xf32>
    %123 = vector.extract_strided_slice %118 {offsets = [16, 0], sizes = [16, 44], strides = [1, 1]} : vector<144x44xf32> to vector<16x44xf32>
    %c1_65 = arith.constant 1 : index
    %c0_66 = arith.constant 0 : index
    %c0_67 = arith.constant 0 : index
    %124 = vector.load %arg4[%c1_65, %c0_66, %c0_67] : memref<9x44x88xf32, #tpu.memory_space<vmem>>, vector<1x44x88xf32>
    %125 = vector.shape_cast %124 : vector<1x44x88xf32> to vector<44x88xf32>
    %cst_68 = arith.constant dense<0.000000e+00> : vector<16x88xf32>
    %126 = tpu.matmul %123, %125, %cst_68 {dimension_numbers = #tpu.dot_dimension_numbers<[1], [0], [0], [1], [0, 0, 1, 1], [], []>} : vector<16x44xf32>, vector<44x88xf32>, vector<16x88xf32> -> vector<16x88xf32>
    %127 = arith.addf %122, %126 : vector<16x88xf32>
    %128 = vector.extract_strided_slice %118 {offsets = [32, 0], sizes = [16, 44], strides = [1, 1]} : vector<144x44xf32> to vector<16x44xf32>
    %c2_69 = arith.constant 2 : index
    %c0_70 = arith.constant 0 : index
    %c0_71 = arith.constant 0 : index
    %129 = vector.load %arg4[%c2_69, %c0_70, %c0_71] : memref<9x44x88xf32, #tpu.memory_space<vmem>>, vector<1x44x88xf32>
    %130 = vector.shape_cast %129 : vector<1x44x88xf32> to vector<44x88xf32>
    %cst_72 = arith.constant dense<0.000000e+00> : vector<16x88xf32>
    %131 = tpu.matmul %128, %130, %cst_72 {dimension_numbers = #tpu.dot_dimension_numbers<[1], [0], [0], [1], [0, 0, 1, 1], [], []>} : vector<16x44xf32>, vector<44x88xf32>, vector<16x88xf32> -> vector<16x88xf32>
    %132 = arith.addf %127, %131 : vector<16x88xf32>
    %133 = vector.extract_strided_slice %118 {offsets = [48, 0], sizes = [16, 44], strides = [1, 1]} : vector<144x44xf32> to vector<16x44xf32>
    %c3_73 = arith.constant 3 : index
    %c0_74 = arith.constant 0 : index
    %c0_75 = arith.constant 0 : index
    %134 = vector.load %arg4[%c3_73, %c0_74, %c0_75] : memref<9x44x88xf32, #tpu.memory_space<vmem>>, vector<1x44x88xf32>
    %135 = vector.shape_cast %134 : vector<1x44x88xf32> to vector<44x88xf32>
    %cst_76 = arith.constant dense<0.000000e+00> : vector<16x88xf32>
    %136 = tpu.matmul %133, %135, %cst_76 {dimension_numbers = #tpu.dot_dimension_numbers<[1], [0], [0], [1], [0, 0, 1, 1], [], []>} : vector<16x44xf32>, vector<44x88xf32>, vector<16x88xf32> -> vector<16x88xf32>
    %137 = arith.addf %132, %136 : vector<16x88xf32>
    %138 = vector.extract_strided_slice %118 {offsets = [64, 0], sizes = [16, 44], strides = [1, 1]} : vector<144x44xf32> to vector<16x44xf32>
    %c4_77 = arith.constant 4 : index
    %c0_78 = arith.constant 0 : index
    %c0_79 = arith.constant 0 : index
    %139 = vector.load %arg4[%c4_77, %c0_78, %c0_79] : memref<9x44x88xf32, #tpu.memory_space<vmem>>, vector<1x44x88xf32>
    %140 = vector.shape_cast %139 : vector<1x44x88xf32> to vector<44x88xf32>
    %cst_80 = arith.constant dense<0.000000e+00> : vector<16x88xf32>
    %141 = tpu.matmul %138, %140, %cst_80 {dimension_numbers = #tpu.dot_dimension_numbers<[1], [0], [0], [1], [0, 0, 1, 1], [], []>} : vector<16x44xf32>, vector<44x88xf32>, vector<16x88xf32> -> vector<16x88xf32>
    %142 = arith.addf %137, %141 : vector<16x88xf32>
    %143 = vector.extract_strided_slice %118 {offsets = [80, 0], sizes = [16, 44], strides = [1, 1]} : vector<144x44xf32> to vector<16x44xf32>
    %c5_81 = arith.constant 5 : index
    %c0_82 = arith.constant 0 : index
    %c0_83 = arith.constant 0 : index
    %144 = vector.load %arg4[%c5_81, %c0_82, %c0_83] : memref<9x44x88xf32, #tpu.memory_space<vmem>>, vector<1x44x88xf32>
    %145 = vector.shape_cast %144 : vector<1x44x88xf32> to vector<44x88xf32>
    %cst_84 = arith.constant dense<0.000000e+00> : vector<16x88xf32>
    %146 = tpu.matmul %143, %145, %cst_84 {dimension_numbers = #tpu.dot_dimension_numbers<[1], [0], [0], [1], [0, 0, 1, 1], [], []>} : vector<16x44xf32>, vector<44x88xf32>, vector<16x88xf32> -> vector<16x88xf32>
    %147 = arith.addf %142, %146 : vector<16x88xf32>
    %148 = vector.extract_strided_slice %118 {offsets = [96, 0], sizes = [16, 44], strides = [1, 1]} : vector<144x44xf32> to vector<16x44xf32>
    %c6_85 = arith.constant 6 : index
    %c0_86 = arith.constant 0 : index
    %c0_87 = arith.constant 0 : index
    %149 = vector.load %arg4[%c6_85, %c0_86, %c0_87] : memref<9x44x88xf32, #tpu.memory_space<vmem>>, vector<1x44x88xf32>
    %150 = vector.shape_cast %149 : vector<1x44x88xf32> to vector<44x88xf32>
    %cst_88 = arith.constant dense<0.000000e+00> : vector<16x88xf32>
    %151 = tpu.matmul %148, %150, %cst_88 {dimension_numbers = #tpu.dot_dimension_numbers<[1], [0], [0], [1], [0, 0, 1, 1], [], []>} : vector<16x44xf32>, vector<44x88xf32>, vector<16x88xf32> -> vector<16x88xf32>
    %152 = arith.addf %147, %151 : vector<16x88xf32>
    %153 = vector.extract_strided_slice %118 {offsets = [112, 0], sizes = [16, 44], strides = [1, 1]} : vector<144x44xf32> to vector<16x44xf32>
    %c7_89 = arith.constant 7 : index
    %c0_90 = arith.constant 0 : index
    %c0_91 = arith.constant 0 : index
    %154 = vector.load %arg4[%c7_89, %c0_90, %c0_91] : memref<9x44x88xf32, #tpu.memory_space<vmem>>, vector<1x44x88xf32>
    %155 = vector.shape_cast %154 : vector<1x44x88xf32> to vector<44x88xf32>
    %cst_92 = arith.constant dense<0.000000e+00> : vector<16x88xf32>
    %156 = tpu.matmul %153, %155, %cst_92 {dimension_numbers = #tpu.dot_dimension_numbers<[1], [0], [0], [1], [0, 0, 1, 1], [], []>} : vector<16x44xf32>, vector<44x88xf32>, vector<16x88xf32> -> vector<16x88xf32>
    %157 = arith.addf %152, %156 : vector<16x88xf32>
    %158 = vector.extract_strided_slice %118 {offsets = [128, 0], sizes = [16, 44], strides = [1, 1]} : vector<144x44xf32> to vector<16x44xf32>
    %c8_93 = arith.constant 8 : index
    %c0_94 = arith.constant 0 : index
    %c0_95 = arith.constant 0 : index
    %159 = vector.load %arg4[%c8_93, %c0_94, %c0_95] : memref<9x44x88xf32, #tpu.memory_space<vmem>>, vector<1x44x88xf32>
    %160 = vector.shape_cast %159 : vector<1x44x88xf32> to vector<44x88xf32>
    %cst_96 = arith.constant dense<0.000000e+00> : vector<16x88xf32>
    %161 = tpu.matmul %158, %160, %cst_96 {dimension_numbers = #tpu.dot_dimension_numbers<[1], [0], [0], [1], [0, 0, 1, 1], [], []>} : vector<16x44xf32>, vector<44x88xf32>, vector<16x88xf32> -> vector<16x88xf32>
    %162 = arith.addf %157, %161 : vector<16x88xf32>
    %c0_97 = arith.constant 0 : index
    %c0_98 = arith.constant 0 : index
    %163 = vector.load %arg9[%c0_97, %c0_98] : memref<88x88xf32, #tpu.memory_space<vmem>>, vector<88x88xf32>
    %cst_99 = arith.constant dense<0.000000e+00> : vector<88xf32>
    %164 = vector.multi_reduction <add>, %162, %cst_99 [0] : vector<16x88xf32> to vector<88xf32>
    %165 = vector.shape_cast %164 : vector<88xf32> to vector<1x88xf32>
    %166 = arith.mulf %162, %162 : vector<16x88xf32>
    %cst_100 = arith.constant dense<0.000000e+00> : vector<88xf32>
    %167 = vector.multi_reduction <add>, %166, %cst_100 [0] : vector<16x88xf32> to vector<88xf32>
    %168 = vector.shape_cast %167 : vector<88xf32> to vector<1x88xf32>
    %cst_101 = arith.constant dense<0.000000e+00> : vector<1x88xf32>
    %169 = tpu.matmul %165, %163, %cst_101 {dimension_numbers = #tpu.dot_dimension_numbers<[1], [0], [0], [1], [0, 0, 1, 1], [], []>} : vector<1x88xf32>, vector<88x88xf32>, vector<1x88xf32> -> vector<1x88xf32>
    %cst_102 = arith.constant dense<0.000000e+00> : vector<1x88xf32>
    %170 = tpu.matmul %168, %163, %cst_102 {dimension_numbers = #tpu.dot_dimension_numbers<[1], [0], [0], [1], [0, 0, 1, 1], [], []>} : vector<1x88xf32>, vector<88x88xf32>, vector<1x88xf32> -> vector<1x88xf32>
    %cst_103 = arith.constant 0.055555556 : f32
    %171 = vector.broadcast %cst_103 : f32 to vector<1x88xf32>
    %172 = arith.mulf %169, %171 : vector<1x88xf32>
    %cst_104 = arith.constant 0.055555556 : f32
    %173 = vector.broadcast %cst_104 : f32 to vector<1x88xf32>
    %174 = arith.mulf %170, %173 : vector<1x88xf32>
    %175 = arith.mulf %172, %172 : vector<1x88xf32>
    %176 = arith.subf %174, %175 : vector<1x88xf32>
    %cst_105 = arith.constant 0.000000e+00 : f32
    %177 = vector.broadcast %cst_105 : f32 to vector<1x88xf32>
    %178 = arith.maximumf %176, %177 : vector<1x88xf32>
    %cst_106 = arith.constant 9.99999974E-6 : f32
    %179 = vector.broadcast %cst_106 : f32 to vector<1x88xf32>
    %180 = arith.addf %178, %179 : vector<1x88xf32>
    %181 = math.rsqrt %180 : vector<1x88xf32>
    %182 = arith.mulf %5, %181 : vector<1x88xf32>
    %183 = arith.mulf %172, %182 : vector<1x88xf32>
    %184 = arith.subf %6, %183 : vector<1x88xf32>
    %185 = vector.broadcast %182 : vector<1x88xf32> to vector<16x88xf32>
    %186 = arith.mulf %162, %185 : vector<16x88xf32>
    %187 = vector.broadcast %184 : vector<1x88xf32> to vector<16x88xf32>
    %188 = arith.addf %186, %187 : vector<16x88xf32>
    %cst_107 = arith.constant 0.000000e+00 : f32
    %189 = vector.broadcast %cst_107 : f32 to vector<16x88xf32>
    %190 = arith.maximumf %188, %189 : vector<16x88xf32>
    %cst_108 = arith.constant dense<0.000000e+00> : vector<1x88xf32>
    %191 = tpu.matmul %9, %190, %cst_108 {dimension_numbers = #tpu.dot_dimension_numbers<[1], [0], [0], [1], [0, 0, 1, 1], [], []>} : vector<1x16xf32>, vector<16x88xf32>, vector<1x88xf32> -> vector<1x88xf32>
    %c0_109 = arith.constant 0 : index
    %c0_110 = arith.constant 0 : index
    %192 = vector.load %arg10[%c0_109, %c0_110] : memref<88x44xf32, #tpu.memory_space<vmem>>, vector<88x44xf32>
    %cst_111 = arith.constant dense<0.000000e+00> : vector<1x44xf32>
    %193 = tpu.matmul %191, %192, %cst_111 {dimension_numbers = #tpu.dot_dimension_numbers<[1], [0], [0], [1], [0, 0, 1, 1], [], []>} : vector<1x88xf32>, vector<88x44xf32>, vector<1x44xf32> -> vector<1x44xf32>
    %194 = arith.addf %193, %7 : vector<1x44xf32>
    %c0_112 = arith.constant 0 : index
    %c0_113 = arith.constant 0 : index
    %195 = vector.load %arg11[%c0_112, %c0_113] : memref<44x256xf32, #tpu.memory_space<vmem>>, vector<44x256xf32>
    %cst_114 = arith.constant dense<0.000000e+00> : vector<1x256xf32>
    %196 = tpu.matmul %194, %195, %cst_114 {dimension_numbers = #tpu.dot_dimension_numbers<[1], [0], [0], [1], [0, 0, 1, 1], [], []>} : vector<1x44xf32>, vector<44x256xf32>, vector<1x256xf32> -> vector<1x256xf32>
    %197 = arith.addf %196, %8 : vector<1x256xf32>
    %c0_115 = arith.constant 0 : index
    %c0_116 = arith.constant 0 : index
    %198 = vector.load %arg13[%c0_115, %c0_116] : memref<1x256xf32, #tpu.memory_space<vmem>>, vector<1x256xf32>
    tpu.vector_store %arg13[%c0_115, %c0_116], %197 {strides = array<i32>} : memref<1x256xf32, #tpu.memory_space<vmem>>, vector<1x256xf32>,
    return
  }
  func.func @transform_0(%arg0: i32) -> (i32, i32) {
    %c0_i32 = arith.constant 0 : i32
    %c0_i32_0 = arith.constant 0 : i32
    %c0_i32_1 = arith.constant 0 : i32
    return %c0_i32, %c0_i32_0 : i32, i32
  }
  func.func @transform_1(%arg0: i32) -> (i32, i32) {
    %c0_i32 = arith.constant 0 : i32
    %c0_i32_0 = arith.constant 0 : i32
    %c0_i32_1 = arith.constant 0 : i32
    return %c0_i32, %c0_i32_0 : i32, i32
  }
  func.func @transform_2(%arg0: i32) -> (i32, i32, i32) {
    %c0_i32 = arith.constant 0 : i32
    %c0_i32_0 = arith.constant 0 : i32
    %c0_i32_1 = arith.constant 0 : i32
    %c0_i32_2 = arith.constant 0 : i32
    return %c0_i32, %c0_i32_0, %c0_i32_1 : i32, i32, i32
  }
  func.func @transform_3(%arg0: i32) -> (i32, i32, i32) {
    %c0_i32 = arith.constant 0 : i32
    %c0_i32_0 = arith.constant 0 : i32
    %c0_i32_1 = arith.constant 0 : i32
    %c0_i32_2 = arith.constant 0 : i32
    return %c0_i32, %c0_i32_0, %c0_i32_1 : i32, i32, i32
  }
  func.func @transform_4(%arg0: i32) -> (i32, i32) {
    %c0_i32 = arith.constant 0 : i32
    %c0_i32_0 = arith.constant 0 : i32
    %c0_i32_1 = arith.constant 0 : i32
    return %c0_i32, %c0_i32_0 : i32, i32
  }
  func.func @transform_5(%arg0: i32) -> (i32, i32) {
    %c0_i32 = arith.constant 0 : i32
    %c0_i32_0 = arith.constant 0 : i32
    %c0_i32_1 = arith.constant 0 : i32
    return %c0_i32, %c0_i32_0 : i32, i32
  }
  func.func @transform_6(%arg0: i32) -> (i32, i32) {
    %c0_i32 = arith.constant 0 : i32
    %c0_i32_0 = arith.constant 0 : i32
    %c0_i32_1 = arith.constant 0 : i32
    return %c0_i32, %c0_i32_0 : i32, i32
  }
  func.func @transform_7(%arg0: i32) -> (i32, i32) {
    %c0_i32 = arith.constant 0 : i32
    %c0_i32_0 = arith.constant 0 : i32
    %c0_i32_1 = arith.constant 0 : i32
    return %c0_i32, %c0_i32_0 : i32, i32
  }
  func.func @transform_8(%arg0: i32) -> (i32, i32) {
    %c0_i32 = arith.constant 0 : i32
    %c0_i32_0 = arith.constant 0 : i32
    %c0_i32_1 = arith.constant 0 : i32
    return %c0_i32, %c0_i32_0 : i32, i32
  }
  func.func @transform_9(%arg0: i32) -> (i32, i32) {
    %c0_i32 = arith.constant 0 : i32
    %c0_i32_0 = arith.constant 0 : i32
    %c0_i32_1 = arith.constant 0 : i32
    return %c0_i32, %c0_i32_0 : i32, i32
  }
  func.func @transform_10(%arg0: i32) -> (i32, i32) {
    %c0_i32 = arith.constant 0 : i32
    %c0_i32_0 = arith.constant 0 : i32
    %c0_i32_1 = arith.constant 0 : i32
    return %c0_i32, %c0_i32_0 : i32, i32
  }
  func.func @transform_11(%arg0: i32) -> (i32, i32) {
    %c0_i32 = arith.constant 0 : i32
    %c0_i32_0 = arith.constant 0 : i32
    %c0_i32_1 = arith.constant 0 : i32
    return %c0_i32, %c0_i32_0 : i32, i32
  }
  func.func @transform_12(%arg0: i32) -> (i32, i32) {
    %c0_i32 = arith.constant 0 : i32
    %c0_i32_0 = arith.constant 0 : i32
    %c0_i32_1 = arith.constant 0 : i32
    return %c0_i32, %c0_i32_0 : i32, i32
  }
}

</mosaic_0001>

<bundles_post_ra>
// kernel: mul.36
= control target key start
LH: loop header
LB: loop body
LE: loop exit
PB: predicated region body
PF: predicated region fallthrough
CT: control target
= control target key end

     0   :  { %vm15_vm0 = vcmask 179200   ;;  %s59_s0 = inlined_call_operand.vmem [shape: f32[3,3,22], index: 0, kind: input, shape index: {}]   ;;  %s60_s1 = inlined_call_operand.vmem [shape: f32[9,22], index: 1, kind: output, shape index: {}]  }
   0x1   :  { %v27_v0 = vld [vmem:[%s59_s0 + $0x8] sm:$0xf]  ;;  %v28_v1 = vld [vmem:[%s59_s0 + $0x4] sm:$0xf]  ;;  %v12_v2 = vld [vmem:[%s59_s0] sm:$0xf] }
   0x2   :  { %7 = vst [vmem:[#allocation0] sm:$0xf] %v27_v0 }
   0x3   :  { %11 = vst [vmem:[#allocation0 + $0x10] sm:$0xf] %v28_v1 }
   0x4   :  { %13 = vst [vmem:[#allocation0 + $0x8] sm:$0xf] %v12_v2 }
   0x9   :  { %v23_v3 = vld [vmem:[#allocation0] sm:$0x7]  }
   0xa   :  { %v18_v4 = vld [vmem:[#allocation0 + $0x10] sm:$0x7]   ;;  %30 = vst.msk [vmem:[%s60_s1 + $0x6] sm:$0x7] %vm15_vm0, %v23_v3  }
   0xb   :  { %v14_v5 = vld [vmem:[#allocation0 + $0x8] sm:$0x7]   ;;  %29 = vst.msk [vmem:[%s60_s1 + $0x3] sm:$0x7] %vm15_vm0, %v18_v4  }
   0xc   :  { %16 = vst.msk [vmem:[%s60_s1] sm:$0x7] %vm15_vm0, %v14_v5  }

// kernel: mul.29
= control target key start
LH: loop header
LB: loop body
LE: loop exit
PB: predicated region body
PF: predicated region fallthrough
CT: control target
= control target key end

     0   :  { %vm15_vm0 = vcmask 89088   ;;  %s59_s0 = inlined_call_operand.vmem [shape: f32[3,3,11], index: 0, kind: input, shape index: {}]   ;;  %s60_s1 = inlined_call_operand.vmem [shape: f32[9,11], index: 1, kind: output, shape index: {}]  }
   0x1   :  { %v27_v0 = vld [vmem:[%s59_s0 + $0x8] sm:$0xf]  ;;  %v28_v1 = vld [vmem:[%s59_s0 + $0x4] sm:$0xf]  ;;  %v12_v2 = vld [vmem:[%s59_s0] sm:$0xf] }
   0x2   :  { %7 = vst [vmem:[#allocation0] sm:$0xf] %v27_v0 }
   0x3   :  { %11 = vst [vmem:[#allocation0 + $0x10] sm:$0xf] %v28_v1 }
   0x4   :  { %13 = vst [vmem:[#allocation0 + $0x8] sm:$0xf] %v12_v2 }
   0x9   :  { %v23_v3 = vld [vmem:[#allocation0] sm:$0x7]  }
   0xa   :  { %v18_v4 = vld [vmem:[#allocation0 + $0x10] sm:$0x7]   ;;  %30 = vst.msk [vmem:[%s60_s1 + $0x6] sm:$0x7] %vm15_vm0, %v23_v3  }
   0xb   :  { %v14_v5 = vld [vmem:[#allocation0 + $0x8] sm:$0x7]   ;;  %29 = vst.msk [vmem:[%s60_s1 + $0x3] sm:$0x7] %vm15_vm0, %v18_v4  }
   0xc   :  { %16 = vst.msk [vmem:[%s60_s1] sm:$0x7] %vm15_vm0, %v14_v5  }

// kernel: tile.38
= control target key start
LH: loop header
LB: loop body
LE: loop exit
PB: predicated region body
PF: predicated region fallthrough
CT: control target
= control target key end

     0   :  { %s22_s0 = inlined_call_operand.vmem [shape: f32[11], index: 0, kind: input, shape index: {}]   ;;  %s23_s1 = inlined_call_operand.vmem [shape: f32[2,11], index: 1, kind: output, shape index: {}]  }
   0x1   :  { %v4_v0 = vld [vmem:[%s22_s0] ss:$0 sm:$0xff] }
   0x2   :  { %5 = vst [vmem:[%s23_s1] sm:$0x3] %v4_v0 }

// kernel: tile.48
= control target key start
LH: loop header
LB: loop body
LE: loop exit
PB: predicated region body
PF: predicated region fallthrough
CT: control target
= control target key end

     0   :  { %s22_s0 = inlined_call_operand.vmem [shape: f32[22], index: 0, kind: input, shape index: {}]   ;;  %s23_s1 = inlined_call_operand.vmem [shape: f32[2,22], index: 1, kind: output, shape index: {}]  }
   0x1   :  { %v4_v0 = vld [vmem:[%s22_s0] ss:$0 sm:$0xff] }
   0x2   :  { %5 = vst [vmem:[%s23_s1] sm:$0x3] %v4_v0 }

// kernel: tile.58
= control target key start
LH: loop header
LB: loop body
LE: loop exit
PB: predicated region body
PF: predicated region fallthrough
CT: control target
= control target key end

     0   :  { %s22_s0 = inlined_call_operand.vmem [shape: f32[44], index: 0, kind: input, shape index: {}]   ;;  %s23_s1 = inlined_call_operand.vmem [shape: f32[2,44], index: 1, kind: output, shape index: {}]  }
   0x1   :  { %v4_v0 = vld [vmem:[%s22_s0] ss:$0 sm:$0xff] }
   0x2   :  { %5 = vst [vmem:[%s23_s1] sm:$0x3] %v4_v0 }

// kernel: model_5k_forward.1
= control target key start
LH: loop header
LB: loop body
LE: loop exit
PB: predicated region body
PF: predicated region fallthrough
CT: control target
= control target key end

     0   :  { %vm169_vm0 = vcmask 1045504   ;;  %s4976_s0 = inlined_call_operand.vmem [shape: f32[225,54], index: 0, kind: input, shape index: {}]   ;;  %s4977_s1 = inlined_call_operand.vmem [shape: f32[54,22], index: 1, kind: input, shape index: {}]   ;;  %s4978_s2 = inlined_call_operand.vmem [shape: f32[9,22,44], index: 2, kind: input, shape index: {}]   ;;  %s4979_s3 = inlined_call_operand.vmem [shape: f32[9,44,88], index: 3, kind: input, shape index: {}]   ;;  %s4980_s4 = inlined_call_operand.vmem [shape: bf16[504,225], index: 4, kind: input, shape index: {}]   ;;  %s4981_s5 = inlined_call_operand.vmem [shape: bf16[144,56], index: 5, kind: input, shape index: {}]   ;;  %s4982_s6 = inlined_call_operand.vmem [shape: f32[22,22], index: 6, kind: input, shape index: {}]   ;;  %s4983_s7 = inlined_call_operand.vmem [shape: f32[44,44], index: 7, kind: input, shape index: {}]   ;;  %s4984_s8 = inlined_call_operand.vmem [shape: f32[88,88], index: 8, kind: input, shape index: {}]   ;;  %s4985_s9 = inlined_call_operand.vmem [shape: f32[88,44], index: 9, kind: input, shape index: {}]   ;;  %s4986_s10 = inlined_call_operand.vmem [shape: f32[44,256], index: 10, kind: input, shape index: {}]   ;;  %s4987_s11 = inlined_call_operand.vmem [shape: f32[16,256], index: 11, kind: input, shape index: {}]   ;;  %s4988_s12 = inlined_call_operand.hbm [shape: f32[1,256], index: 12, kind: output, shape index: {}]  }
   0x1   :  { %v80_v0 = vld [vmem:[%s4977_s1 + $0x30] sm:$0x3f]  ;;  %v79_v1 = vld [vmem:[%s4977_s1 + $0x28] sm:$0xff]  ;;  %v78_v2 = vld [vmem:[%s4977_s1 + $0x20] sm:$0xff] }
   0x2   :  { %2980 = vmatpush.msk.msra.mxu0 %vm169_vm0, %v80_v0 }
   0x4   :  { %183 = vmatpush.msra.mxu0 %v79_v1 }
   0x5   :  { %17 = vsyncpa [#allocation3], 0  ;;  %v77_v3 = vld [vmem:[%s4977_s1 + $0x18] sm:$0xff]  ;;  %v76_v4 = vld [vmem:[%s4977_s1 + $0x10] sm:$0xff]  ;;  %vm81_vm1 = vcmask 441344   ;;  %vm280_vm2 = vcmask 179200  }
   0x6   :  { %184 = vmatpush.msra.mxu0 %v78_v2  ;;  %v75_v5 = vld [vmem:[%s4977_s1 + $0x8] sm:$0xff]  ;;  %v74_v6 = vld [vmem:[%s4977_s1] sm:$0xff]  ;;  %v47_v9 = vld [vmem:[%s4976_s0 + $0x10] sm:$0xff]  ;;  %vm336_vm3 = vcmask 172032   ;;  %vm976_vm7 = vcmask 1040384   ;;  %vm786_vm8 = vcmask 793600  }
   0x7   :  { %v45_v7 = vld [vmem:[%s4976_s0] sm:$0xff]  ;;  %v46_v8 = vld [vmem:[%s4976_s0 + $0x8] sm:$0xff]  ;;  %v48_v10 = vld [vmem:[%s4976_s0 + $0x18] sm:$0xff]  ;;  %vm2089_vm9 = vcmask 1043456   ;;  %vm2040_vm10 = vcmask 359424   ;;  %vm2223_vm14 = vcmask 457728  }
   0x8   :  { %185 = vmatpush.msra.mxu0 %v77_v3  ;;  %v49_v11 = vld [vmem:[%s4976_s0 + $0x20] sm:$0xff]  ;;  %v50_v12 = vld [vmem:[%s4976_s0 + $0x28] sm:$0xff]  ;;  %v51_v13 = vld [vmem:[%s4976_s0 + $0x30] sm:$0xff]  ;;  %vm2724_vm15 = vcmask 719872   ;;  %s2971_s23 = sshll.u32 %s4988_s12, 4  ;;  %s2972_s23 = int_to_ptr.hbm [resolvable:$true] %s2971_s23 }
   0x9   :  { %v52_v14 = vld [vmem:[%s4976_s0 + $0x38] sm:$0xff]  ;;  %v53_v15 = vld [vmem:[%s4976_s0 + $0x40] sm:$0xff]  ;;  %v54_v16 = vld [vmem:[%s4976_s0 + $0x48] sm:$0xff] }
   0xa   :  { %186 = vmatpush.msra.mxu0 %v76_v4  ;;  %v55_v17 = vld [vmem:[%s4976_s0 + $0x50] sm:$0xff]  ;;  %v56_v18 = vld [vmem:[%s4976_s0 + $0x58] sm:$0xff]  ;;  %v57_v19 = vld [vmem:[%s4976_s0 + $0x60] sm:$0xff] }
   0xb   :  { %v58_v20 = vld [vmem:[%s4976_s0 + $0x68] sm:$0xff]  ;;  %v59_v21 = vld [vmem:[%s4976_s0 + $0x70] sm:$0xff]  ;;  %v60_v22 = vld [vmem:[%s4976_s0 + $0x78] sm:$0xff] }
   0xc   :  { %187 = vmatpush.msra.mxu0 %v75_v5  ;;  %v61_v24 = vld [vmem:[%s4976_s0 + $0x80] sm:$0xff]  ;;  %v62_v26 = vld [vmem:[%s4976_s0 + $0x88] sm:$0xff]  ;;  %v63_v28 = vld [vmem:[%s4976_s0 + $0x90] sm:$0xff] }
   0xd   :  { %v64_v30 = vld [vmem:[%s4976_s0 + $0x98] sm:$0xff]  ;;  %v65_v32 = vld [vmem:[%s4976_s0 + $0xa0] sm:$0xff]  ;;  %v66_v34 = vld [vmem:[%s4976_s0 + $0xa8] sm:$0xff] }
   0xe   :  { %188 = vmatpush.msra.mxu0 %v74_v6  ;;  %v67_v36 = vld [vmem:[%s4976_s0 + $0xb0] sm:$0xff]  ;;  %v68_v38 = vld [vmem:[%s4976_s0 + $0xb8] sm:$0xff]  ;;  %v69_v40 = vld [vmem:[%s4976_s0 + $0xc0] sm:$0xff] }
   0xf   :  { %2981 = vmatmul.msk.f32.vlgmr.msra.gmra.mxu0 %vm81_vm1, %v45_v7  ;;  %v70_v42 = vld [vmem:[%s4976_s0 + $0xc8] sm:$0xff]  ;;  %v71_v44 = vld [vmem:[%s4976_s0 + $0xd0] sm:$0xff]  ;;  %v72_v46 = vld [vmem:[%s4976_s0 + $0xd8] sm:$0xff] }
  0x10   :  { %v73_v48 = vld [vmem:[%s4976_s0 + $0xe0] sm:$0x1] }
  0x17   :  { %2982 = vmatmul.msk.f32.gmra.mxu0 %vm81_vm1, %v46_v8 }
  0x1f   :  { %2983 = vmatmul.msk.f32.gmra.mxu0 %vm81_vm1, %v47_v9 }
  0x27   :  { %2984 = vmatmul.msk.f32.gmra.mxu0 %vm81_vm1, %v48_v10 }
  0x2f   :  { %2985 = vmatmul.msk.f32.gmra.mxu0 %vm81_vm1, %v49_v11 }
  0x37   :  { %2986 = vmatmul.msk.f32.gmra.mxu0 %vm81_vm1, %v50_v12 }
  0x3f   :  { %2987 = vmatmul.msk.f32.gmra.mxu0 %vm81_vm1, %v51_v13 }
  0x47   :  { %2988 = vmatmul.msk.f32.gmra.mxu0 %vm81_vm1, %v52_v14 }
  0x4f   :  { %2989 = vmatmul.msk.f32.gmra.mxu0 %vm81_vm1, %v53_v15 }
  0x57   :  { %2990 = vmatmul.msk.f32.gmra.mxu0 %vm81_vm1, %v54_v16 }
  0x5f   :  { %2991 = vmatmul.msk.f32.gmra.mxu0 %vm81_vm1, %v55_v17 }
  0x67   :  { %2992 = vmatmul.msk.f32.gmra.mxu0 %vm81_vm1, %v56_v18 }
  0x6f   :  { %2993 = vmatmul.msk.f32.gmra.mxu0 %vm81_vm1, %v57_v19 }
  0x77   :  { %2994 = vmatmul.msk.f32.gmra.mxu0 %vm81_vm1, %v58_v20 }
  0x7f   :  { %2995 = vmatmul.msk.f32.gmra.mxu0 %vm81_vm1, %v59_v21 }
  0x87   :  { %2996 = vmatmul.msk.f32.gmra.mxu0 %vm81_vm1, %v60_v22 }
  0x8c   :  { %v3509_v23 = vpop.f32.mrf.mxu0 }
  0x8d   :  { %v345_v59 = vmul.f32 %v3509_v23, %v3509_v23  ;;  %v281_v62 = vsel %vm280_vm2, %v3509_v23, 0.0 }
  0x8f   :  { %2997 = vmatmul.msk.f32.gmra.mxu0 %vm81_vm1, %v61_v24  ;;  %v374_v3 = vsel %vm280_vm2, %v345_v59, 0.0 }
  0x94   :  { %v3515_v25 = vpop.f32.mrf.mxu0 }
  0x95   :  { %v346_v57 = vmul.f32 %v3515_v25, %v3515_v25  ;;  %v282_v60 = vsel %vm280_vm2, %v3515_v25, 0.0 }
  0x96   :  { %v283_v2 = vadd.f32 %v282_v60, %v281_v62 }
  0x97   :  { %2998 = vmatmul.msk.f32.gmra.mxu0 %vm81_vm1, %v62_v26  ;;  %v375_v63 = vsel %vm280_vm2, %v346_v57, 0.0 }
  0x98   :  { %v376_v7 = vadd.f32 %v375_v63, %v374_v3 }
  0x9c   :  { %v3521_v27 = vpop.f32.mrf.mxu0 }
  0x9d   :  { %v347_v61 = vmul.f32 %v3521_v27, %v3521_v27  ;;  %v284_v0 = vsel %vm280_vm2, %v3521_v27, 0.0 }
  0x9e   :  { %v285_v8 = vadd.f32 %v284_v0, %v283_v2 }
  0x9f   :  { %2999 = vmatmul.msk.f32.gmra.mxu0 %vm81_vm1, %v63_v28  ;;  %v377_v4 = vsel %vm280_vm2, %v347_v61, 0.0 }
  0xa0   :  { %v378_v12 = vadd.f32 %v377_v4, %v376_v7 }
  0xa4   :  { %v3527_v29 = vpop.f32.mrf.mxu0 }
  0xa5   :  { %v348_v1 = vmul.f32 %v3527_v29, %v3527_v29  ;;  %v286_v5 = vsel %vm280_vm2, %v3527_v29, 0.0 }
  0xa6   :  { %v287_v13 = vadd.f32 %v286_v5, %v285_v8 }
  0xa7   :  { %3000 = vmatmul.msk.f32.gmra.mxu0 %vm81_vm1, %v64_v30  ;;  %v379_v9 = vsel %vm280_vm2, %v348_v1, 0.0 }
  0xa8   :  { %v380_v18 = vadd.f32 %v379_v9, %v378_v12 }
  0xac   :  { %v3533_v31 = vpop.f32.mrf.mxu0 }
  0xad   :  { %v349_v6 = vmul.f32 %v3533_v31, %v3533_v31  ;;  %v288_v10 = vsel %vm280_vm2, %v3533_v31, 0.0 }
  0xae   :  { %v289_v19 = vadd.f32 %v288_v10, %v287_v13 }
  0xaf   :  { %3001 = vmatmul.msk.f32.gmra.mxu0 %vm81_vm1, %v65_v32  ;;  %v381_v15 = vsel %vm280_vm2, %v349_v6, 0.0 }
  0xb0   :  { %v382_v24 = vadd.f32 %v381_v15, %v380_v18 }
  0xb4   :  { %v3539_v33 = vpop.f32.mrf.mxu0 }
  0xb5   :  { %v350_v11 = vmul.f32 %v3539_v33, %v3539_v33  ;;  %v290_v16 = vsel %vm280_vm2, %v3539_v33, 0.0 }
  0xb6   :  { %v291_v26 = vadd.f32 %v290_v16, %v289_v19 }
  0xb7   :  { %3002 = vmatmul.msk.f32.gmra.mxu0 %vm81_vm1, %v66_v34  ;;  %v383_v20 = vsel %vm280_vm2, %v350_v11, 0.0 }
  0xb8   :  { %v384_v34 = vadd.f32 %v383_v20, %v382_v24 }
  0xbc   :  { %v3545_v35 = vpop.f32.mrf.mxu0 }
  0xbd   :  { %v351_v17 = vmul.f32 %v3545_v35, %v3545_v35  ;;  %v292_v21 = vsel %vm280_vm2, %v3545_v35, 0.0 }
  0xbf   :  { %3003 = vmatmul.msk.f32.gmra.mxu0 %vm81_vm1, %v67_v36  ;;  %v385_v28 = vsel %vm280_vm2, %v351_v17, 0.0  ;;  %v293_v36 = vadd.f32 %v292_v21, %v291_v26 }
  0xc4   :  { %v3551_v37 = vpop.f32.mrf.mxu0 }
  0xc5   :  { %v352_v22 = vmul.f32 %v3551_v37, %v3551_v37  ;;  %v294_v30 = vsel %vm280_vm2, %v3551_v37, 0.0 }
  0xc7   :  { %3004 = vmatmul.msk.f32.gmra.mxu0 %vm81_vm1, %v68_v38  ;;  %v387_v38 = vsel %vm280_vm2, %v352_v22, 0.0 }
  0xcc   :  { %v3557_v39 = vpop.f32.mrf.mxu0 }
  0xcd   :  { %v353_v32 = vmul.f32 %v3557_v39, %v3557_v39 }
  0xcf   :  { %3005 = vmatmul.msk.f32.gmra.mxu0 %vm81_vm1, %v69_v40  ;;  %v296_v40 = vsel %vm280_vm2, %v3557_v39, 0.0  ;;  %v389_v57 = vsel %vm280_vm2, %v353_v32, 0.0  ;;  %v278_v32 = vld [vmem:[%s4982_s6 + $0x8] sm:$0xff] }
  0xd4   :  { %v3563_v41 = vpop.f32.mrf.mxu0 }
  0xd5   :  { %v298_v59 = vsel %vm280_vm2, %v3563_v41, 0.0 }
  0xd7   :  { %3006 = vmatmul.msk.f32.gmra.mxu0 %vm81_vm1, %v70_v42  ;;  %v354_v42 = vmul.f32 %v3563_v41, %v3563_v41 }
  0xd9   :  { %v391_v63 = vsel %vm280_vm2, %v354_v42, 0.0 }
  0xdc   :  { %v3569_v43 = vpop.f32.mrf.mxu0 }
  0xdd   :  { %v355_v60 = vmul.f32 %v3569_v43, %v3569_v43  ;;  %v300_v0 = vsel %vm280_vm2, %v3569_v43, 0.0 }
  0xdf   :  { %3007 = vmatmul.msk.f32.gmra.mxu0 %vm81_vm1, %v71_v44  ;;  %v386_v44 = vadd.f32 %v385_v28, %v384_v34  ;;  %v393_v4 = vsel %vm280_vm2, %v355_v60, 0.0 }
  0xe1   :  { %v388_v61 = vadd.f32 %v387_v38, %v386_v44  ;;  %v277_v44 = vld [vmem:[%s4982_s6] sm:$0xff] }
  0xe3   :  { %v390_v2 = vadd.f32 %v389_v57, %v388_v61 }
  0xe4   :  { %v3575_v45 = vpop.f32.mrf.mxu0 }
  0xe5   :  { %v356_v1 = vmul.f32 %v3575_v45, %v3575_v45  ;;  %v302_v5 = vsel %vm280_vm2, %v3575_v45, 0.0  ;;  %v392_v7 = vadd.f32 %v391_v63, %v390_v2 }
  0xe7   :  { %3008 = vmatmul.msk.f32.gmra.mxu0 %vm81_vm1, %v72_v46  ;;  %v295_v46 = vadd.f32 %v294_v30, %v293_v36  ;;  %v395_v9 = vsel %vm280_vm2, %v356_v1, 0.0  ;;  %v394_v12 = vadd.f32 %v393_v4, %v392_v7  ;;  %v279_v30 = vld [vmem:[%s4982_s6 + $0x10] sm:$0x3f] }
  0xe8   :  { %3010 = vmatpush.msk.msra.mxu1 %vm169_vm0, %v279_v30  ;;  %3012 = vmatpush.msk.msra.mxu2 %vm169_vm0, %v279_v30 }
  0xe9   :  { %v297_v62 = vadd.f32 %v296_v40, %v295_v46  ;;  %v396_v19 = vadd.f32 %v395_v9, %v394_v12 }
  0xea   :  { %457 = vmatpush.msra.mxu1 %v278_v32  ;;  %480 = vmatpush.msra.mxu2 %v278_v32 }
  0xeb   :  { %v299_v3 = vadd.f32 %v298_v59, %v297_v62 }
  0xec   :  { %v3581_v47 = vpop.f32.mrf.mxu0  ;;  %458 = vmatpush.msra.mxu1 %v277_v44  ;;  %481 = vmatpush.msra.mxu2 %v277_v44 }
  0xed   :  { %v357_v6 = vmul.f32 %v3581_v47, %v3581_v47  ;;  %v301_v8 = vadd.f32 %v300_v0, %v299_v3  ;;  %v304_v10 = vsel %vm280_vm2, %v3581_v47, 0.0 }
  0xef   :  { %3009 = vmatmul.msk.f32.gmra.mxu0 %vm81_vm1, %v73_v48  ;;  %v303_v13 = vadd.f32 %v302_v5, %v301_v8  ;;  %v397_v16 = vsel %vm280_vm2, %v357_v6, 0.0 }
  0xf0   :  { %v398_v26 = vadd.f32 %v397_v16, %v396_v19 }
  0xf1   :  { %v305_v20 = vadd.f32 %v304_v10, %v303_v13 }
  0xf4   :  { %v3587_v49 = vpop.f32.mrf.mxu0 }
  0xf5   :  { %v358_v11 = vmul.f32 %v3587_v49, %v3587_v49  ;;  %v306_v17 = vsel %vm280_vm2, %v3587_v49, 0.0 }
  0xf6   :  { %v307_v28 = vadd.f32 %v306_v17, %v305_v20 }
  0xf7   :  { %v399_v21 = vsel %vm280_vm2, %v358_v11, 0.0 }
  0xf8   :  { %v400_v40 = vadd.f32 %v399_v21, %v398_v26 }
  0xfc   :  { %v3589_v50 = vpop.f32.mrf.mxu0 }
  0xfd   :  { %v359_v18 = vmul.f32 %v3589_v50, %v3589_v50  ;;  %v308_v22 = vsel %vm280_vm2, %v3589_v50, 0.0 }
  0xfe   :  { %v309_v42 = vadd.f32 %v308_v22, %v307_v28 }
  0xff   :  { %v401_v34 = vsel %vm280_vm2, %v359_v18, 0.0 }
 0x100   :  { %v402_v60 = vadd.f32 %v401_v34, %v400_v40 }
 0x104   :  { %v3591_v51 = vpop.f32.mrf.mxu0 }
 0x105   :  { %v360_v24 = vmul.f32 %v3591_v51, %v3591_v51  ;;  %v310_v36 = vsel %vm280_vm2, %v3591_v51, 0.0 }
 0x106   :  { %v311_v61 = vadd.f32 %v310_v36, %v309_v42 }
 0x107   :  { %v403_v46 = vsel %vm280_vm2, %v360_v24, 0.0 }
 0x108   :  { %v404_v2 = vadd.f32 %v403_v46, %v402_v60 }
 0x10c   :  { %v3593_v52 = vpop.f32.mrf.mxu0 }
 0x10d   :  { %v361_v38 = vmul.f32 %v3593_v52, %v3593_v52  ;;  %v312_v57 = vsel %vm280_vm2, %v3593_v52, 0.0 }
 0x10e   :  { %v313_v3 = vadd.f32 %v312_v57, %v311_v61 }
 0x10f   :  { %v405_v63 = vsel %vm280_vm2, %v361_v38, 0.0 }
 0x110   :  { %v406_v7 = vadd.f32 %v405_v63, %v404_v2 }
 0x114   :  { %v3595_v53 = vpop.f32.mrf.mxu0 }
 0x115   :  { %v362_v59 = vmul.f32 %v3595_v53, %v3595_v53  ;;  %v314_v0 = vsel %vm280_vm2, %v3595_v53, 0.0 }
 0x116   :  { %v315_v8 = vadd.f32 %v314_v0, %v313_v3 }
 0x117   :  { %v407_v4 = vsel %vm280_vm2, %v362_v59, 0.0 }
 0x118   :  { %v408_v12 = vadd.f32 %v407_v4, %v406_v7 }
 0x11c   :  { %v3597_v54 = vpop.f32.mrf.mxu0 }
 0x11d   :  { %v363_v1 = vmul.f32 %v3597_v54, %v3597_v54  ;;  %v316_v5 = vsel %vm280_vm2, %v3597_v54, 0.0 }
 0x11e   :  { %v317_v13 = vadd.f32 %v316_v5, %v315_v8 }
 0x11f   :  { %v409_v9 = vsel %vm280_vm2, %v363_v1, 0.0 }
 0x120   :  { %v410_v19 = vadd.f32 %v409_v9, %v408_v12 }
 0x124   :  { %v3599_v55 = vpop.f32.mrf.mxu0 }
 0x125   :  { %v364_v6 = vmul.f32 %v3599_v55, %v3599_v55  ;;  %v318_v10 = vsel %vm280_vm2, %v3599_v55, 0.0 }
 0x126   :  { %v319_v20 = vadd.f32 %v318_v10, %v317_v13 }
 0x127   :  { %v411_v16 = vsel %vm280_vm2, %v364_v6, 0.0 }
 0x128   :  { %v412_v28 = vadd.f32 %v411_v16, %v410_v19 }
 0x12c   :  { %v3601_v56 = vpop.f32.mrf.mxu0 }
 0x12d   :  { %v365_v11 = vmul.f32 %v3601_v56, %v3601_v56  ;;  %v320_v17 = vsel %vm280_vm2, %v3601_v56, 0.0 }
 0x12e   :  { %v321_v30 = vadd.f32 %v320_v17, %v319_v20 }
 0x12f   :  { %v413_v22 = vsel %vm280_vm2, %v365_v11, 0.0 }
 0x130   :  { %v414_v38 = vadd.f32 %v413_v22, %v412_v28 }
 0x134   :  { %v3605_v58 = vpop.f32.mrf.mxu0 }
 0x135   :  { %v366_v18 = vmul.f32 %v3605_v58, %v3605_v58  ;;  %v322_v24 = vsel %vm280_vm2, %v3605_v58, 0.0 }
 0x136   :  { %v323_v40 = vadd.f32 %v322_v24, %v321_v30 }
 0x137   :  { %v415_v32 = vsel %vm280_vm2, %v366_v18, 0.0 }
 0x138   :  { %v416_v57 = vadd.f32 %v415_v32, %v414_v38 }
 0x13c   :  { %v3631_v14 = vpop.f32.mrf.mxu0 }
 0x13d   :  { %v367_v26 = vmul.f32 %v3631_v14, %v3631_v14  ;;  %v324_v34 = vsel %vm280_vm2, %v3631_v14, 0.0 }
 0x13e   :  { %v325_v59 = vadd.f32 %v324_v34, %v323_v40 }
 0x13f   :  { %v417_v42 = vsel %vm280_vm2, %v367_v26, 0.0 }
 0x140   :  { %v418_v0 = vadd.f32 %v417_v42, %v416_v57 }
 0x144   :  { %v3653_v48 = vpop.f32.mrf.mxu0 }
 0x145   :  { %v368_v36 = vmul.f32 %v3653_v48, %v3653_v48  ;;  %v326_v44 = vsel %vm280_vm2, %v3653_v48, 0.0 }
 0x146   :  { %v327_v1 = vadd.f32 %v326_v44, %v325_v59 }
 0x147   :  { %v419_v60 = vsel %vm280_vm2, %v368_v36, 0.0 }
 0x148   :  { %v420_v6 = vadd.f32 %v419_v60, %v418_v0 }
 0x14c   :  { %v3675_v15 = vpop.f32.mrf.mxu0 }
 0x14d   :  { %v369_v46 = vmul.f32 %v3675_v15, %v3675_v15  ;;  %v328_v61 = vsel %vm280_vm2, %v3675_v15, 0.0 }
 0x14e   :  { %v329_v7 = vadd.f32 %v328_v61, %v327_v1 }
 0x14f   :  { %v421_v3 = vsel %vm280_vm2, %v369_v46, 0.0 }
 0x150   :  { %v422_v11 = vadd.f32 %v421_v3, %v420_v6 }
 0x154   :  { %v3708_v62 = vpop.f32.mrf.mxu0 }
 0x155   :  { %v370_v63 = vmul.f32 %v3708_v62, %v3708_v62  ;;  %v330_v4 = vsel %vm280_vm2, %v3708_v62, 0.0 }
 0x156   :  { %v331_v12 = vadd.f32 %v330_v4, %v329_v7 }
 0x157   :  { %v423_v8 = vsel %vm280_vm2, %v370_v63, 0.0 }
 0x158   :  { %v424_v17 = vadd.f32 %v423_v8, %v422_v11 }
 0x15c   :  { %v3730_v21 = vpop.f32.mrf.mxu0 }
 0x15d   :  { %v371_v5 = vmul.f32 %v3730_v21, %v3730_v21  ;;  %v332_v9 = vsel %vm280_vm2, %v3730_v21, 0.0 }
 0x15e   :  { %v333_v18 = vadd.f32 %v332_v9, %v331_v12 }
 0x15f   :  { %v425_v13 = vsel %vm280_vm2, %v371_v5, 0.0 }
 0x160   :  { %v426_v20 = vadd.f32 %v425_v13, %v424_v17 }
 0x164   :  { %v3752_v2 = vpop.f32.mrf.mxu0 }
 0x165   :  { %v372_v10 = vmul.f32 %v3752_v2, %v3752_v2  ;;  %v334_v16 = vsel %vm280_vm2, %v3752_v2, 0.0 }
 0x166   :  { %v335_v22 = vadd.f32 %v334_v16, %v333_v18  ;;  %v42_v18 = vld [vmem:[%s4987_s11] sm:$0xff] }
 0x167   :  { %v427_v19 = vsel %vm280_vm2, %v372_v10, 0.0 }
 0x168   :  { %v428_v30 = vadd.f32 %v427_v19, %v426_v20 }
 0x16c   :  { %v274_v24 = vpop.f32.mrf.mxu0 }
 0x16d   :  { %v337_v26 = vsel %vm336_vm3, %v274_v24, 0.0  ;;  %v373_v28 = vmul.f32 %v274_v24, %v274_v24 }
 0x16e   :  { %v338_v32 = vadd.f32 %v337_v26, %v335_v22 }
 0x16f   :  { %v429_v34 = vsel %vm336_vm3, %v373_v28, 0.0  ;;  %vm2827_vm3 = vcmask 130048  }
 0x170   :  { %v339_v36 = vrot.slane %v338_v32, 4  ;;  %v430_v38 = vadd.f32 %v429_v34, %v428_v30 }
 0x172   :  { %v340_v40 = vadd.f32 %v339_v36, %v338_v32  ;;  %v431_v42 = vrot.slane %v430_v38, 4 }
 0x174   :  { %v341_v44 = vrot.slane %v340_v40, 2  ;;  %v432_v46 = vadd.f32 %v431_v42, %v430_v38 }
 0x176   :  { %v342_v57 = vadd.f32 %v341_v44, %v340_v40  ;;  %v433_v59 = vrot.slane %v432_v46, 2 }
 0x178   :  { %v343_v60 = vrot.slane %v342_v57, 1  ;;  %v434_v61 = vadd.f32 %v433_v59, %v432_v46 }
 0x17a   :  { %v344_v63 = vadd.f32 %v343_v60, %v342_v57  ;;  %v435_v0 = vrot.slane %v434_v61, 1 }
 0x17c   :  { %3011 = vmatmul.msk.f32.vlgmr.msra.gmra.mxu1 %vm280_vm2, %v344_v63  ;;  %v436_v1 = vadd.f32 %v435_v0, %v434_v61 }
 0x17e   :  { %3013 = vmatmul.msk.f32.vlgmr.msra.gmra.mxu2 %vm280_vm2, %v436_v1 }
 0x1f9   :  { %v460_v3 = vpop.f32.mrf.mxu1 }
 0x1fa   :  { %v486_v4 = vmul.f32 0.0022222223, %v460_v3 }
 0x1fc   :  { %v488_v6 = vmul.f32 %v486_v4, %v486_v4 }
 0x201   :  { %v483_v5 = vpop.f32.mrf.mxu2 }
 0x202   :  { %v487_v7 = vmul.f32 0.0022222223, %v483_v5 }
 0x204   :  { %v489_v8 = vsub.f32 %v487_v7, %v488_v6 }
 0x206   :  { %v490_v9 = vmax.f32 %v489_v8, 0.0 }
 0x208   :  { %v491_v10 = vadd.f32 1e-05, %v490_v9 }
 0x20a   :  { %3324 = vrsqrt.f32 %v491_v10  ;;  %vm498_vm5 = vweird.f32 %v491_v10 }
 0x210   :  { %v3325_v11 = vpop.eup %3324 }
 0x211   :  { %v493_v12 = vmul.f32 %v3325_v11, %v491_v10  ;;  %vm499_vm4 = vweird.f32 %v3325_v11 }
 0x212   :  { %vm500_vm6 = vmor %vm498_vm5, %vm499_vm4 }
 0x213   :  { %v494_v13 = vmul.f32 %v3325_v11, %v493_v12 }
 0x215   :  { %v495_v16 = vmul.f32 0.5, %v494_v13 }
 0x217   :  { %v496_v17 = vsub.f32 1.5, %v495_v16 }
 0x219   :  { %v497_v19 = vmul.f32 %v3325_v11, %v496_v17 }
 0x21b   :  { %v501_v20 = vsel %vm500_vm6, %v3325_v11, %v497_v19 }
 0x21c   :  { %v502_v22 = vmul.f32 %v501_v20, %v42_v18 }
 0x21e   :  { %v503_v26 = vmul.f32 %v502_v22, %v486_v4  ;;  %v3773_v28 = vperm.slane %v502_v22, 0 }
 0x220   :  { %v505_v30 = vrot.slane %v503_v26, 7  ;;  %v524_v34 = vmul.f32 %v3773_v28, %v3591_v51  ;;  %v537_v38 = vmul.f32 %v3773_v28, %v274_v24  ;;  %v523_v40 = vmul.f32 %v3773_v28, %v3589_v50 }
 0x221   :  { %v536_v42 = vmul.f32 %v3773_v28, %v3752_v2  ;;  %v522_v44 = vmul.f32 %v3773_v28, %v3587_v49  ;;  %v535_v46 = vmul.f32 %v3773_v28, %v3730_v21  ;;  %v521_v50 = vmul.f32 %v3773_v28, %v3581_v47 }
 0x222   :  { %v507_v32 = vsub.f32 %v42_v18, %v505_v30  ;;  %v534_v2 = vmul.f32 %v3773_v28, %v3708_v62  ;;  %v520_v63 = vmul.f32 %v3773_v28, %v3575_v45  ;;  %v533_v0 = vmul.f32 %v3773_v28, %v3675_v15 }
 0x223   :  { %v519_v4 = vmul.f32 %v3773_v28, %v3569_v43  ;;  %v532_v5 = vmul.f32 %v3773_v28, %v3653_v48  ;;  %v518_v8 = vmul.f32 %v3773_v28, %v3563_v41  ;;  %v531_v9 = vmul.f32 %v3773_v28, %v3631_v14 }
 0x224   :  { %v3777_v36 = vperm.slane %v507_v32, 1  ;;  %v517_v12 = vmul.f32 %v3773_v28, %v3557_v39  ;;  %v530_v13 = vmul.f32 %v3773_v28, %v3605_v58  ;;  %v516_v18 = vmul.f32 %v3773_v28, %v3551_v37 }
 0x225   :  { %v529_v19 = vmul.f32 %v3773_v28, %v3601_v56  ;;  %v515_v26 = vmul.f32 %v3773_v28, %v3545_v35  ;;  %v528_v30 = vmul.f32 %v3773_v28, %v3599_v55  ;;  %v527_v55 = vmul.f32 %v3773_v28, %v3597_v54 }
 0x226   :  { %v554_v57 = vadd.f32 %v3777_v36, %v524_v34  ;;  %v567_v51 = vadd.f32 %v3777_v36, %v537_v38  ;;  %v553_v59 = vadd.f32 %v3777_v36, %v523_v40  ;;  %v566_v24 = vadd.f32 %v3777_v36, %v536_v42 }
 0x227   :  { %v552_v61 = vadd.f32 %v3777_v36, %v522_v44  ;;  %v565_v21 = vadd.f32 %v3777_v36, %v535_v46  ;;  %v551_v3 = vadd.f32 %v3777_v36, %v521_v50  ;;  %v564_v62 = vadd.f32 %v3777_v36, %v534_v2 }
 0x228   :  { %v583_v60 = vmax.f32 %v554_v57, 0.0  ;;  %v596_v49 = vmax.f32 %v567_v51, 0.0  ;;  %v582_v1 = vmax.f32 %v553_v59, 0.0  ;;  %v595_v47 = vmax.f32 %v566_v24, 0.0 }
 0x229   :  { %v581_v45 = vmax.f32 %v552_v61, 0.0  ;;  %v594_v6 = vmax.f32 %v565_v21, 0.0  ;;  %v550_v15 = vadd.f32 %v3777_v36, %v520_v63  ;;  %v563_v7 = vadd.f32 %v3777_v36, %v533_v0 }
 0x22a   :  { %980 = vmatpush.msra.mxu3 %v583_v60  ;;  %3014 = vmatpush.msk.msrb.mxu1 %vm976_vm7, %v596_v49  ;;  %v580_v43 = vmax.f32 %v551_v3, 0.0  ;;  %v593_v10 = vmax.f32 %v564_v62, 0.0  ;;  %v549_v48 = vadd.f32 %v3777_v36, %v519_v4  ;;  %v562_v11 = vadd.f32 %v3777_v36, %v532_v5  ;;  %v597_v3 = vld [vmem:[%s4980_s4] sm:$0xff] }
 0x22b   :  { %v579_v41 = vmax.f32 %v550_v15, 0.0  ;;  %v592_v16 = vmax.f32 %v563_v7, 0.0  ;;  %v548_v14 = vadd.f32 %v3777_v36, %v518_v8  ;;  %v561_v17 = vadd.f32 %v3777_v36, %v531_v9 }
 0x22c   :  { %981 = vmatpush.msra.mxu3 %v582_v1  ;;  %1190 = vmatpush.msrb.mxu1 %v595_v47  ;;  %v578_v39 = vmax.f32 %v549_v48, 0.0  ;;  %v591_v20 = vmax.f32 %v562_v11, 0.0  ;;  %v547_v58 = vadd.f32 %v3777_v36, %v517_v12  ;;  %v560_v22 = vadd.f32 %v3777_v36, %v530_v13  ;;  %v600_v48 = vld [vmem:[%s4980_s4 + $0x18] sm:$0xff]  ;;  %v601_v13 = vld [vmem:[%s4980_s4 + $0x20] sm:$0xff] }
 0x22d   :  { %v577_v37 = vmax.f32 %v548_v14, 0.0  ;;  %v590_v32 = vmax.f32 %v561_v17, 0.0  ;;  %v546_v56 = vadd.f32 %v3777_v36, %v516_v18  ;;  %v559_v34 = vadd.f32 %v3777_v36, %v529_v19  ;;  %v602_v14 = vld [vmem:[%s4980_s4 + $0x28] sm:$0xff]  ;;  %v603_v19 = vld [vmem:[%s4980_s4 + $0x30] sm:$0xff] }
 0x22e   :  { %982 = vmatpush.msra.mxu3 %v581_v45  ;;  %1191 = vmatpush.msrb.mxu1 %v594_v6  ;;  %v545_v38 = vadd.f32 %v3777_v36, %v515_v26  ;;  %v514_v40 = vmul.f32 %v3773_v28, %v3539_v33  ;;  %v576_v42 = vmax.f32 %v547_v58, 0.0  ;;  %v589_v35 = vmax.f32 %v560_v22, 0.0  ;;  %v604_v58 = vld [vmem:[%s4980_s4 + $0x38] sm:$0xff] }
 0x22f   :  { %v558_v44 = vadd.f32 %v3777_v36, %v528_v30  ;;  %v513_v57 = vmul.f32 %v3773_v28, %v3533_v31  ;;  %v575_v51 = vmax.f32 %v546_v56, 0.0  ;;  %v588_v59 = vmax.f32 %v559_v34, 0.0  ;;  %v605_v30 = vld [vmem:[%s4980_s4 + $0x40] sm:$0xff]  ;;  %v606_v56 = vld [vmem:[%s4980_s4 + $0x48] sm:$0xff] }
 0x230   :  { %983 = vmatpush.msra.mxu3 %v580_v43  ;;  %1192 = vmatpush.msrb.mxu1 %v593_v10  ;;  %v544_v46 = vadd.f32 %v3777_v36, %v514_v40  ;;  %v557_v33 = vadd.f32 %v3777_v36, %v527_v55  ;;  %v526_v24 = vmul.f32 %v3773_v28, %v3595_v53  ;;  %v574_v50 = vmax.f32 %v545_v38, 0.0  ;;  %v607_v40 = vld [vmem:[%s4980_s4 + $0x50] sm:$0xff] }
 0x231   :  { %v543_v2 = vadd.f32 %v3777_v36, %v513_v57  ;;  %v587_v54 = vmax.f32 %v558_v44, 0.0  ;;  %v512_v31 = vmul.f32 %v3773_v28, %v3527_v29  ;;  %v525_v49 = vmul.f32 %v3773_v28, %v3593_v52  ;;  %v608_v44 = vld [vmem:[%s4980_s4 + $0x58] sm:$0xff]  ;;  %v609_v57 = vld [vmem:[%s4980_s4 + $0x60] sm:$0xff] }
 0x232   :  { %984 = vmatpush.msra.mxu3 %v579_v41  ;;  %1193 = vmatpush.msrb.mxu1 %v592_v16  ;;  %v556_v60 = vadd.f32 %v3777_v36, %v526_v24  ;;  %v573_v61 = vmax.f32 %v544_v46, 0.0  ;;  %v586_v21 = vmax.f32 %v557_v33, 0.0  ;;  %v511_v0 = vmul.f32 %v3773_v28, %v3521_v27  ;;  %v610_v33 = vld [vmem:[%s4980_s4 + $0x68] sm:$0xff] }
 0x233   :  { %v542_v53 = vadd.f32 %v3777_v36, %v512_v31  ;;  %v555_v63 = vadd.f32 %v3777_v36, %v525_v49  ;;  %v572_v1 = vmax.f32 %v543_v2, 0.0  ;;  %v510_v52 = vmul.f32 %v3773_v28, %v3515_v25  ;;  %v611_v2 = vld [vmem:[%s4980_s4 + $0x70] sm:$0xff]  ;;  %v612_v31 = vld [vmem:[%s4980_s4 + $0x78] sm:$0xff] }
 0x234   :  { %985 = vmatpush.msra.mxu3 %v578_v39  ;;  %1194 = vmatpush.msrb.mxu1 %v591_v20  ;;  %v585_v47 = vmax.f32 %v556_v60, 0.0  ;;  %v541_v29 = vadd.f32 %v3777_v36, %v511_v0  ;;  %v509_v62 = vmul.f32 %v3773_v28, %v3509_v23  ;;  %v661_v4 = vunpack.c.h.bf16 %v597_v3  ;;  %v598_v28 = vld [vmem:[%s4980_s4 + $0x8] sm:$0xff] }
 0x235   :  { %v571_v27 = vmax.f32 %v542_v53, 0.0  ;;  %v584_v5 = vmax.f32 %v555_v63, 0.0  ;;  %v540_v45 = vadd.f32 %v3777_v36, %v510_v52  ;;  %v660_v7 = vunpack.c.l.bf16 %v597_v3 }
 0x236   :  { %986 = vmatpush.msra.mxu3 %v577_v37  ;;  %1195 = vmatpush.msrb.mxu1 %v590_v32  ;;  %v570_v6 = vmax.f32 %v541_v29, 0.0  ;;  %v539_v25 = vadd.f32 %v3777_v36, %v509_v62  ;;  %v663_v8 = vunpack.c.h.bf16 %v598_v28  ;;  %v662_v9 = vunpack.c.l.bf16 %v598_v28  ;;  %v599_v36 = vld [vmem:[%s4980_s4 + $0x10] sm:$0xff] }
 0x237   :  { %v569_v15 = vmax.f32 %v540_v45, 0.0  ;;  %v665_v43 = vunpack.c.h.bf16 %v599_v36  ;;  %v664_v10 = vunpack.c.l.bf16 %v599_v36  ;;  %v667_v11 = vunpack.c.h.bf16 %v600_v48  ;;  %v617_v36 = vld [vmem:[%s4980_s4 + $0xa0] sm:$0xff] }
 0x238   :  { %987 = vmatpush.msra.mxu3 %v576_v42  ;;  %1196 = vmatpush.msrb.mxu1 %v589_v35  ;;  %v568_v23 = vmax.f32 %v539_v25, 0.0  ;;  %v666_v12 = vunpack.c.l.bf16 %v600_v48  ;;  %v669_v41 = vunpack.c.h.bf16 %v601_v13  ;;  %v668_v16 = vunpack.c.l.bf16 %v601_v13  ;;  %v3080_v48 = vld [vmem:[%s4978_s2 + $0x28] sm:$0x3f] }
 0x239   :  { %v671_v17 = vunpack.c.h.bf16 %v602_v14  ;;  %v670_v18 = vunpack.c.l.bf16 %v602_v14  ;;  %v673_v39 = vunpack.c.h.bf16 %v603_v19  ;;  %v672_v20 = vunpack.c.l.bf16 %v603_v19  ;;  %3081 = vmatpush.msk.msrb.mxu2 %vm169_vm0, %v3080_v48  ;;  %v618_v14 = vld [vmem:[%s4980_s4 + $0xa8] sm:$0xff] }
 0x23a   :  { %988 = vmatpush.msra.mxu3 %v575_v51  ;;  %1197 = vmatpush.msrb.mxu1 %v588_v59  ;;  %v675_v22 = vunpack.c.h.bf16 %v604_v58  ;;  %v674_v26 = vunpack.c.l.bf16 %v604_v58  ;;  %v677_v37 = vunpack.c.h.bf16 %v605_v30  ;;  %v676_v32 = vunpack.c.l.bf16 %v605_v30  ;;  %v619_v58 = vld [vmem:[%s4980_s4 + $0xb0] sm:$0xff] }
 0x23b   :  { %v679_v34 = vunpack.c.h.bf16 %v606_v56  ;;  %v678_v38 = vunpack.c.l.bf16 %v606_v56  ;;  %v681_v42 = vunpack.c.h.bf16 %v607_v40  ;;  %v680_v35 = vunpack.c.l.bf16 %v607_v40  ;;  %v620_v56 = vld [vmem:[%s4980_s4 + $0xb8] sm:$0xff] }
 0x23c   :  { %989 = vmatpush.msra.mxu3 %v574_v50  ;;  %1198 = vmatpush.msrb.mxu1 %v587_v54  ;;  %v683_v55 = vunpack.c.h.bf16 %v608_v44  ;;  %v682_v46 = vunpack.c.l.bf16 %v608_v44  ;;  %v685_v51 = vunpack.c.h.bf16 %v609_v57  ;;  %v684_v59 = vunpack.c.l.bf16 %v609_v57  ;;  %v621_v44 = vld [vmem:[%s4980_s4 + $0xc0] sm:$0xff] }
 0x23d   :  { %v687_v24 = vunpack.c.h.bf16 %v610_v33  ;;  %v686_v50 = vunpack.c.l.bf16 %v610_v33  ;;  %v689_v54 = vunpack.c.h.bf16 %v611_v2  ;;  %v688_v60 = vunpack.c.l.bf16 %v611_v2  ;;  %v622_v33 = vld [vmem:[%s4980_s4 + $0xc8] sm:$0xff] }
 0x23e   :  { %990 = vmatpush.msra.mxu3 %v573_v61  ;;  %1199 = vmatpush.msrb.mxu1 %v586_v21  ;;  %v691_v49 = vunpack.c.h.bf16 %v612_v31  ;;  %v690_v61 = vunpack.c.l.bf16 %v612_v31  ;;  %v613_v21 = vld [vmem:[%s4980_s4 + $0x80] sm:$0xff]  ;;  %v700_v13 = vunpack.c.l.bf16 %v617_v36  ;;  %v623_v31 = vld [vmem:[%s4980_s4 + $0xd0] sm:$0xff] }
 0x23f   :  { %v693_v53 = vunpack.c.h.bf16 %v613_v21  ;;  %v692_v0 = vunpack.c.l.bf16 %v613_v21 }
 0x240   :  { %991 = vmatpush.msra.mxu3 %v572_v1  ;;  %1200 = vmatpush.msrb.mxu1 %v585_v47  ;;  %v614_v1 = vld [vmem:[%s4980_s4 + $0x88] sm:$0xff] }
 0x241   :  { %v695_v47 = vunpack.c.h.bf16 %v614_v1  ;;  %v694_v62 = vunpack.c.l.bf16 %v614_v1 }
 0x242   :  { %992 = vmatpush.msra.mxu3 %v571_v27  ;;  %1201 = vmatpush.msrb.mxu1 %v584_v5 }
 0x243   :  { %3015 = vmatmul.msk.f32.vlgmr.msrb.gmra.mxu1 %vm786_vm8, %v661_v4  ;;  %v615_v4 = vld [vmem:[%s4980_s4 + $0x90] sm:$0xff] }
 0x244   :  { %993 = vmatpush.msra.mxu3 %v570_v6  ;;  %v697_v27 = vunpack.c.h.bf16 %v615_v4  ;;  %v696_v25 = vunpack.c.l.bf16 %v615_v4 }
 0x246   :  { %994 = vmatpush.msra.mxu3 %v569_v15  ;;  %v616_v15 = vld [vmem:[%s4980_s4 + $0x98] sm:$0xff] }
 0x248   :  { %995 = vmatpush.msra.mxu3 %v568_v23 }
 0x249   :  { %996 = vmatmul.f32.vlgmr.msra.gmra.mxu3 %v660_v7  ;;  %v699_v7 = vunpack.c.h.bf16 %v616_v15 }
 0x24b   :  { %3016 = vmatmul.msk.f32.gmra.mxu1 %vm786_vm8, %v663_v8 }
 0x251   :  { %999 = vmatmul.f32.gmra.mxu3 %v662_v9  ;;  %v698_v9 = vunpack.c.l.bf16 %v616_v15 }
 0x253   :  { %3017 = vmatmul.msk.f32.gmra.mxu1 %vm786_vm8, %v665_v43  ;;  %v701_v43 = vunpack.c.h.bf16 %v617_v36 }
 0x259   :  { %1002 = vmatmul.f32.gmra.mxu3 %v664_v10 }
 0x25b   :  { %3018 = vmatmul.msk.f32.gmra.mxu1 %vm786_vm8, %v667_v11 }
 0x261   :  { %1005 = vmatmul.f32.gmra.mxu3 %v666_v12 }
 0x263   :  { %3019 = vmatmul.msk.f32.gmra.mxu1 %vm786_vm8, %v669_v41  ;;  %v3079_v41 = vld [vmem:[%s4978_s2 + $0x20] sm:$0xff] }
 0x264   :  { %1437 = vmatpush.msrb.mxu2 %v3079_v41 }
 0x269   :  { %1008 = vmatmul.f32.gmra.mxu3 %v668_v16  ;;  %v3078_v16 = vld [vmem:[%s4978_s2 + $0x18] sm:$0xff] }
 0x26a   :  { %1438 = vmatpush.msrb.mxu2 %v3078_v16 }
 0x26b   :  { %3020 = vmatmul.msk.f32.gmra.mxu1 %vm786_vm8, %v671_v17  ;;  %v703_v17 = vunpack.c.h.bf16 %v618_v14 }
 0x271   :  { %1011 = vmatmul.f32.gmra.mxu3 %v670_v18 }
 0x273   :  { %3021 = vmatmul.msk.f32.gmra.mxu1 %vm786_vm8, %v673_v39 }
 0x279   :  { %1014 = vmatmul.f32.gmra.mxu3 %v672_v20  ;;  %v702_v20 = vunpack.c.l.bf16 %v618_v14 }
 0x27b   :  { %3022 = vmatmul.msk.f32.gmra.mxu1 %vm786_vm8, %v675_v22  ;;  %v705_v22 = vunpack.c.h.bf16 %v619_v58 }
 0x281   :  { %1017 = vmatmul.f32.gmra.mxu3 %v674_v26 }
 0x283   :  { %3023 = vmatmul.msk.f32.gmra.mxu1 %vm786_vm8, %v677_v37 }
 0x289   :  { %1020 = vmatmul.f32.gmra.mxu3 %v676_v32  ;;  %v704_v32 = vunpack.c.l.bf16 %v619_v58 }
 0x28b   :  { %3024 = vmatmul.msk.f32.gmra.mxu1 %vm786_vm8, %v679_v34  ;;  %v707_v34 = vunpack.c.h.bf16 %v620_v56 }
 0x291   :  { %1023 = vmatmul.f32.gmra.mxu3 %v678_v38 }
 0x293   :  { %3025 = vmatmul.msk.f32.gmra.mxu1 %vm786_vm8, %v681_v42 }
 0x299   :  { %1026 = vmatmul.f32.gmra.mxu3 %v680_v35  ;;  %v706_v35 = vunpack.c.l.bf16 %v620_v56 }
 0x29b   :  { %3026 = vmatmul.msk.f32.gmra.mxu1 %vm786_vm8, %v683_v55  ;;  %v709_v55 = vunpack.c.h.bf16 %v621_v44 }
 0x2a1   :  { %1029 = vmatmul.f32.gmra.mxu3 %v682_v46 }
 0x2a3   :  { %3027 = vmatmul.msk.f32.gmra.mxu1 %vm786_vm8, %v685_v51 }
 0x2a9   :  { %1032 = vmatmul.f32.gmra.mxu3 %v684_v59  ;;  %v708_v59 = vunpack.c.l.bf16 %v621_v44 }
 0x2ab   :  { %3028 = vmatmul.msk.f32.gmra.mxu1 %vm786_vm8, %v687_v24  ;;  %v711_v24 = vunpack.c.h.bf16 %v622_v33 }
 0x2b1   :  { %1035 = vmatmul.f32.gmra.mxu3 %v686_v50 }
 0x2b3   :  { %3029 = vmatmul.msk.f32.gmra.mxu1 %vm786_vm8, %v689_v54 }
 0x2b9   :  { %1038 = vmatmul.f32.gmra.mxu3 %v688_v60  ;;  %v710_v60 = vunpack.c.l.bf16 %v622_v33 }
 0x2bb   :  { %3030 = vmatmul.msk.f32.gmra.mxu1 %vm786_vm8, %v691_v49  ;;  %v713_v49 = vunpack.c.h.bf16 %v623_v31 }
 0x2c0   :  { %v1203_v63 = vpop.f32.mrf.mxu1 }
 0x2c1   :  { %1041 = vmatmul.f32.gmra.mxu3 %v690_v61 }
 0x2c3   :  { %3031 = vmatmul.msk.f32.gmra.mxu1 %vm786_vm8, %v693_v53 }
 0x2c8   :  { %v1206_v29 = vpop.f32.mrf.mxu1 }
 0x2c9   :  { %1044 = vmatmul.f32.gmra.mxu3 %v692_v0  ;;  %v624_v0 = vld [vmem:[%s4980_s4 + $0xd8] sm:$0xff] }
 0x2ca   :  { %v715_v1 = vunpack.c.h.bf16 %v624_v0  ;;  %v714_v4 = vunpack.c.l.bf16 %v624_v0  ;;  %v634_v0 = vld [vmem:[%s4980_s4 + $0x128] sm:$0xff] }
 0x2cb   :  { %3032 = vmatmul.msk.f32.gmra.mxu1 %vm786_vm8, %v695_v47 }
 0x2cc   :  { %v997_v52 = vpop.f32.mrf.mxu3 }
 0x2cd   :  { %v3936_v3 = vadd.f32 %v1203_v63, %v997_v52  ;;  %v712_v63 = vunpack.c.l.bf16 %v623_v31 }
 0x2d0   :  { %v1209_v5 = vpop.f32.mrf.mxu1 }
 0x2d1   :  { %1047 = vmatmul.f32.gmra.mxu3 %v694_v62 }
 0x2d3   :  { %3033 = vmatmul.msk.f32.gmra.mxu1 %vm786_vm8, %v697_v27  ;;  %v1393_v27 = vld [vmem:[%s4978_s2 + $0x8] sm:$0xff] }
 0x2d4   :  { %v1000_v45 = vpop.f32.mrf.mxu3 }
 0x2d5   :  { %v3942_v6 = vadd.f32 %v1206_v29, %v1000_v45  ;;  %v1394_v29 = vld [vmem:[%s4978_s2 + $0x10] sm:$0x3f]  ;;  %v625_v45 = vld [vmem:[%s4980_s4 + $0xe0] sm:$0xff] }
 0x2d6   :  { %3089 = vmatpush.msk.msra.mxu2 %vm169_vm0, %v1394_v29  ;;  %v734_v29 = vunpack.c.l.bf16 %v634_v0 }
 0x2d8   :  { %v1212_v23 = vpop.f32.mrf.mxu1  ;;  %1499 = vmatpush.msra.mxu2 %v1393_v27 }
 0x2d9   :  { %1050 = vmatmul.f32.gmra.mxu3 %v696_v25  ;;  %v717_v25 = vunpack.c.h.bf16 %v625_v45 }
 0x2db   :  { %3034 = vmatmul.msk.f32.gmra.mxu1 %vm786_vm8, %v699_v7 }
 0x2dc   :  { %v1003_v28 = vpop.f32.mrf.mxu3 }
 0x2dd   :  { %v3948_v8 = vadd.f32 %v1209_v5, %v1003_v28  ;;  %v1392_v5 = vld [vmem:[%s4978_s2] sm:$0xff]  ;;  %v716_v28 = vunpack.c.l.bf16 %v625_v45  ;;  %v636_v45 = vld [vmem:[%s4980_s4 + $0x138] sm:$0xff] }
 0x2de   :  { %1500 = vmatpush.msra.mxu2 %v1392_v5 }
 0x2e0   :  { %v1215_v10 = vpop.f32.mrf.mxu1 }
 0x2e1   :  { %1053 = vmatmul.f32.gmra.mxu3 %v698_v9  ;;  %v626_v9 = vld [vmem:[%s4980_s4 + $0xe8] sm:$0xff] }
 0x2e2   :  { %v719_v36 = vunpack.c.h.bf16 %v626_v9 }
 0x2e3   :  { %3035 = vmatmul.msk.f32.gmra.mxu1 %vm786_vm8, %v701_v43 }
 0x2e4   :  { %v1006_v11 = vpop.f32.mrf.mxu3 }
 0x2e5   :  { %v3958_v12 = vadd.f32 %v1212_v23, %v1006_v11  ;;  %v718_v11 = vunpack.c.l.bf16 %v626_v9 }
 0x2e8   :  { %v1218_v18 = vpop.f32.mrf.mxu1 }
 0x2e9   :  { %1056 = vmatmul.f32.gmra.mxu3 %v700_v13  ;;  %v627_v13 = vld [vmem:[%s4980_s4 + $0xf0] sm:$0xff] }
 0x2ea   :  { %v721_v41 = vunpack.c.h.bf16 %v627_v13 }
 0x2eb   :  { %3036 = vmatmul.msk.f32.gmra.mxu1 %vm786_vm8, %v703_v17 }
 0x2ec   :  { %v1009_v19 = vpop.f32.mrf.mxu3 }
 0x2ed   :  { %v3970_v39 = vadd.f32 %v1215_v10, %v1009_v19  ;;  %v628_v19 = vld [vmem:[%s4980_s4 + $0xf8] sm:$0xff] }
 0x2f0   :  { %v1221_v26 = vpop.f32.mrf.mxu1 }
 0x2f1   :  { %1059 = vmatmul.f32.gmra.mxu3 %v702_v20  ;;  %v723_v20 = vunpack.c.h.bf16 %v628_v19 }
 0x2f3   :  { %3037 = vmatmul.msk.f32.gmra.mxu1 %vm786_vm8, %v705_v22 }
 0x2f4   :  { %v1012_v30 = vpop.f32.mrf.mxu3 }
 0x2f5   :  { %v3976_v37 = vadd.f32 %v1218_v18, %v1012_v30  ;;  %v720_v18 = vunpack.c.l.bf16 %v627_v13  ;;  %v629_v30 = vld [vmem:[%s4980_s4 + $0x100] sm:$0xff] }
 0x2f8   :  { %v1224_v38 = vpop.f32.mrf.mxu1 }
 0x2f9   :  { %1062 = vmatmul.f32.gmra.mxu3 %v704_v32  ;;  %v725_v32 = vunpack.c.h.bf16 %v629_v30 }
 0x2fb   :  { %3038 = vmatmul.msk.f32.gmra.mxu1 %vm786_vm8, %v707_v34 }
 0x2fc   :  { %v1015_v40 = vpop.f32.mrf.mxu3 }
 0x2fd   :  { %v3982_v42 = vadd.f32 %v1221_v26, %v1015_v40  ;;  %v722_v26 = vunpack.c.l.bf16 %v628_v19  ;;  %v630_v40 = vld [vmem:[%s4980_s4 + $0x108] sm:$0xff] }
 0x300   :  { %v1227_v46 = vpop.f32.mrf.mxu1 }
 0x301   :  { %1065 = vmatmul.f32.gmra.mxu3 %v706_v35  ;;  %v727_v35 = vunpack.c.h.bf16 %v630_v40 }
 0x303   :  { %3039 = vmatmul.msk.f32.gmra.mxu1 %vm786_vm8, %v709_v55  ;;  %v726_v55 = vunpack.c.l.bf16 %v630_v40  ;;  %v640_v40 = vld [vmem:[%s4980_s4 + $0x158] sm:$0xff] }
 0x304   :  { %v1018_v57 = vpop.f32.mrf.mxu3 }
 0x305   :  { %v1225_v51 = vadd.f32 %v1224_v38, %v1018_v57  ;;  %v724_v38 = vunpack.c.l.bf16 %v629_v30 }
 0x307   :  { %3082 = vmatmul.msk.f32.vlgmr.msrb.gmra.mxu2 %vm280_vm2, %v1225_v51 }
 0x308   :  { %v1230_v50 = vpop.f32.mrf.mxu1 }
 0x309   :  { %1068 = vmatmul.f32.gmra.mxu3 %v708_v59 }
 0x30b   :  { %3040 = vmatmul.msk.f32.gmra.mxu1 %vm786_vm8, %v711_v24  ;;  %v3098_v24 = vld [vmem:[%s4978_s2 + $0x38] sm:$0xff] }
 0x30c   :  { %v1021_v2 = vpop.f32.mrf.mxu3 }
 0x30d   :  { %v1228_v54 = vadd.f32 %v1227_v46, %v1021_v2  ;;  %v631_v46 = vld [vmem:[%s4980_s4 + $0x110] sm:$0xff] }
 0x30e   :  { %v729_v57 = vunpack.c.h.bf16 %v631_v46  ;;  %v728_v33 = vunpack.c.l.bf16 %v631_v46 }
 0x30f   :  { %3083 = vmatmul.msk.f32.gmra.mxu2 %vm280_vm2, %v1228_v54 }
 0x310   :  { %v1233_v61 = vpop.f32.mrf.mxu1 }
 0x311   :  { %1071 = vmatmul.f32.gmra.mxu3 %v710_v60 }
 0x313   :  { %3041 = vmatmul.msk.f32.gmra.mxu1 %vm786_vm8, %v713_v49  ;;  %v633_v49 = vld [vmem:[%s4980_s4 + $0x120] sm:$0xff] }
 0x314   :  { %v1024_v21 = vpop.f32.mrf.mxu3 }
 0x315   :  { %v1231_v53 = vadd.f32 %v1230_v50, %v1024_v21  ;;  %v632_v50 = vld [vmem:[%s4980_s4 + $0x118] sm:$0xff] }
 0x316   :  { %v731_v2 = vunpack.c.h.bf16 %v632_v50  ;;  %v730_v31 = vunpack.c.l.bf16 %v632_v50 }
 0x317   :  { %3084 = vmatmul.msk.f32.gmra.mxu2 %vm280_vm2, %v1231_v53 }
 0x318   :  { %v1236_v47 = vpop.f32.mrf.mxu1 }
 0x319   :  { %1074 = vmatmul.f32.gmra.mxu3 %v712_v63  ;;  %v732_v63 = vunpack.c.l.bf16 %v633_v49 }
 0x31b   :  { %3042 = vmatmul.msk.f32.gmra.mxu1 %vm786_vm8, %v715_v1 }
 0x31c   :  { %v1027_v52 = vpop.f32.mrf.mxu3 }
 0x31d   :  { %v1234_v62 = vadd.f32 %v1233_v61, %v1027_v52  ;;  %v733_v61 = vunpack.c.h.bf16 %v633_v49  ;;  %v635_v52 = vld [vmem:[%s4980_s4 + $0x130] sm:$0xff] }
 0x31e   :  { %v736_v5 = vunpack.c.l.bf16 %v635_v52 }
 0x31f   :  { %3085 = vmatmul.msk.f32.gmra.mxu2 %vm280_vm2, %v1234_v62  ;;  %v737_v62 = vunpack.c.h.bf16 %v635_v52  ;;  %v644_v52 = vld [vmem:[%s4980_s4 + $0x178] sm:$0xff] }
 0x320   :  { %v1239_v15 = vpop.f32.mrf.mxu1 }
 0x321   :  { %1077 = vmatmul.f32.gmra.mxu3 %v714_v4 }
 0x323   :  { %3043 = vmatmul.msk.f32.gmra.mxu1 %vm786_vm8, %v717_v25  ;;  %v739_v25 = vunpack.c.h.bf16 %v636_v45 }
 0x324   :  { %v1030_v7 = vpop.f32.mrf.mxu3 }
 0x325   :  { %v1237_v23 = vadd.f32 %v1236_v47, %v1030_v7 }
 0x327   :  { %3086 = vmatmul.msk.f32.gmra.mxu2 %vm280_vm2, %v1237_v23  ;;  %v738_v23 = vunpack.c.l.bf16 %v636_v45  ;;  %v754_v45 = vunpack.c.l.bf16 %v644_v52 }
 0x328   :  { %v1242_v43 = vpop.f32.mrf.mxu1 }
 0x329   :  { %1080 = vmatmul.f32.gmra.mxu3 %v716_v28  ;;  %v637_v28 = vld [vmem:[%s4980_s4 + $0x140] sm:$0xff] }
 0x32a   :  { %v741_v9 = vunpack.c.h.bf16 %v637_v28 }
 0x32b   :  { %3044 = vmatmul.msk.f32.gmra.mxu1 %vm786_vm8, %v719_v36 }
 0x32c   :  { %v1033_v10 = vpop.f32.mrf.mxu3 }
 0x32d   :  { %v1240_v48 = vadd.f32 %v1239_v15, %v1033_v10 }
 0x32f   :  { %3087 = vmatmul.msk.f32.gmra.mxu2 %vm280_vm2, %v1240_v48  ;;  %v740_v48 = vunpack.c.l.bf16 %v637_v28 }
 0x330   :  { %v4027_v16 = vpop.f32.mrf.mxu1 }
 0x331   :  { %1083 = vmatmul.f32.gmra.mxu3 %v718_v11  ;;  %v638_v11 = vld [vmem:[%s4980_s4 + $0x148] sm:$0xff] }
 0x332   :  { %v743_v13 = vunpack.c.h.bf16 %v638_v11  ;;  %v742_v19 = vunpack.c.l.bf16 %v638_v11  ;;  %v3119_v11 = vld [vmem:[%s4978_s2 + $0x60] sm:$0xff] }
 0x333   :  { %3045 = vmatmul.msk.f32.gmra.mxu1 %vm786_vm8, %v721_v41 }
 0x334   :  { %v1036_v14 = vpop.f32.mrf.mxu3 }
 0x335   :  { %v1243_v17 = vadd.f32 %v1242_v43, %v1036_v14  ;;  %v3110_v14 = vld [vmem:[%s4978_s2 + $0x58] sm:$0x3f] }
 0x337   :  { %3088 = vmatmul.msk.f32.gmra.mxu2 %vm280_vm2, %v1243_v17 }
 0x338   :  { %v4034_v58 = vpop.f32.mrf.mxu1 }
 0x339   :  { %1086 = vmatmul.f32.gmra.mxu3 %v720_v18 }
 0x33b   :  { %3046 = vmatmul.msk.f32.gmra.mxu1 %vm786_vm8, %v723_v20  ;;  %v3109_v20 = vld [vmem:[%s4978_s2 + $0x50] sm:$0xff] }
 0x33c   :  { %v4037_v22 = vpop.f32.mrf.mxu3 }
 0x33d   :  { %v1246_v27 = vadd.f32 %v4027_v16, %v4037_v22  ;;  %v639_v22 = vld [vmem:[%s4980_s4 + $0x150] sm:$0xff] }
 0x33f   :  { %3090 = vmatmul.msk.f32.vlgmr.msra.gmra.mxu2 %vm280_vm2, %v3936_v3 }
 0x340   :  { %v4044_v56 = vpop.f32.mrf.mxu1 }
 0x341   :  { %1089 = vmatmul.f32.gmra.mxu3 %v722_v26  ;;  %v745_v26 = vunpack.c.h.bf16 %v639_v22 }
 0x343   :  { %3047 = vmatmul.msk.f32.gmra.mxu1 %vm786_vm8, %v725_v32 }
 0x344   :  { %v4047_v34 = vpop.f32.mrf.mxu3 }
 0x345   :  { %v1249_v7 = vadd.f32 %v4034_v58, %v4047_v34  ;;  %v3108_v58 = vld [vmem:[%s4978_s2 + $0x48] sm:$0xff] }
 0x347   :  { %3091 = vmatmul.msk.f32.gmra.mxu2 %vm280_vm2, %v3942_v6  ;;  %v3099_v6 = vld [vmem:[%s4978_s2 + $0x40] sm:$0x3f] }
 0x348   :  { %v4054_v44 = vpop.f32.mrf.mxu1  ;;  %3100 = vmatpush.msk.msrb.mxu2 %vm169_vm0, %v3099_v6 }
 0x349   :  { %1092 = vmatmul.f32.gmra.mxu3 %v724_v38  ;;  %v744_v38 = vunpack.c.l.bf16 %v639_v22  ;;  %v647_v22 = vld [vmem:[%s4980_s4 + $0x190] sm:$0xff] }
 0x34a   :  { %1565 = vmatpush.msrb.mxu2 %v3098_v24 }
 0x34b   :  { %3048 = vmatmul.msk.f32.gmra.mxu1 %vm786_vm8, %v727_v35  ;;  %v747_v35 = vunpack.c.h.bf16 %v640_v40 }
 0x34c   :  { %v4057_v3 = vpop.f32.mrf.mxu3 }
 0x34d   :  { %v1252_v10 = vadd.f32 %v4044_v56, %v4057_v3 }
 0x34f   :  { %3092 = vmatmul.msk.f32.gmra.mxu2 %vm280_vm2, %v3948_v8  ;;  %v3097_v8 = vld [vmem:[%s4978_s2 + $0x30] sm:$0xff] }
 0x350   :  { %v4064_v51 = vpop.f32.mrf.mxu1  ;;  %1566 = vmatpush.msrb.mxu2 %v3097_v8 }
 0x351   :  { %1095 = vmatmul.f32.gmra.mxu3 %v726_v55 }
 0x352   :  { %3111 = vmatpush.msk.msra.mxu2 %vm169_vm0, %v3110_v14 }
 0x353   :  { %3049 = vmatmul.msk.f32.gmra.mxu1 %vm786_vm8, %v729_v57  ;;  %v746_v57 = vunpack.c.l.bf16 %v640_v40 }
 0x354   :  { %v4071_v59 = vpop.f32.mrf.mxu3  ;;  %1638 = vmatpush.msra.mxu2 %v3109_v20 }
 0x355   :  { %v1255_v18 = vadd.f32 %v4054_v44, %v4071_v59 }
 0x356   :  { %1639 = vmatpush.msra.mxu2 %v3108_v58 }
 0x357   :  { %3093 = vmatmul.msk.f32.gmra.mxu2 %vm280_vm2, %v3958_v12  ;;  %v3132_v12 = vld [vmem:[%s4978_s2 + $0x88] sm:$0x3f] }
 0x358   :  { %v4084_v54 = vpop.f32.mrf.mxu1  ;;  %3133 = vmatpush.msk.msrb.mxu0 %vm169_vm0, %v3132_v12 }
 0x359   :  { %1098 = vmatmul.f32.gmra.mxu3 %v728_v33 }
 0x35b   :  { %3050 = vmatmul.msk.f32.gmra.mxu1 %vm786_vm8, %v731_v2  ;;  %v642_v2 = vld [vmem:[%s4980_s4 + $0x168] sm:$0xff] }
 0x35c   :  { %v4087_v60 = vpop.f32.mrf.mxu3  ;;  %v750_v12 = vunpack.c.l.bf16 %v642_v2 }
 0x35d   :  { %v1258_v34 = vadd.f32 %v4064_v51, %v4087_v60  ;;  %v641_v51 = vld [vmem:[%s4980_s4 + $0x160] sm:$0xff] }
 0x35e   :  { %v749_v6 = vunpack.c.h.bf16 %v641_v51  ;;  %v748_v50 = vunpack.c.l.bf16 %v641_v51 }
 0x35f   :  { %3094 = vmatmul.msk.f32.gmra.mxu2 %vm280_vm2, %v3970_v39  ;;  %v735_v39 = vunpack.c.h.bf16 %v634_v0 }
 0x360   :  { %v4097_v21 = vpop.f32.mrf.mxu1 }
 0x361   :  { %1101 = vmatmul.f32.gmra.mxu3 %v730_v31 }
 0x363   :  { %3051 = vmatmul.msk.f32.gmra.mxu1 %vm786_vm8, %v733_v61 }
 0x364   :  { %v4101_v53 = vpop.f32.mrf.mxu3 }
 0x365   :  { %v1261_v46 = vadd.f32 %v4084_v54, %v4101_v53  ;;  %v751_v54 = vunpack.c.h.bf16 %v642_v2  ;;  %v643_v53 = vld [vmem:[%s4980_s4 + $0x170] sm:$0xff] }
 0x367   :  { %3095 = vmatmul.msk.f32.gmra.mxu2 %vm280_vm2, %v3976_v37 }
 0x368   :  { %v4108_v1 = vpop.f32.mrf.mxu1 }
 0x369   :  { %1104 = vmatmul.f32.gmra.mxu3 %v732_v63  ;;  %v753_v63 = vunpack.c.h.bf16 %v643_v53 }
 0x36b   :  { %3052 = vmatmul.msk.f32.gmra.mxu1 %vm786_vm8, %v735_v39 }
 0x36c   :  { %v4111_v47 = vpop.f32.mrf.mxu3 }
 0x36d   :  { %v1264_v8 = vadd.f32 %v4097_v21, %v4111_v47  ;;  %v3131_v21 = vld [vmem:[%s4978_s2 + $0x80] sm:$0xff] }
 0x36e   :  { %1784 = vmatpush.msrb.mxu0 %v3131_v21  ;;  %v650_v21 = vld [vmem:[%s4980_s4 + $0x1a8] sm:$0xff] }
 0x36f   :  { %3096 = vmatmul.msk.f32.gmra.mxu2 %vm280_vm2, %v3982_v42 }
 0x370   :  { %v4118_v4 = vpop.f32.mrf.mxu1 }
 0x371   :  { %1107 = vmatmul.f32.gmra.mxu3 %v734_v29  ;;  %v752_v29 = vunpack.c.l.bf16 %v643_v53  ;;  %v767_v53 = vunpack.c.h.bf16 %v650_v21 }
 0x373   :  { %3053 = vmatmul.msk.f32.gmra.mxu1 %vm786_vm8, %v737_v62  ;;  %v755_v62 = vunpack.c.h.bf16 %v644_v52  ;;  %v766_v52 = vunpack.c.l.bf16 %v650_v21 }
 0x374   :  { %v4121_v37 = vpop.f32.mrf.mxu3 }
 0x375   :  { %v1267_v61 = vadd.f32 %v4108_v1, %v4121_v37 }
 0x377   :  { %3101 = vmatmul.msk.f32.vlgmr.msrb.gmra.mxu2 %vm280_vm2, %v1246_v27 }
 0x378   :  { %v4129_v42 = vpop.f32.mrf.mxu1 }
 0x379   :  { %1110 = vmatmul.f32.gmra.mxu3 %v736_v5 }
 0x37b   :  { %3054 = vmatmul.msk.f32.gmra.mxu1 %vm786_vm8, %v739_v25  ;;  %v645_v25 = vld [vmem:[%s4980_s4 + $0x180] sm:$0xff] }
 0x37c   :  { %v4132_v15 = vpop.f32.mrf.mxu3 }
 0x37d   :  { %v1270_v47 = vadd.f32 %v4118_v4, %v4132_v15  ;;  %v757_v15 = vunpack.c.h.bf16 %v645_v25 }
 0x37f   :  { %3102 = vmatmul.msk.f32.gmra.mxu2 %vm280_vm2, %v1249_v7 }
 0x380   :  { %v4140_v36 = vpop.f32.mrf.mxu1 }
 0x381   :  { %1113 = vmatmul.f32.gmra.mxu3 %v738_v23 }
 0x383   :  { %3055 = vmatmul.msk.f32.gmra.mxu1 %vm786_vm8, %v741_v9 }
 0x384   :  { %v4143_v43 = vpop.f32.mrf.mxu3 }
 0x385   :  { %v1273_v4 = vadd.f32 %v4129_v42, %v4143_v43  ;;  %v3121_v42 = vld [vmem:[%s4978_s2 + $0x70] sm:$0x3f] }
 0x386   :  { %3122 = vmatpush.msk.msrb.mxu2 %vm169_vm0, %v3121_v42  ;;  %v652_v42 = vld [vmem:[%s4980_s4 + $0x1b8] sm:$0xff] }
 0x387   :  { %3103 = vmatmul.msk.f32.gmra.mxu2 %vm280_vm2, %v1252_v10  ;;  %v756_v10 = vunpack.c.l.bf16 %v645_v25 }
 0x388   :  { %v4151_v41 = vpop.f32.mrf.mxu1 }
 0x389   :  { %1116 = vmatmul.f32.gmra.mxu3 %v740_v48  ;;  %v3120_v48 = vld [vmem:[%s4978_s2 + $0x68] sm:$0xff] }
 0x38a   :  { %v4153_v16 = vpop.f32.mrf.mxu2  ;;  %1711 = vmatpush.msrb.mxu2 %v3120_v48 }
 0x38b   :  { %3056 = vmatmul.msk.f32.gmra.mxu1 %vm786_vm8, %v743_v13  ;;  %v3130_v13 = vld [vmem:[%s4978_s2 + $0x78] sm:$0xff] }
 0x38c   :  { %v4160_v17 = vpop.f32.mrf.mxu3  ;;  %1785 = vmatpush.msrb.mxu0 %v3130_v13  ;;  %1712 = vmatpush.msrb.mxu2 %v3119_v11 }
 0x38d   :  { %v1276_v43 = vadd.f32 %v4140_v36, %v4160_v17 }
 0x38f   :  { %3104 = vmatmul.msk.f32.gmra.mxu2 %vm280_vm2, %v1255_v18 }
 0x390   :  { %v4174_v30 = vpop.f32.mrf.mxu1 }
 0x391   :  { %1119 = vmatmul.f32.gmra.mxu3 %v742_v19 }
 0x392   :  { %v4176_v32 = vpop.f32.mrf.mxu2 }
 0x393   :  { %3057 = vmatmul.msk.f32.gmra.mxu1 %vm786_vm8, %v745_v26  ;;  %v761_v26 = vunpack.c.h.bf16 %v647_v22 }
 0x394   :  { %v4179_v56 = vpop.f32.mrf.mxu3 }
 0x395   :  { %v1279_v20 = vadd.f32 %v4151_v41, %v4179_v56  ;;  %v760_v56 = vunpack.c.l.bf16 %v647_v22 }
 0x397   :  { %3105 = vmatmul.msk.f32.gmra.mxu2 %vm280_vm2, %v1258_v34 }
 0x398   :  { %v4187_v44 = vpop.f32.mrf.mxu1 }
 0x399   :  { %1122 = vmatmul.f32.gmra.mxu3 %v744_v38 }
 0x39a   :  { %v4189_v3 = vpop.f32.mrf.mxu2 }
 0x39b   :  { %3058 = vmatmul.msk.f32.gmra.mxu1 %vm786_vm8, %v747_v35  ;;  %v648_v35 = vld [vmem:[%s4980_s4 + $0x198] sm:$0xff] }
 0x39c   :  { %v4192_v55 = vpop.f32.mrf.mxu3 }
 0x39d   :  { %v1282_v41 = vadd.f32 %v4174_v30, %v4192_v55  ;;  %v762_v55 = vunpack.c.l.bf16 %v648_v35 }
 0x39f   :  { %3106 = vmatmul.msk.f32.gmra.mxu2 %vm280_vm2, %v1261_v46  ;;  %v763_v46 = vunpack.c.h.bf16 %v648_v35 }
 0x3a0   :  { %v4200_v59 = vpop.f32.mrf.mxu1 }
 0x3a1   :  { %1125 = vmatmul.f32.gmra.mxu3 %v746_v57 }
 0x3a2   :  { %v4202_v33 = vpop.f32.mrf.mxu2 }
 0x3a3   :  { %3059 = vmatmul.msk.f32.gmra.mxu1 %vm786_vm8, %v749_v6 }
 0x3a4   :  { %v4205_v24 = vpop.f32.mrf.mxu3 }
 0x3a5   :  { %v1285_v30 = vadd.f32 %v4187_v44, %v4205_v24 }
 0x3a7   :  { %3107 = vmatmul.msk.f32.gmra.mxu2 %vm280_vm2, %v1264_v8  ;;  %v649_v8 = vld [vmem:[%s4980_s4 + $0x1a0] sm:$0xff] }
 0x3a8   :  { %v4213_v60 = vpop.f32.mrf.mxu1 }
 0x3a9   :  { %1128 = vmatmul.f32.gmra.mxu3 %v748_v50  ;;  %v765_v50 = vunpack.c.h.bf16 %v649_v8 }
 0x3aa   :  { %v4215_v31 = vpop.f32.mrf.mxu2 }
 0x3ab   :  { %3060 = vmatmul.msk.f32.gmra.mxu1 %vm786_vm8, %v751_v54 }
 0x3ac   :  { %v4218_v49 = vpop.f32.mrf.mxu3 }
 0x3ad   :  { %v1288_v44 = vadd.f32 %v4200_v59, %v4218_v49 }
 0x3af   :  { %3112 = vmatmul.msk.f32.vlgmr.msra.gmra.mxu2 %vm280_vm2, %v1267_v61 }
 0x3b0   :  { %v4229_v0 = vpop.f32.mrf.mxu1 }
 0x3b1   :  { %1131 = vmatmul.f32.gmra.mxu3 %v750_v12  ;;  %v764_v12 = vunpack.c.l.bf16 %v649_v8 }
 0x3b2   :  { %v4231_v39 = vpop.f32.mrf.mxu2 }
 0x3b3   :  { %3061 = vmatmul.msk.f32.gmra.mxu1 %vm786_vm8, %v753_v63 }
 0x3b4   :  { %v4234_v1 = vpop.f32.mrf.mxu3 }
 0x3b5   :  { %v1291_v49 = vadd.f32 %v4213_v60, %v4234_v1 }
 0x3b7   :  { %3113 = vmatmul.msk.f32.gmra.mxu2 %vm280_vm2, %v1270_v47 }
 0x3b8   :  { %v4242_v37 = vpop.f32.mrf.mxu1 }
 0x3b9   :  { %1134 = vmatmul.f32.gmra.mxu3 %v752_v29 }
 0x3ba   :  { %v4244_v27 = vpop.f32.mrf.mxu2 }
 0x3bb   :  { %3062 = vmatmul.msk.f32.gmra.mxu1 %vm786_vm8, %v755_v62  ;;  %v651_v62 = vld [vmem:[%s4980_s4 + $0x1b0] sm:$0xff] }
 0x3bc   :  { %v4247_v5 = vpop.f32.mrf.mxu3 }
 0x3bd   :  { %v1294_v1 = vadd.f32 %v4229_v0, %v4247_v5  ;;  %v3143_v0 = vld [vmem:[%s4978_s2 + $0xa0] sm:$0x3f] }
 0x3be   :  { %3144 = vmatpush.msk.msra.mxu2 %vm169_vm0, %v3143_v0 }
 0x3bf   :  { %3114 = vmatmul.msk.f32.gmra.mxu2 %vm280_vm2, %v1273_v4  ;;  %v769_v4 = vunpack.c.h.bf16 %v651_v62 }
 0x3c0   :  { %v4255_v7 = vpop.f32.mrf.mxu1 }
 0x3c1   :  { %1137 = vmatmul.f32.gmra.mxu3 %v754_v45 }
 0x3c2   :  { %v1502_v23 = vpop.f32.mrf.mxu2 }
 0x3c3   :  { %v4258_v28 = vadd.f32 %v1502_v23, %v4153_v16  ;;  %3063 = vmatmul.msk.f32.gmra.mxu1 %vm786_vm8, %v757_v15  ;;  %v646_v16 = vld [vmem:[%s4980_s4 + $0x188] sm:$0xff]  ;;  %v768_v23 = vunpack.c.l.bf16 %v651_v62 }
 0x3c4   :  { %v4264_v9 = vpop.f32.mrf.mxu3  ;;  %v759_v36 = vunpack.c.h.bf16 %v646_v16  ;;  %v758_v58 = vunpack.c.l.bf16 %v646_v16  ;;  %v770_v16 = vunpack.c.l.bf16 %v652_v42 }
 0x3c5   :  { %v1297_v11 = vadd.f32 %v4242_v37, %v4264_v9 }
 0x3c7   :  { %3115 = vmatmul.msk.f32.gmra.mxu2 %vm280_vm2, %v1276_v43  ;;  %v771_v43 = vunpack.c.h.bf16 %v652_v42 }
 0x3c8   :  { %v4282_v14 = vpop.f32.mrf.mxu1 }
 0x3c9   :  { %1140 = vmatmul.f32.gmra.mxu3 %v756_v10 }
 0x3ca   :  { %v1505_v17 = vpop.f32.mrf.mxu2 }
 0x3cb   :  { %v4285_v18 = vadd.f32 %v1505_v17, %v4176_v32  ;;  %3064 = vmatmul.msk.f32.gmra.mxu1 %vm786_vm8, %v759_v36  ;;  %v3142_v36 = vld [vmem:[%s4978_s2 + $0x98] sm:$0xff]  ;;  %v653_v17 = vld [vmem:[%s4980_s4 + $0x1c0] sm:$0xff] }
 0x3cc   :  { %v4288_v19 = vpop.f32.mrf.mxu3  ;;  %1857 = vmatpush.msra.mxu2 %v3142_v36  ;;  %v773_v37 = vunpack.c.h.bf16 %v653_v17 }
 0x3cf   :  { %3116 = vmatmul.msk.f32.gmra.mxu2 %vm280_vm2, %v1279_v20 }
 0x3d0   :  { %v4296_v34 = vpop.f32.mrf.mxu1 }
 0x3d1   :  { %1143 = vmatmul.f32.gmra.mxu3 %v758_v58 }
 0x3d2   :  { %v1508_v32 = vpop.f32.mrf.mxu2 }
 0x3d3   :  { %v4299_v38 = vadd.f32 %v1508_v32, %v4189_v3  ;;  %3065 = vmatmul.msk.f32.gmra.mxu1 %vm786_vm8, %v761_v26  ;;  %v1300_v26 = vadd.f32 %v4255_v7, %v4288_v19 }
 0x3d4   :  { %v4302_v40 = vpop.f32.mrf.mxu3 }
 0x3d5   :  { %v1303_v19 = vadd.f32 %v4282_v14, %v4302_v40 }
 0x3d7   :  { %3117 = vmatmul.msk.f32.gmra.mxu2 %vm280_vm2, %v1282_v41  ;;  %v772_v41 = vunpack.c.l.bf16 %v653_v17 }
 0x3d8   :  { %v1308_v57 = vpop.f32.mrf.mxu1 }
 0x3d9   :  { %1146 = vmatmul.f32.gmra.mxu3 %v760_v56  ;;  %v654_v56 = vld [vmem:[%s4980_s4 + $0x1c8] sm:$0xff] }
 0x3da   :  { %v1511_v51 = vpop.f32.mrf.mxu2  ;;  %v775_v35 = vunpack.c.h.bf16 %v654_v56 }
 0x3db   :  { %v4311_v3 = vadd.f32 %v1511_v51, %v4202_v33  ;;  %3066 = vmatmul.msk.f32.gmra.mxu1 %vm786_vm8, %v763_v46 }
 0x3dc   :  { %v4314_v6 = vpop.f32.mrf.mxu3 }
 0x3dd   :  { %v1306_v40 = vadd.f32 %v4296_v34, %v4314_v6  ;;  %v657_v34 = vld [vmem:[%s4980_s4 + $0x1e0] sm:$0xff] }
 0x3de   :  { %v781_v6 = vunpack.c.h.bf16 %v657_v34 }
 0x3df   :  { %3118 = vmatmul.msk.f32.gmra.mxu2 %vm280_vm2, %v1285_v30  ;;  %v774_v30 = vunpack.c.l.bf16 %v654_v56 }
 0x3e0   :  { %v1311_v2 = vpop.f32.mrf.mxu1 }
 0x3e1   :  { %1149 = vmatmul.f32.gmra.mxu3 %v762_v55  ;;  %v655_v55 = vld [vmem:[%s4980_s4 + $0x1d0] sm:$0xff] }
 0x3e2   :  { %v1514_v54 = vpop.f32.mrf.mxu2  ;;  %v777_v8 = vunpack.c.h.bf16 %v655_v55 }
 0x3e3   :  { %v4323_v33 = vadd.f32 %v1514_v54, %v4215_v31  ;;  %3067 = vmatmul.msk.f32.gmra.mxu1 %vm786_vm8, %v765_v50 }
 0x3e4   :  { %v1102_v61 = vpop.f32.mrf.mxu3 }
 0x3e5   :  { %v1309_v24 = vadd.f32 %v1308_v57, %v1102_v61  ;;  %v776_v61 = vunpack.c.l.bf16 %v655_v55 }
 0x3e7   :  { %3123 = vmatmul.msk.f32.vlgmr.msrb.gmra.mxu2 %vm280_vm2, %v1288_v44  ;;  %3134 = vmatmul.msk.f32.vlgmr.msrb.gmra.mxu0 %vm280_vm2, %v1309_v24  ;;  %v656_v44 = vld [vmem:[%s4980_s4 + $0x1d8] sm:$0xff] }
 0x3e8   :  { %v1314_v63 = vpop.f32.mrf.mxu1  ;;  %v779_v24 = vunpack.c.h.bf16 %v656_v44 }
 0x3e9   :  { %1152 = vmatmul.f32.gmra.mxu3 %v764_v12 }
 0x3ea   :  { %v1517_v31 = vpop.f32.mrf.mxu2 }
 0x3eb   :  { %v4334_v47 = vadd.f32 %v1517_v31, %v4231_v39  ;;  %3068 = vmatmul.msk.f32.gmra.mxu1 %vm786_vm8, %v767_v53  ;;  %v778_v53 = vunpack.c.l.bf16 %v656_v44 }
 0x3ec   :  { %v1105_v59 = vpop.f32.mrf.mxu3 }
 0x3ed   :  { %v1312_v29 = vadd.f32 %v1311_v2, %v1105_v59 }
 0x3ef   :  { %3124 = vmatmul.msk.f32.gmra.mxu2 %vm280_vm2, %v1291_v49  ;;  %3135 = vmatmul.msk.f32.gmra.mxu0 %vm280_vm2, %v1312_v29  ;;  %v780_v29 = vunpack.c.l.bf16 %v657_v34 }
 0x3f0   :  { %v1317_v45 = vpop.f32.mrf.mxu1 }
 0x3f1   :  { %1155 = vmatmul.f32.gmra.mxu3 %v766_v52  ;;  %v658_v52 = vld [vmem:[%s4980_s4 + $0x1e8] sm:$0xff] }
 0x3f2   :  { %v1520_v39 = vpop.f32.mrf.mxu2  ;;  %v783_v62 = vunpack.c.h.bf16 %v658_v52 }
 0x3f3   :  { %v4345_v25 = vadd.f32 %v1520_v39, %v4244_v27  ;;  %3069 = vmatmul.msk.f32.gmra.mxu1 %vm786_vm8, %v769_v4 }
 0x3f4   :  { %v1108_v60 = vpop.f32.mrf.mxu3 }
 0x3f5   :  { %v1315_v15 = vadd.f32 %v1314_v63, %v1108_v60 }
 0x3f7   :  { %3125 = vmatmul.msk.f32.gmra.mxu2 %vm280_vm2, %v1294_v1  ;;  %3136 = vmatmul.msk.f32.gmra.mxu0 %vm280_vm2, %v1315_v15  ;;  %v782_v1 = vunpack.c.l.bf16 %v658_v52  ;;  %v659_v15 = vld [vmem:[%s4980_s4 + $0x1f0] sm:$0xff] }
 0x3f8   :  { %v1320_v10 = vpop.f32.mrf.mxu1  ;;  %v784_v0 = vunpack.c.l.bf16 %v659_v15 }
 0x3f9   :  { %1158 = vmatmul.f32.gmra.mxu3 %v768_v23  ;;  %v785_v23 = vunpack.c.h.bf16 %v659_v15 }
 0x3fa   :  { %v1568_v27 = vpop.f32.mrf.mxu2 }
 0x3fb   :  { %v4356_v48 = vadd.f32 %v1568_v27, %v4258_v28  ;;  %3070 = vmatmul.msk.f32.gmra.mxu1 %vm786_vm8, %v771_v43  ;;  %v3141_v28 = vld [vmem:[%s4978_s2 + $0x90] sm:$0xff]  ;;  %v3154_v43 = vld [vmem:[%s4978_s2 + $0xb8] sm:$0x3f] }
 0x3fc   :  { %v1111_v5 = vpop.f32.mrf.mxu3  ;;  %1858 = vmatpush.msra.mxu2 %v3141_v28  ;;  %3155 = vmatpush.msk.msra.mxu0 %vm169_vm0, %v3154_v43 }
 0x3fd   :  { %v1318_v13 = vadd.f32 %v1317_v45, %v1111_v5  ;;  %v3153_v5 = vld [vmem:[%s4978_s2 + $0xb0] sm:$0xff] }
 0x3fe   :  { %1930 = vmatpush.msra.mxu0 %v3153_v5 }
 0x3ff   :  { %3126 = vmatmul.msk.f32.gmra.mxu2 %vm280_vm2, %v1297_v11  ;;  %3137 = vmatmul.msk.f32.gmra.mxu0 %vm280_vm2, %v1318_v13  ;;  %v3152_v11 = vld [vmem:[%s4978_s2 + $0xa8] sm:$0xff] }
 0x400   :  { %v1323_v9 = vpop.f32.mrf.mxu1  ;;  %1931 = vmatpush.msra.mxu0 %v3152_v11 }
 0x401   :  { %1161 = vmatmul.f32.gmra.mxu3 %v770_v16 }
 0x402   :  { %v1571_v20 = vpop.f32.mrf.mxu2 }
 0x403   :  { %v4377_v58 = vadd.f32 %v1571_v20, %v4285_v18  ;;  %3071 = vmatmul.msk.f32.gmra.mxu1 %vm786_vm8, %v773_v37 }
 0x404   :  { %v1114_v22 = vpop.f32.mrf.mxu3 }
 0x405   :  { %v1321_v32 = vadd.f32 %v1320_v10, %v1114_v22  ;;  %v3165_v22 = vld [vmem:[%s4978_s2 + $0xd0] sm:$0x3f] }
 0x406   :  { %3166 = vmatpush.msk.msrb.mxu2 %vm169_vm0, %v3165_v22 }
 0x407   :  { %3127 = vmatmul.msk.f32.gmra.mxu2 %vm280_vm2, %v1300_v26  ;;  %3138 = vmatmul.msk.f32.gmra.mxu0 %vm280_vm2, %v1321_v32 }
 0x408   :  { %v1326_v46 = vpop.f32.mrf.mxu1 }
 0x409   :  { %1164 = vmatmul.f32.gmra.mxu3 %v772_v41 }
 0x40a   :  { %v1574_v18 = vpop.f32.mrf.mxu2 }
 0x40b   :  { %v4388_v57 = vadd.f32 %v1574_v18, %v4299_v38  ;;  %3072 = vmatmul.msk.f32.gmra.mxu1 %vm786_vm8, %v775_v35 }
 0x40c   :  { %v1117_v7 = vpop.f32.mrf.mxu3 }
 0x40d   :  { %v1324_v51 = vadd.f32 %v1323_v9, %v1117_v7 }
 0x40f   :  { %3128 = vmatmul.msk.f32.gmra.mxu2 %vm280_vm2, %v1303_v19  ;;  %3139 = vmatmul.msk.f32.gmra.mxu0 %vm280_vm2, %v1324_v51  ;;  %v3164_v19 = vld [vmem:[%s4978_s2 + $0xc8] sm:$0xff] }
 0x410   :  { %v1329_v50 = vpop.f32.mrf.mxu1  ;;  %2003 = vmatpush.msrb.mxu2 %v3164_v19 }
 0x411   :  { %1167 = vmatmul.f32.gmra.mxu3 %v774_v30 }
 0x412   :  { %v1577_v38 = vpop.f32.mrf.mxu2 }
 0x413   :  { %v4399_v2 = vadd.f32 %v1577_v38, %v4311_v3  ;;  %3073 = vmatmul.msk.f32.gmra.mxu1 %vm786_vm8, %v777_v8 }
 0x414   :  { %v1120_v14 = vpop.f32.mrf.mxu3 }
 0x415   :  { %v1327_v54 = vadd.f32 %v1326_v46, %v1120_v14 }
 0x417   :  { %3129 = vmatmul.msk.f32.gmra.mxu2 %vm280_vm2, %v1306_v40  ;;  %3140 = vmatmul.msk.f32.gmra.mxu0 %vm280_vm2, %v1327_v54 }
 0x418   :  { %v1332_v12 = vpop.f32.mrf.mxu1 }
 0x419   :  { %1170 = vmatmul.f32.gmra.mxu3 %v776_v61  ;;  %v3163_v61 = vld [vmem:[%s4978_s2 + $0xc0] sm:$0xff] }
 0x41a   :  { %v4414_v31 = vpop.f32.mrf.mxu2  ;;  %2004 = vmatpush.msrb.mxu2 %v3163_v61 }
 0x41b   :  { %3074 = vmatmul.msk.f32.gmra.mxu1 %vm786_vm8, %v779_v24 }
 0x41c   :  { %v1123_v3 = vpop.f32.mrf.mxu3 }
 0x41d   :  { %v1330_v21 = vadd.f32 %v1329_v50, %v1123_v3 }
 0x41f   :  { %3145 = vmatmul.msk.f32.vlgmr.msra.gmra.mxu2 %vm280_vm2, %v1330_v21 }
 0x420   :  { %v1335_v63 = vpop.f32.mrf.mxu1 }
 0x421   :  { %1173 = vmatmul.f32.gmra.mxu3 %v778_v53 }
 0x422   :  { %v4422_v39 = vpop.f32.mrf.mxu2 }
 0x423   :  { %3075 = vmatmul.msk.f32.gmra.mxu1 %vm786_vm8, %v781_v6 }
 0x424   :  { %v1126_v59 = vpop.f32.mrf.mxu3 }
 0x425   :  { %v1333_v49 = vadd.f32 %v1332_v12, %v1126_v59 }
 0x427   :  { %3146 = vmatmul.msk.f32.gmra.mxu2 %vm280_vm2, %v1333_v49 }
 0x428   :  { %v1338_v4 = vpop.f32.mrf.mxu1 }
 0x429   :  { %1176 = vmatmul.f32.gmra.mxu3 %v780_v29 }
 0x42a   :  { %v4439_v13 = vpop.f32.mrf.mxu2 }
 0x42b   :  { %3076 = vmatmul.msk.f32.gmra.mxu1 %vm786_vm8, %v783_v62 }
 0x42c   :  { %v1129_v45 = vpop.f32.mrf.mxu3 }
 0x42d   :  { %v1336_v60 = vadd.f32 %v1335_v63, %v1129_v45 }
 0x42f   :  { %3147 = vmatmul.msk.f32.gmra.mxu2 %vm280_vm2, %v1336_v60 }
 0x430   :  { %v1341_v42 = vpop.f32.mrf.mxu1 }
 0x431   :  { %1179 = vmatmul.f32.gmra.mxu3 %v782_v1 }
 0x432   :  { %v4443_v37 = vpop.f32.mrf.mxu2 }
 0x433   :  { %3077 = vmatmul.msk.f32.gmra.mxu1 %vm786_vm8, %v785_v23 }
 0x434   :  { %v1132_v10 = vpop.f32.mrf.mxu3 }
 0x435   :  { %v1339_v27 = vadd.f32 %v1338_v4, %v1132_v10 }
 0x437   :  { %3148 = vmatmul.msk.f32.gmra.mxu2 %vm280_vm2, %v1339_v27 }
 0x438   :  { %v1344_v16 = vpop.f32.mrf.mxu1 }
 0x439   :  { %1182 = vmatmul.f32.gmra.mxu3 %v784_v0 }
 0x43a   :  { %v4450_v32 = vpop.f32.mrf.mxu2 }
 0x43c   :  { %v1135_v36 = vpop.f32.mrf.mxu3 }
 0x43d   :  { %v1342_v28 = vadd.f32 %v1341_v42, %v1135_v36 }
 0x43f   :  { %3149 = vmatmul.msk.f32.gmra.mxu2 %vm280_vm2, %v1342_v28 }
 0x440   :  { %v1347_v17 = vpop.f32.mrf.mxu1 }
 0x442   :  { %v4453_v18 = vpop.f32.mrf.mxu2 }
 0x444   :  { %v1138_v9 = vpop.f32.mrf.mxu3 }
 0x445   :  { %v1345_v20 = vadd.f32 %v1344_v16, %v1138_v9 }
 0x447   :  { %3150 = vmatmul.msk.f32.gmra.mxu2 %vm280_vm2, %v1345_v20 }
 0x448   :  { %v1350_v26 = vpop.f32.mrf.mxu1 }
 0x44a   :  { %v4459_v8 = vpop.f32.mrf.mxu2 }
 0x44c   :  { %v1141_v41 = vpop.f32.mrf.mxu3 }
 0x44d   :  { %v1348_v56 = vadd.f32 %v1347_v17, %v1141_v41 }
 0x44f   :  { %3151 = vmatmul.msk.f32.gmra.mxu2 %vm280_vm2, %v1348_v56 }
 0x450   :  { %v1353_v35 = vpop.f32.mrf.mxu1 }
 0x452   :  { %v4463_v54 = vpop.f32.mrf.mxu2 }
 0x454   :  { %v1144_v46 = vpop.f32.mrf.mxu3 }
 0x455   :  { %v1351_v7 = vadd.f32 %v1350_v26, %v1144_v46 }
 0x457   :  { %3156 = vmatmul.msk.f32.vlgmr.msra.gmra.mxu0 %vm280_vm2, %v1351_v7 }
 0x458   :  { %v1356_v51 = vpop.f32.mrf.mxu1 }
 0x45a   :  { %v4469_v3 = vpop.f32.mrf.mxu2 }
 0x45c   :  { %v1147_v30 = vpop.f32.mrf.mxu3 }
 0x45d   :  { %v1354_v55 = vadd.f32 %v1353_v35, %v1147_v30 }
 0x45f   :  { %3157 = vmatmul.msk.f32.gmra.mxu0 %vm280_vm2, %v1354_v55 }
 0x460   :  { %v1359_v50 = vpop.f32.mrf.mxu1 }
 0x462   :  { %v4472_v63 = vpop.f32.mrf.mxu2 }
 0x464   :  { %v1150_v38 = vpop.f32.mrf.mxu3  ;;  %v1787_v7 = vpop.f32.mrf.mxu0 }
 0x465   :  { %v1357_v14 = vadd.f32 %v1356_v51, %v1150_v38 }
 0x467   :  { %3158 = vmatmul.msk.f32.gmra.mxu0 %vm280_vm2, %v1357_v14 }
 0x468   :  { %v1362_v40 = vpop.f32.mrf.mxu1 }
 0x46a   :  { %v4475_v62 = vpop.f32.mrf.mxu2 }
 0x46c   :  { %v1153_v44 = vpop.f32.mrf.mxu3  ;;  %v1790_v51 = vpop.f32.mrf.mxu0 }
 0x46d   :  { %v1360_v24 = vadd.f32 %v1359_v50, %v1153_v44 }
 0x46f   :  { %3159 = vmatmul.msk.f32.gmra.mxu0 %vm280_vm2, %v1360_v24 }
 0x470   :  { %v1365_v12 = vpop.f32.mrf.mxu1 }
 0x472   :  { %v1717_v1 = vpop.f32.mrf.mxu2 }
 0x474   :  { %v1156_v21 = vpop.f32.mrf.mxu3  ;;  %v1793_v55 = vpop.f32.mrf.mxu0 }
 0x475   :  { %v1363_v53 = vadd.f32 %v1362_v40, %v1156_v21 }
 0x477   :  { %3160 = vmatmul.msk.f32.gmra.mxu0 %vm280_vm2, %v1363_v53 }
 0x478   :  { %v1368_v34 = vpop.f32.mrf.mxu1 }
 0x47a   :  { %v1720_v43 = vpop.f32.mrf.mxu2 }
 0x47c   :  { %v1159_v6 = vpop.f32.mrf.mxu3  ;;  %v1796_v38 = vpop.f32.mrf.mxu0 }
 0x47d   :  { %v1366_v59 = vadd.f32 %v1365_v12, %v1159_v6 }
 0x47f   :  { %3161 = vmatmul.msk.f32.gmra.mxu0 %vm280_vm2, %v1366_v59 }
 0x480   :  { %v1371_v49 = vpop.f32.mrf.mxu1 }
 0x482   :  { %v1723_v16 = vpop.f32.mrf.mxu2 }
 0x484   :  { %v1162_v29 = vpop.f32.mrf.mxu3  ;;  %v1799_v40 = vpop.f32.mrf.mxu0 }
 0x485   :  { %v1369_v52 = vadd.f32 %v1368_v34, %v1162_v29  ;;  %v4492_v34 = vld [vmem:[%s4983_s7 + $0x28] sm:$0xf] }
 0x486   :  { %3174 = vmatpush.msk.msrb.mxu0 %vm2089_vm9, %v4492_v34 }
 0x487   :  { %3162 = vmatmul.msk.f32.gmra.mxu0 %vm280_vm2, %v1369_v52  ;;  %v4501_v52 = vld [vmem:[%s4983_s7 + $0x20] sm:$0xff] }
 0x488   :  { %v1374_v4 = vpop.f32.mrf.mxu1  ;;  %2104 = vmatpush.msrb.mxu0 %v4501_v52 }
 0x48a   :  { %v1726_v9 = vpop.f32.mrf.mxu2 }
 0x48c   :  { %v1165_v45 = vpop.f32.mrf.mxu3  ;;  %v1802_v44 = vpop.f32.mrf.mxu0 }
 0x48d   :  { %v1372_v60 = vadd.f32 %v1371_v49, %v1165_v45 }
 0x48f   :  { %3167 = vmatmul.msk.f32.vlgmr.msrb.gmra.mxu2 %vm280_vm2, %v1372_v60  ;;  %v4507_v60 = vld [vmem:[%s4983_s7 + $0x18] sm:$0xff] }
 0x490   :  { %v1377_v15 = vpop.f32.mrf.mxu1  ;;  %2105 = vmatpush.msrb.mxu0 %v4507_v60 }
 0x492   :  { %v1729_v41 = vpop.f32.mrf.mxu2 }
 0x494   :  { %v1168_v23 = vpop.f32.mrf.mxu3  ;;  %v4487_v12 = vpop.f32.mrf.mxu0 }
 0x495   :  { %v1375_v42 = vadd.f32 %v1374_v4, %v1168_v23  ;;  %v1663_v23 = vadd.f32 %v4450_v32, %v4377_v58  ;;  %v1594_v58 = vadd.f32 %v4422_v39, %v4334_v47 }
 0x497   :  { %3168 = vmatmul.msk.f32.gmra.mxu2 %vm280_vm2, %v1375_v42  ;;  %v1662_v42 = vadd.f32 %v4443_v37, %v4356_v48 }
 0x498   :  { %v1380_v27 = vpop.f32.mrf.mxu1 }
 0x49a   :  { %v4485_v19 = vpop.f32.mrf.mxu2 }
 0x49c   :  { %v1171_v10 = vpop.f32.mrf.mxu3 }
 0x49d   :  { %v1378_v0 = vadd.f32 %v1377_v15, %v1171_v10  ;;  %v1664_v10 = vadd.f32 %v4453_v18, %v4388_v57  ;;  %v1667_v57 = vadd.f32 %v4469_v3, %v1594_v58 }
 0x49f   :  { %3169 = vmatmul.msk.f32.gmra.mxu2 %vm280_vm2, %v1378_v0  ;;  %v1593_v0 = vadd.f32 %v4414_v31, %v4323_v33 }
 0x4a0   :  { %v1383_v36 = vpop.f32.mrf.mxu1 }
 0x4a1   :  { %v1666_v48 = vadd.f32 %v4463_v54, %v1593_v0  ;;  %v1595_v54 = vadd.f32 %v4439_v13, %v4345_v25  ;;  %v2034_v13 = vld [vmem:[%s4983_s7] sm:$0xff] }
 0x4a2   :  { %v1860_v30 = vpop.f32.mrf.mxu2 }
 0x4a3   :  { %v1739_v18 = vadd.f32 %v1726_v9, %v1666_v48  ;;  %v2036_v9 = vld [vmem:[%s4983_s7 + $0x10] sm:$0xff] }
 0x4a4   :  { %v1174_v5 = vpop.f32.mrf.mxu3  ;;  %2106 = vmatpush.msrb.mxu0 %v2036_v9 }
 0x4a5   :  { %v1381_v11 = vadd.f32 %v1380_v27, %v1174_v5  ;;  %v1736_v27 = vadd.f32 %v1717_v1, %v1663_v23  ;;  %v2723_v23 = vld [vmem:[%s4984_s8 + $0x50] sm:$0xff] }
 0x4a6   :  { %2776 = vmatpush.msrb.mxu3 %v2723_v23  ;;  %2753 = vmatpush.msra.mxu1 %v2723_v23 }
 0x4a7   :  { %3170 = vmatmul.msk.f32.gmra.mxu2 %vm280_vm2, %v1381_v11  ;;  %v1809_v32 = vadd.f32 %v1790_v51, %v1736_v27 }
 0x4a8   :  { %v1386_v20 = vpop.f32.mrf.mxu1 }
 0x4aa   :  { %v1863_v50 = vpop.f32.mrf.mxu2 }
 0x4ab   :  { %v1882_v33 = vadd.f32 %v1863_v50, %v1809_v32 }
 0x4ac   :  { %v1177_v28 = vpop.f32.mrf.mxu3 }
 0x4ad   :  { %v1384_v17 = vadd.f32 %v1383_v36, %v1177_v28  ;;  %v1665_v36 = vadd.f32 %v4459_v8, %v4399_v2  ;;  %v1735_v28 = vadd.f32 %v4475_v62, %v1662_v42  ;;  %v1812_v62 = vadd.f32 %v1799_v40, %v1739_v18 }
 0x4af   :  { %3171 = vmatmul.msk.f32.gmra.mxu2 %vm280_vm2, %v1384_v17  ;;  %v1737_v17 = vadd.f32 %v1720_v43, %v1664_v10  ;;  %v1738_v37 = vadd.f32 %v1723_v16, %v1665_v36  ;;  %v1808_v1 = vadd.f32 %v1787_v7, %v1735_v28 }
 0x4b0   :  { %v1389_v56 = vpop.f32.mrf.mxu1 }
 0x4b1   :  { %v1810_v31 = vadd.f32 %v1793_v55, %v1737_v17  ;;  %v1811_v2 = vadd.f32 %v1796_v38, %v1738_v37  ;;  %v1668_v55 = vadd.f32 %v4472_v63, %v1595_v54 }
 0x4b2   :  { %v1866_v14 = vpop.f32.mrf.mxu2 }
 0x4b3   :  { %v1741_v40 = vadd.f32 %v4485_v19, %v1668_v55 }
 0x4b4   :  { %v1180_v22 = vpop.f32.mrf.mxu3 }
 0x4b5   :  { %v1387_v26 = vadd.f32 %v1386_v20, %v1180_v22  ;;  %v1740_v20 = vadd.f32 %v1729_v41, %v1667_v57  ;;  %v1881_v22 = vadd.f32 %v1860_v30, %v1808_v1  ;;  %v2035_v41 = vld [vmem:[%s4983_s7 + $0x8] sm:$0xff] }
 0x4b6   :  { %2107 = vmatpush.msrb.mxu0 %v2035_v41 }
 0x4b7   :  { %3172 = vmatmul.msk.f32.gmra.mxu2 %vm280_vm2, %v1387_v26  ;;  %v1883_v26 = vadd.f32 %v1866_v14, %v1810_v31  ;;  %v1813_v3 = vadd.f32 %v1802_v44, %v1740_v20 }
 0x4b8   :  { %2108 = vmatpush.msrb.mxu0 %v2034_v13 }
 0x4ba   :  { %v1869_v61 = vpop.f32.mrf.mxu2  ;;  %3176 = vmatpush.msk.msra.mxu0 %vm2089_vm9, %v4492_v34 }
 0x4bc   :  { %v1183_v35 = vpop.f32.mrf.mxu3  ;;  %2127 = vmatpush.msra.mxu0 %v4501_v52 }
 0x4bd   :  { %v1390_v46 = vadd.f32 %v1389_v56, %v1183_v35  ;;  %v1884_v56 = vadd.f32 %v1869_v61, %v1811_v2 }
 0x4be   :  { %2128 = vmatpush.msra.mxu0 %v4507_v60 }
 0x4bf   :  { %3173 = vmatmul.msk.f32.gmra.mxu2 %vm280_vm2, %v1390_v46 }
 0x4c0   :  { %2129 = vmatpush.msra.mxu0 %v2036_v9 }
 0x4c2   :  { %v1872_v24 = vpop.f32.mrf.mxu2  ;;  %2130 = vmatpush.msra.mxu0 %v2035_v41 }
 0x4c3   :  { %v1885_v46 = vadd.f32 %v1872_v24, %v1812_v62 }
 0x4c4   :  { %2131 = vmatpush.msra.mxu0 %v2034_v13 }
 0x4ca   :  { %v1875_v21 = vpop.f32.mrf.mxu2 }
 0x4cb   :  { %v1886_v25 = vadd.f32 %v1875_v21, %v1813_v3 }
 0x4d2   :  { %v4496_v6 = vpop.f32.mrf.mxu2 }
 0x4d4   :  { %v1933_v53 = vpop.f32.mrf.mxu0 }
 0x4d5   :  { %v1954_v35 = vadd.f32 %v1933_v53, %v1881_v22 }
 0x4dc   :  { %v1936_v59 = vpop.f32.mrf.mxu0 }
 0x4dd   :  { %v1955_v8 = vadd.f32 %v1936_v59, %v1882_v33 }
 0x4e4   :  { %v1939_v29 = vpop.f32.mrf.mxu0 }
 0x4e5   :  { %v1956_v47 = vadd.f32 %v1939_v29, %v1883_v26 }
 0x4ec   :  { %v1942_v45 = vpop.f32.mrf.mxu0 }
 0x4ed   :  { %v1957_v7 = vadd.f32 %v1942_v45, %v1884_v56  ;;  %v1814_v45 = vadd.f32 %v4487_v12, %v1741_v40 }
 0x4ef   :  { %v1887_v52 = vadd.f32 %v4496_v6, %v1814_v45 }
 0x4f4   :  { %v1945_v5 = vpop.f32.mrf.mxu0 }
 0x4f5   :  { %v1958_v50 = vadd.f32 %v1945_v5, %v1885_v46 }
 0x4fc   :  { %v1948_v16 = vpop.f32.mrf.mxu0 }
 0x4fd   :  { %v1959_v61 = vadd.f32 %v1948_v16, %v1886_v25 }
 0x504   :  { %v1951_v12 = vpop.f32.mrf.mxu0 }
 0x505   :  { %v1960_v48 = vadd.f32 %v1951_v12, %v1887_v52 }
 0x512   :  { %v2006_v49 = vpop.f32.mrf.mxu2 }
 0x513   :  { %v4535_v51 = vadd.f32 %v2006_v49, %v1954_v35 }
 0x515   :  { %v2060_v44 = vmul.f32 %v4535_v51, %v4535_v51  ;;  %v2041_v53 = vsel %vm2040_vm10, %v4535_v51, 0.0 }
 0x517   :  { %v2067_v34 = vsel %vm2040_vm10, %v2060_v44, 0.0 }
 0x51a   :  { %v2009_v4 = vpop.f32.mrf.mxu2 }
 0x51b   :  { %v4525_v39 = vadd.f32 %v2009_v4, %v1955_v8 }
 0x51d   :  { %v2061_v38 = vmul.f32 %v4525_v39, %v4525_v39  ;;  %v2042_v63 = vsel %vm2040_vm10, %v4525_v39, 0.0 }
 0x51f   :  { %v2068_v19 = vsel %vm2040_vm10, %v2061_v38, 0.0 }
 0x520   :  { %v2069_v0 = vadd.f32 %v2068_v19, %v2067_v34  ;;  %v4599_v34 = vld [vmem:[%s4987_s11] sm:$0xff] }
 0x522   :  { %v2012_v15 = vpop.f32.mrf.mxu2 }
 0x523   :  { %v4537_v30 = vadd.f32 %v2012_v15, %v1956_v47  ;;  %v2043_v15 = vadd.f32 %v2042_v63, %v2041_v53 }
 0x525   :  { %v2062_v24 = vmul.f32 %v4537_v30, %v4537_v30  ;;  %v2044_v49 = vsel %vm2040_vm10, %v4537_v30, 0.0 }
 0x526   :  { %v2045_v5 = vadd.f32 %v2044_v49, %v2043_v15 }
 0x527   :  { %v2070_v42 = vsel %vm2040_vm10, %v2062_v24, 0.0  ;;  %v2722_v24 = vld [vmem:[%s4984_s8 + $0x48] sm:$0xff] }
 0x528   :  { %v2071_v17 = vadd.f32 %v2070_v42, %v2069_v0  ;;  %2777 = vmatpush.msrb.mxu3 %v2722_v24  ;;  %2754 = vmatpush.msra.mxu1 %v2722_v24  ;;  %v3198_v24 = vld [vmem:[%s4979_s3 + $0x40] sm:$0xff] }
 0x52a   :  { %v2015_v11 = vpop.f32.mrf.mxu2 }
 0x52b   :  { %v4545_v14 = vadd.f32 %v2015_v11, %v1957_v7 }
 0x52d   :  { %v2063_v29 = vmul.f32 %v4545_v14, %v4545_v14  ;;  %v2046_v10 = vsel %vm2040_vm10, %v4545_v14, 0.0 }
 0x52e   :  { %v2047_v58 = vadd.f32 %v2046_v10, %v2045_v5 }
 0x52f   :  { %v2072_v11 = vsel %vm2040_vm10, %v2063_v29, 0.0 }
 0x530   :  { %v2073_v60 = vadd.f32 %v2072_v11, %v2071_v17 }
 0x532   :  { %v2018_v43 = vpop.f32.mrf.mxu2 }
 0x533   :  { %v4554_v21 = vadd.f32 %v2018_v43, %v1958_v50 }
 0x535   :  { %v2064_v27 = vmul.f32 %v4554_v21, %v4554_v21  ;;  %v2048_v36 = vsel %vm2040_vm10, %v4554_v21, 0.0 }
 0x536   :  { %v2049_v57 = vadd.f32 %v2048_v36, %v2047_v58 }
 0x537   :  { %v2074_v37 = vsel %vm2040_vm10, %v2064_v27, 0.0 }
 0x538   :  { %v2075_v33 = vadd.f32 %v2074_v37, %v2073_v60 }
 0x53a   :  { %v2021_v59 = vpop.f32.mrf.mxu2 }
 0x53b   :  { %v4565_v4 = vadd.f32 %v2021_v59, %v1959_v61 }
 0x53d   :  { %v2065_v28 = vmul.f32 %v4565_v4, %v4565_v4  ;;  %v2050_v32 = vsel %vm2040_vm10, %v4565_v4, 0.0 }
 0x53e   :  { %v2051_v31 = vadd.f32 %v2050_v32, %v2049_v57 }
 0x53f   :  { %v2076_v18 = vsel %vm2040_vm10, %v2065_v28, 0.0 }
 0x540   :  { %v2077_v26 = vadd.f32 %v2076_v18, %v2075_v33 }
 0x542   :  { %v2024_v6 = vpop.f32.mrf.mxu2 }
 0x543   :  { %v2033_v1 = vadd.f32 %v2024_v6, %v1960_v48  ;;  %v2721_v48 = vld [vmem:[%s4984_s8 + $0x40] sm:$0xff] }
 0x544   :  { %2778 = vmatpush.msrb.mxu3 %v2721_v48  ;;  %2755 = vmatpush.msra.mxu1 %v2721_v48  ;;  %v3213_v48 = vld [vmem:[%s4979_s3 + $0x88] sm:$0xf] }
 0x545   :  { %v2052_v20 = vsel %vm2040_vm10, %v2033_v1, 0.0  ;;  %v2066_v22 = vmul.f32 %v2033_v1, %v2033_v1 }
 0x546   :  { %v2053_v2 = vadd.f32 %v2052_v20, %v2051_v31 }
 0x547   :  { %v2078_v8 = vsel %vm2040_vm10, %v2066_v22, 0.0 }
 0x548   :  { %v2054_v62 = vrot.slane %v2053_v2, 4  ;;  %v2079_v43 = vadd.f32 %v2078_v8, %v2077_v26  ;;  %v3280_v26 = vld [vmem:[%s4981_s5] sm:$0xff]  }
 0x54a   :  { %v2055_v56 = vadd.f32 %v2054_v62, %v2053_v2  ;;  %v2080_v35 = vrot.slane %v2079_v43, 4 }
 0x54c   :  { %v2056_v47 = vrot.slane %v2055_v56, 2  ;;  %v2081_v54 = vadd.f32 %v2080_v35, %v2079_v43  ;;  %v2720_v43 = vld [vmem:[%s4984_s8 + $0x38] sm:$0xff]  ;;  %v3316_v35 = vld [vmem:[%s4981_s5 + $0x10] sm:$0xff]  }
 0x54d   :  { %2779 = vmatpush.msrb.mxu3 %v2720_v43  ;;  %2756 = vmatpush.msra.mxu1 %v2720_v43  ;;  %v3229_v43 = vld [vmem:[%s4979_s3 + $0xd8] sm:$0xff] }
 0x54e   :  { %v2057_v3 = vadd.f32 %v2056_v47, %v2055_v56  ;;  %v2082_v16 = vrot.slane %v2081_v54, 2  ;;  %v3289_v47 = vunpack.c.l.bf16 %v3316_v35 }
 0x550   :  { %v2058_v9 = vrot.slane %v2057_v3, 1  ;;  %v2083_v46 = vadd.f32 %v2082_v16, %v2081_v54  ;;  %v3290_v54 = vunpack.c.h.bf16 %v3316_v35  ;;  %v3227_v35 = vld [vmem:[%s4979_s3 + $0xc8] sm:$0xff] }
 0x552   :  { %v2059_v41 = vadd.f32 %v2058_v9, %v2057_v3  ;;  %v2084_v7 = vrot.slane %v2083_v46, 1  ;;  %v3317_v3 = vld [vmem:[%s4981_s5 + $0x18] sm:$0xff]  }
 0x553   :  { %v3293_v16 = vunpack.c.l.bf16 %v3317_v3  ;;  %v3294_v9 = vunpack.c.h.bf16 %v3317_v3  ;;  %v3240_v3 = vld [vmem:[%s4979_s3 + $0x118] sm:$0xf] }
 0x554   :  { %3175 = vmatmul.msk.f32.vlgmr.msrb.gmra.mxu0 %vm2040_vm10, %v2059_v41  ;;  %v2085_v55 = vadd.f32 %v2084_v7, %v2083_v46  ;;  %v3201_v41 = vld [vmem:[%s4979_s3 + $0x58] sm:$0xf]  ;;  %v3318_v46 = vld [vmem:[%s4981_s5 + $0x20] sm:$0xff]  }
 0x555   :  { %3202 = vmatpush.msk.msra.mxu2 %vm2089_vm9, %v3201_v41  ;;  %v3297_v7 = vunpack.c.l.bf16 %v3318_v46  ;;  %v3263_v41 = vld [vmem:[%s4979_s3 + $0x188] sm:$0xff] }
 0x55c   :  { %3177 = vmatmul.msk.f32.vlgmr.msra.gmra.mxu0 %vm2040_vm10, %v2085_v55  ;;  %v2719_v55 = vld [vmem:[%s4984_s8 + $0x30] sm:$0xff] }
 0x55d   :  { %2780 = vmatpush.msrb.mxu3 %v2719_v55  ;;  %2757 = vmatpush.msra.mxu1 %v2719_v55  ;;  %v3236_v55 = vld [vmem:[%s4979_s3 + $0xf8] sm:$0xff] }
 0x5d1   :  { %v2110_v25 = vpop.f32.mrf.mxu0 }
 0x5d2   :  { %v2136_v13 = vmul.f32 0.010204081, %v2110_v25  ;;  %v3200_v25 = vld [vmem:[%s4979_s3 + $0x50] sm:$0xff] }
 0x5d3   :  { %2382 = vmatpush.msra.mxu2 %v3200_v25 }
 0x5d4   :  { %v2138_v38 = vmul.f32 %v2136_v13, %v2136_v13 }
 0x5d9   :  { %v2133_v50 = vpop.f32.mrf.mxu0 }
 0x5da   :  { %v2137_v40 = vmul.f32 0.010204081, %v2133_v50  ;;  %v3199_v50 = vld [vmem:[%s4979_s3 + $0x48] sm:$0xff] }
 0x5db   :  { %2383 = vmatpush.msra.mxu2 %v3199_v50  ;;  %v3249_v50 = vld [vmem:[%s4979_s3 + $0x148] sm:$0xf] }
 0x5dc   :  { %v2139_v61 = vsub.f32 %v2137_v40, %v2138_v38  ;;  %v3319_v38 = vld [vmem:[%s4981_s5 + $0x28] sm:$0xff]  }
 0x5dd   :  { %v3301_v40 = vunpack.c.l.bf16 %v3319_v38  ;;  %2384 = vmatpush.msra.mxu2 %v3198_v24  ;;  %v3245_v24 = vld [vmem:[%s4979_s3 + $0x128] sm:$0xff] }
 0x5de   :  { %v2140_v44 = vmax.f32 %v2139_v61, 0.0  ;;  %v3302_v61 = vunpack.c.h.bf16 %v3319_v38 }
 0x5e0   :  { %v2141_v63 = vadd.f32 1e-05, %v2140_v44  ;;  %v3320_v44 = vld [vmem:[%s4981_s5 + $0x30] sm:$0xff]  }
 0x5e2   :  { %3326 = vrsqrt.f32 %v2141_v63  ;;  %vm2148_vm12 = vweird.f32 %v2141_v63 }
 0x5e8   :  { %v3327_v53 = vpop.eup %3326 }
 0x5e9   :  { %v2143_v59 = vmul.f32 %v3327_v53, %v2141_v63  ;;  %vm2149_vm11 = vweird.f32 %v3327_v53  ;;  %v3305_v63 = vunpack.c.l.bf16 %v3320_v44 }
 0x5ea   :  { %vm2150_vm13 = vmor %vm2148_vm12, %vm2149_vm11 }
 0x5eb   :  { %v2144_v19 = vmul.f32 %v3327_v53, %v2143_v59  ;;  %v3306_v59 = vunpack.c.h.bf16 %v3320_v44  ;;  %v3247_v44 = vld [vmem:[%s4979_s3 + $0x138] sm:$0xff] }
 0x5ed   :  { %v2145_v49 = vmul.f32 0.5, %v2144_v19  ;;  %v3197_v19 = vld [vmem:[%s4979_s3 + $0x38] sm:$0xff] }
 0x5ee   :  { %2385 = vmatpush.msra.mxu2 %v3197_v19  ;;  %v3262_v19 = vld [vmem:[%s4979_s3 + $0x180] sm:$0xff] }
 0x5ef   :  { %v2146_v29 = vsub.f32 1.5, %v2145_v49  ;;  %v3321_v49 = vld [vmem:[%s4981_s5 + $0x38] sm:$0xff]  }
 0x5f1   :  { %v2147_v45 = vmul.f32 %v3327_v53, %v2146_v29  ;;  %v3309_v29 = vunpack.c.l.bf16 %v3321_v49 }
 0x5f3   :  { %v2151_v15 = vsel %vm2150_vm13, %v3327_v53, %v2147_v45  ;;  %v3267_v53 = vld [vmem:[%s4979_s3 + $0x1a8] sm:$0xf]  ;;  %v3196_v45 = vld [vmem:[%s4979_s3 + $0x30] sm:$0xff] }
 0x5f4   :  { %v2153_v23 = vrot.slane %v2151_v15, 6  ;;  %2386 = vmatpush.msra.mxu2 %v3196_v45  ;;  %v2354_v15 = vld [vmem:[%s4979_s3 + $0x28] sm:$0xf]  ;;  %v3257_v45 = vld [vmem:[%s4979_s3 + $0x170] sm:$0xff] }
 0x5f6   :  { %v2155_v42 = vmul.f32 %v4599_v34, %v2153_v23  ;;  %3205 = vmatpush.msk.msrb.mxu2 %vm2089_vm9, %v2354_v15  ;;  %v3310_v23 = vunpack.c.h.bf16 %v3321_v49  ;;  %v3258_v49 = vld [vmem:[%s4979_s3 + $0x178] sm:$0xf]  ;;  %v3256_v15 = vld [vmem:[%s4979_s3 + $0x168] sm:$0xff] }
 0x5f8   :  { %v2157_v10 = vrot.slane %v2155_v42, 2  ;;  %v2164_v0 = vperm.slane %v2155_v42, 2  ;;  %v2353_v42 = vld [vmem:[%s4979_s3 + $0x20] sm:$0xff] }
 0x5f9   :  { %2414 = vmatpush.msrb.mxu2 %v2353_v42  ;;  %v3254_v42 = vld [vmem:[%s4979_s3 + $0x158] sm:$0xff] }
 0x5fa   :  { %v2159_v27 = vmul.f32 %v2157_v10, %v2136_v13  ;;  %v2171_v11 = vmul.f32 %v2164_v0, %v2033_v1  ;;  %v2170_v36 = vmul.f32 %v2164_v0, %v4565_v4  ;;  %v2169_v58 = vmul.f32 %v2164_v0, %v4554_v21  ;;  %v2352_v10 = vld [vmem:[%s4979_s3 + $0x18] sm:$0xff] }
 0x5fb   :  { %v2168_v60 = vmul.f32 %v2164_v0, %v4545_v14  ;;  %v2167_v18 = vmul.f32 %v2164_v0, %v4537_v30  ;;  %v2166_v21 = vmul.f32 %v2164_v0, %v4525_v39  ;;  %v2165_v20 = vmul.f32 %v2164_v0, %v4535_v51  ;;  %v3315_v51 = vld [vmem:[%s4981_s5 + $0x8] sm:$0xff]   ;;  %v3266_v0 = vld [vmem:[%s4979_s3 + $0x1a0] sm:$0xff]  ;;  %2415 = vmatpush.msrb.mxu2 %v2352_v10 }
 0x5fc   :  { %v2161_v12 = vrot.slane %v2159_v27, 5  ;;  %v3281_v30 = vunpack.c.l.bf16 %v3280_v26  ;;  %v3282_v39 = vunpack.c.h.bf16 %v3280_v26  ;;  %v3285_v62 = vunpack.c.l.bf16 %v3315_v51  ;;  %v2718_v27 = vld [vmem:[%s4984_s8 + $0x28] sm:$0xff] }
 0x5fd   :  { %v3286_v56 = vunpack.c.h.bf16 %v3315_v51  ;;  %v3298_v13 = vunpack.c.h.bf16 %v3318_v46  ;;  %2781 = vmatpush.msrb.mxu3 %v2718_v27  ;;  %2758 = vmatpush.msra.mxu1 %v2718_v27  ;;  %v3238_v46 = vld [vmem:[%s4979_s3 + $0x108] sm:$0xff]  ;;  %v3253_v27 = vld [vmem:[%s4979_s3 + $0x150] sm:$0xff] }
 0x5fe   :  { %v2163_v5 = vsub.f32 %v4599_v34, %v2161_v12  ;;  %v2351_v12 = vld [vmem:[%s4979_s3 + $0x10] sm:$0xff] }
 0x5ff   :  { %2416 = vmatpush.msrb.mxu2 %v2351_v12 }
 0x600   :  { %v2172_v52 = vperm.slane %v2163_v5, 3  ;;  %v3322_v5 = vld [vmem:[%s4981_s5 + $0x40] sm:$0xff]  }
 0x602   :  { %v2179_v28 = vadd.f32 %v2172_v52, %v2171_v11  ;;  %v2178_v17 = vadd.f32 %v2172_v52, %v2170_v36  ;;  %v2177_v32 = vadd.f32 %v2172_v52, %v2169_v58  ;;  %v2176_v6 = vadd.f32 %v2172_v52, %v2168_v60  ;;  %v2349_v11 = vld [vmem:[%s4979_s3] sm:$0xff]  ;;  %v3265_v60 = vld [vmem:[%s4979_s3 + $0x198] sm:$0xff] }
 0x603   :  { %v2175_v1 = vadd.f32 %v2172_v52, %v2167_v18  ;;  %v2174_v31 = vadd.f32 %v2172_v52, %v2166_v21  ;;  %v2173_v14 = vadd.f32 %v2172_v52, %v2165_v20  ;;  %v2350_v52 = vld [vmem:[%s4979_s3 + $0x8] sm:$0xff]  ;;  %v3313_v36 = vunpack.c.l.bf16 %v3322_v5  ;;  %v3222_v21 = vld [vmem:[%s4979_s3 + $0xb8] sm:$0xf] }
 0x604   :  { %v2186_v37 = vmax.f32 %v2179_v28, 0.0  ;;  %v2185_v57 = vmax.f32 %v2178_v17, 0.0  ;;  %v2184_v4 = vmax.f32 %v2177_v32, 0.0  ;;  %v2183_v33 = vmax.f32 %v2176_v6, 0.0  ;;  %2417 = vmatpush.msrb.mxu2 %v2350_v52  ;;  %v3212_v32 = vld [vmem:[%s4979_s3 + $0x80] sm:$0xff]  ;;  %v3210_v6 = vld [vmem:[%s4979_s3 + $0x70] sm:$0xff] }
 0x605   :  { %v2182_v22 = vmax.f32 %v2175_v1, 0.0  ;;  %v2181_v2 = vmax.f32 %v2174_v31, 0.0  ;;  %v2180_v8 = vmax.f32 %v2173_v14, 0.0  ;;  %v3314_v17 = vunpack.c.h.bf16 %v3322_v5  ;;  %v3209_v18 = vld [vmem:[%s4979_s3 + $0x68] sm:$0xff]  ;;  %v3208_v1 = vld [vmem:[%s4979_s3 + $0x60] sm:$0xff]  ;;  %v3221_v31 = vld [vmem:[%s4979_s3 + $0xb0] sm:$0xff] }
 0x606   :  { %2287 = vmatpush.msrb.mxu0 %v2186_v37  ;;  %2418 = vmatpush.msrb.mxu2 %v2349_v11  ;;  %v3220_v20 = vld [vmem:[%s4979_s3 + $0xa8] sm:$0xff]  ;;  %v3218_v14 = vld [vmem:[%s4979_s3 + $0x98] sm:$0xff]  ;;  %v2715_v52 = vld [vmem:[%s4984_s8 + $0x10] sm:$0xff] }
 0x608   :  { %2288 = vmatpush.msrb.mxu0 %v2185_v57  ;;  %v3211_v57 = vld [vmem:[%s4979_s3 + $0x78] sm:$0xff] }
 0x60a   :  { %2289 = vmatpush.msrb.mxu0 %v2184_v4 }
 0x60c   :  { %2290 = vmatpush.msrb.mxu0 %v2183_v33 }
 0x60e   :  { %2291 = vmatpush.msrb.mxu0 %v2182_v22  ;;  %v3219_v22 = vld [vmem:[%s4979_s3 + $0xa0] sm:$0xff] }
 0x610   :  { %2292 = vmatpush.msrb.mxu0 %v2181_v2  ;;  %v3217_v2 = vld [vmem:[%s4979_s3 + $0x90] sm:$0xff] }
 0x612   :  { %2293 = vmatpush.msrb.mxu0 %v2180_v8  ;;  %v3264_v8 = vld [vmem:[%s4979_s3 + $0x190] sm:$0xff] }
 0x613   :  { %3178 = vmatmul.msk.f32.vlgmr.msrb.gmra.mxu0 %vm2223_vm14, %v3281_v30  ;;  %v2717_v30 = vld [vmem:[%s4984_s8 + $0x20] sm:$0xff] }
 0x614   :  { %3268 = vmatpush.msk.msra.mxu0 %vm2089_vm9, %v3267_v53  ;;  %2782 = vmatpush.msrb.mxu3 %v2717_v30 }
 0x615   :  { %2759 = vmatpush.msra.mxu1 %v2717_v30 }
 0x616   :  { %2699 = vmatpush.msra.mxu0 %v3266_v0 }
 0x618   :  { %2700 = vmatpush.msra.mxu0 %v3265_v60 }
 0x61a   :  { %2701 = vmatpush.msra.mxu0 %v3264_v8 }
 0x61b   :  { %3179 = vmatmul.msk.f32.gmra.mxu0 %vm2223_vm14, %v3282_v39  ;;  %v3231_v39 = vld [vmem:[%s4979_s3 + $0xe8] sm:$0xf] }
 0x61c   :  { %2702 = vmatpush.msra.mxu0 %v3263_v41 }
 0x61e   :  { %2703 = vmatpush.msra.mxu0 %v3262_v19 }
 0x623   :  { %3180 = vmatmul.msk.f32.gmra.mxu0 %vm2223_vm14, %v3285_v62  ;;  %v3230_v62 = vld [vmem:[%s4979_s3 + $0xe0] sm:$0xff] }
 0x62b   :  { %3181 = vmatmul.msk.f32.gmra.mxu0 %vm2223_vm14, %v3286_v56  ;;  %v3228_v56 = vld [vmem:[%s4979_s3 + $0xd0] sm:$0xff] }
 0x633   :  { %3182 = vmatmul.msk.f32.gmra.mxu0 %vm2223_vm14, %v3289_v47 }
 0x63b   :  { %3183 = vmatmul.msk.f32.gmra.mxu0 %vm2223_vm14, %v3290_v54  ;;  %v3226_v54 = vld [vmem:[%s4979_s3 + $0xc0] sm:$0xff] }
 0x643   :  { %3184 = vmatmul.msk.f32.gmra.mxu0 %vm2223_vm14, %v3293_v16 }
 0x64b   :  { %3185 = vmatmul.msk.f32.gmra.mxu0 %vm2223_vm14, %v3294_v9  ;;  %v3239_v9 = vld [vmem:[%s4979_s3 + $0x110] sm:$0xff] }
 0x653   :  { %3186 = vmatmul.msk.f32.gmra.mxu0 %vm2223_vm14, %v3297_v7  ;;  %v3237_v7 = vld [vmem:[%s4979_s3 + $0x100] sm:$0xff] }
 0x65b   :  { %3187 = vmatmul.msk.f32.gmra.mxu0 %vm2223_vm14, %v3298_v13  ;;  %v3235_v13 = vld [vmem:[%s4979_s3 + $0xf0] sm:$0xff] }
 0x663   :  { %3188 = vmatmul.msk.f32.gmra.mxu0 %vm2223_vm14, %v3301_v40  ;;  %v3248_v40 = vld [vmem:[%s4979_s3 + $0x140] sm:$0xff] }
 0x66b   :  { %3189 = vmatmul.msk.f32.gmra.mxu0 %vm2223_vm14, %v3302_v61  ;;  %v2716_v61 = vld [vmem:[%s4984_s8 + $0x18] sm:$0xff] }
 0x66c   :  { %2783 = vmatpush.msrb.mxu3 %v2716_v61  ;;  %2760 = vmatpush.msra.mxu1 %v2716_v61 }
 0x66e   :  { %2784 = vmatpush.msrb.mxu3 %v2715_v52  ;;  %2761 = vmatpush.msra.mxu1 %v2715_v52 }
 0x673   :  { %3190 = vmatmul.msk.f32.gmra.mxu0 %vm2223_vm14, %v3305_v63  ;;  %v3246_v63 = vld [vmem:[%s4979_s3 + $0x130] sm:$0xff] }
 0x67b   :  { %3191 = vmatmul.msk.f32.gmra.mxu0 %vm2223_vm14, %v3306_v59  ;;  %v3244_v59 = vld [vmem:[%s4979_s3 + $0x120] sm:$0xff] }
 0x683   :  { %3192 = vmatmul.msk.f32.gmra.mxu0 %vm2223_vm14, %v3309_v29 }
 0x68b   :  { %3193 = vmatmul.msk.f32.gmra.mxu0 %vm2223_vm14, %v3310_v23  ;;  %v3255_v23 = vld [vmem:[%s4979_s3 + $0x160] sm:$0xff] }
 0x690   :  { %v2295_v28 = vpop.f32.mrf.mxu0 }
 0x693   :  { %3194 = vmatmul.msk.f32.gmra.mxu0 %vm2223_vm14, %v3313_v36 }
 0x698   :  { %v2298_v58 = vpop.f32.mrf.mxu0 }
 0x69b   :  { %3195 = vmatmul.msk.f32.gmra.mxu0 %vm2223_vm14, %v3314_v17 }
 0x6a0   :  { %v2301_v37 = vpop.f32.mrf.mxu0 }
 0x6a1   :  { %3203 = vmatmul.msk.f32.vlgmr.msra.gmra.mxu2 %vm2040_vm10, %v2301_v37 }
 0x6a2   :  { %3214 = vmatpush.msk.msra.mxu2 %vm2089_vm9, %v3213_v48 }
 0x6a4   :  { %2453 = vmatpush.msra.mxu2 %v3212_v32 }
 0x6a6   :  { %2454 = vmatpush.msra.mxu2 %v3211_v57  ;;  %v2714_v57 = vld [vmem:[%s4984_s8 + $0x8] sm:$0xff] }
 0x6a7   :  { %2785 = vmatpush.msrb.mxu3 %v2714_v57  ;;  %2762 = vmatpush.msra.mxu1 %v2714_v57  ;;  %v2858_v57 = vld [vmem:[%s4985_s9 + $0x38] sm:$0xff] }
 0x6a8   :  { %v2304_v4 = vpop.f32.mrf.mxu0  ;;  %2455 = vmatpush.msra.mxu2 %v3210_v6 }
 0x6a9   :  { %3204 = vmatmul.msk.f32.gmra.mxu2 %vm2040_vm10, %v2304_v4 }
 0x6aa   :  { %2456 = vmatpush.msra.mxu2 %v3209_v18 }
 0x6ac   :  { %2457 = vmatpush.msra.mxu2 %v3208_v1 }
 0x6b0   :  { %v2307_v33 = vpop.f32.mrf.mxu0 }
 0x6b1   :  { %3206 = vmatmul.msk.f32.vlgmr.msrb.gmra.mxu2 %vm2040_vm10, %v2295_v28 }
 0x6b2   :  { %3223 = vmatpush.msk.msrb.mxu2 %vm2089_vm9, %v3222_v21 }
 0x6b4   :  { %2494 = vmatpush.msrb.mxu2 %v3221_v31 }
 0x6b6   :  { %2495 = vmatpush.msrb.mxu2 %v3220_v20  ;;  %v2713_v20 = vld [vmem:[%s4984_s8] sm:$0xff] }
 0x6b7   :  { %2786 = vmatpush.msrb.mxu3 %v2713_v20  ;;  %2763 = vmatpush.msra.mxu1 %v2713_v20  ;;  %v2854_v20 = vld [vmem:[%s4985_s9 + $0x18] sm:$0xff] }
 0x6b8   :  { %v2310_v26 = vpop.f32.mrf.mxu0  ;;  %2496 = vmatpush.msrb.mxu2 %v3219_v22 }
 0x6b9   :  { %3207 = vmatmul.msk.f32.gmra.mxu2 %vm2040_vm10, %v2298_v58 }
 0x6ba   :  { %2497 = vmatpush.msrb.mxu2 %v3218_v14 }
 0x6bc   :  { %2498 = vmatpush.msrb.mxu2 %v3217_v2 }
 0x6c0   :  { %v2313_v51 = vpop.f32.mrf.mxu0 }
 0x6c1   :  { %3215 = vmatmul.msk.f32.vlgmr.msra.gmra.mxu2 %vm2040_vm10, %v2307_v33 }
 0x6c2   :  { %3232 = vmatpush.msk.msra.mxu2 %vm2089_vm9, %v3231_v39 }
 0x6c4   :  { %2535 = vmatpush.msra.mxu2 %v3230_v62 }
 0x6c6   :  { %2536 = vmatpush.msra.mxu2 %v3229_v43 }
 0x6c8   :  { %v2316_v47 = vpop.f32.mrf.mxu0  ;;  %2537 = vmatpush.msra.mxu2 %v3228_v56 }
 0x6c9   :  { %3216 = vmatmul.msk.f32.gmra.mxu2 %vm2040_vm10, %v2310_v26 }
 0x6ca   :  { %2538 = vmatpush.msra.mxu2 %v3227_v35 }
 0x6cc   :  { %2539 = vmatpush.msra.mxu2 %v3226_v54 }
 0x6d0   :  { %v2319_v16 = vpop.f32.mrf.mxu0 }
 0x6d1   :  { %3224 = vmatmul.msk.f32.vlgmr.msrb.gmra.mxu2 %vm2040_vm10, %v2313_v51 }
 0x6d2   :  { %3241 = vmatpush.msk.msrb.mxu2 %vm2089_vm9, %v3240_v3 }
 0x6d4   :  { %2576 = vmatpush.msrb.mxu2 %v3239_v9 }
 0x6d6   :  { %2577 = vmatpush.msrb.mxu2 %v3238_v46 }
 0x6d8   :  { %v2322_v25 = vpop.f32.mrf.mxu0  ;;  %2578 = vmatpush.msrb.mxu2 %v3237_v7 }
 0x6d9   :  { %3225 = vmatmul.msk.f32.gmra.mxu2 %vm2040_vm10, %v2316_v47 }
 0x6da   :  { %2579 = vmatpush.msrb.mxu2 %v3236_v55 }
 0x6dc   :  { %2580 = vmatpush.msrb.mxu2 %v3235_v13 }
 0x6e0   :  { %v2325_v38 = vpop.f32.mrf.mxu0 }
 0x6e1   :  { %3233 = vmatmul.msk.f32.vlgmr.msra.gmra.mxu2 %vm2040_vm10, %v2319_v16 }
 0x6e2   :  { %3250 = vmatpush.msk.msra.mxu2 %vm2089_vm9, %v3249_v50 }
 0x6e4   :  { %2617 = vmatpush.msra.mxu2 %v3248_v40 }
 0x6e6   :  { %2618 = vmatpush.msra.mxu2 %v3247_v44 }
 0x6e8   :  { %v2328_v53 = vpop.f32.mrf.mxu0  ;;  %2619 = vmatpush.msra.mxu2 %v3246_v63 }
 0x6e9   :  { %3234 = vmatmul.msk.f32.gmra.mxu2 %vm2040_vm10, %v2322_v25 }
 0x6ea   :  { %2620 = vmatpush.msra.mxu2 %v3245_v24 }
 0x6ec   :  { %2621 = vmatpush.msra.mxu2 %v3244_v59 }
 0x6f0   :  { %v2331_v29 = vpop.f32.mrf.mxu0 }
 0x6f1   :  { %3242 = vmatmul.msk.f32.vlgmr.msrb.gmra.mxu2 %vm2040_vm10, %v2325_v38 }
 0x6f2   :  { %3259 = vmatpush.msk.msrb.mxu2 %vm2089_vm9, %v3258_v49 }
 0x6f4   :  { %2658 = vmatpush.msrb.mxu2 %v3257_v45 }
 0x6f6   :  { %2659 = vmatpush.msrb.mxu2 %v3256_v15 }
 0x6f8   :  { %v2334_v10 = vpop.f32.mrf.mxu0  ;;  %2660 = vmatpush.msrb.mxu2 %v3255_v23 }
 0x6f9   :  { %3243 = vmatmul.msk.f32.gmra.mxu2 %vm2040_vm10, %v2328_v53 }
 0x6fa   :  { %2661 = vmatpush.msrb.mxu2 %v3254_v42 }
 0x6fc   :  { %2662 = vmatpush.msrb.mxu2 %v3253_v27 }
 0x700   :  { %v2337_v12 = vpop.f32.mrf.mxu0 }
 0x701   :  { %3251 = vmatmul.msk.f32.vlgmr.msra.gmra.mxu2 %vm2040_vm10, %v2331_v29 }
 0x708   :  { %v2340_v0 = vpop.f32.mrf.mxu0 }
 0x709   :  { %3252 = vmatmul.msk.f32.gmra.mxu2 %vm2040_vm10, %v2334_v10 }
 0x710   :  { %v2343_v5 = vpop.f32.mrf.mxu0 }
 0x711   :  { %3260 = vmatmul.msk.f32.vlgmr.msrb.gmra.mxu2 %vm2040_vm10, %v2337_v12  ;;  %3269 = vmatmul.msk.f32.vlgmr.msra.gmra.mxu0 %vm2040_vm10, %v2343_v5 }
 0x718   :  { %v2346_v11 = vpop.f32.mrf.mxu0 }
 0x719   :  { %3261 = vmatmul.msk.f32.gmra.mxu2 %vm2040_vm10, %v2340_v0  ;;  %3270 = vmatmul.msk.f32.gmra.mxu0 %vm2040_vm10, %v2346_v11 }
 0x724   :  { %v2388_v36 = vpop.f32.mrf.mxu2 }
 0x72c   :  { %v2391_v28 = vpop.f32.mrf.mxu2 }
 0x734   :  { %v2420_v17 = vpop.f32.mrf.mxu2 }
 0x735   :  { %v2421_v58 = vadd.f32 %v2420_v17, %v2388_v36 }
 0x73c   :  { %v2423_v48 = vpop.f32.mrf.mxu2 }
 0x73d   :  { %v2424_v37 = vadd.f32 %v2423_v48, %v2391_v28  ;;  %v2860_v48 = vld [vmem:[%s4985_s9 + $0x48] sm:$0xff] }
 0x744   :  { %v2459_v32 = vpop.f32.mrf.mxu2 }
 0x745   :  { %v2465_v60 = vadd.f32 %v2459_v32, %v2421_v58  ;;  %v2861_v58 = vld [vmem:[%s4985_s9 + $0x50] sm:$0xff]  ;;  %v2859_v32 = vld [vmem:[%s4985_s9 + $0x40] sm:$0xff] }
 0x746   :  { %2873 = vmatpush.msrb.mxu0 %v2861_v58 }
 0x748   :  { %2874 = vmatpush.msrb.mxu0 %v2860_v48 }
 0x74a   :  { %2875 = vmatpush.msrb.mxu0 %v2859_v32 }
 0x74c   :  { %v2462_v6 = vpop.f32.mrf.mxu2  ;;  %2876 = vmatpush.msrb.mxu0 %v2858_v57 }
 0x74d   :  { %v2466_v18 = vadd.f32 %v2462_v6, %v2424_v37 }
 0x754   :  { %v2500_v4 = vpop.f32.mrf.mxu2 }
 0x755   :  { %v2506_v1 = vadd.f32 %v2500_v4, %v2465_v60 }
 0x75c   :  { %v2503_v21 = vpop.f32.mrf.mxu2 }
 0x75d   :  { %v2507_v62 = vadd.f32 %v2503_v21, %v2466_v18  ;;  %v2857_v18 = vld [vmem:[%s4985_s9 + $0x30] sm:$0xff] }
 0x75e   :  { %2877 = vmatpush.msrb.mxu0 %v2857_v18 }
 0x764   :  { %v2541_v33 = vpop.f32.mrf.mxu2 }
 0x765   :  { %v2547_v30 = vadd.f32 %v2541_v33, %v2506_v1  ;;  %v2856_v1 = vld [vmem:[%s4985_s9 + $0x28] sm:$0xff]  ;;  %v2855_v33 = vld [vmem:[%s4985_s9 + $0x20] sm:$0xff] }
 0x766   :  { %2878 = vmatpush.msrb.mxu0 %v2856_v1 }
 0x768   :  { %2879 = vmatpush.msrb.mxu0 %v2855_v33 }
 0x76a   :  { %2880 = vmatpush.msrb.mxu0 %v2854_v20 }
 0x76c   :  { %v2544_v31 = vpop.f32.mrf.mxu2 }
 0x76d   :  { %v2548_v56 = vadd.f32 %v2544_v31, %v2507_v62 }
 0x774   :  { %v2582_v22 = vpop.f32.mrf.mxu2 }
 0x775   :  { %v2588_v39 = vadd.f32 %v2582_v22, %v2547_v30 }
 0x77c   :  { %v2585_v14 = vpop.f32.mrf.mxu2 }
 0x77d   :  { %v2589_v47 = vadd.f32 %v2585_v14, %v2548_v56  ;;  %v2853_v14 = vld [vmem:[%s4985_s9 + $0x10] sm:$0xff] }
 0x77e   :  { %2881 = vmatpush.msrb.mxu0 %v2853_v14 }
 0x784   :  { %v2623_v26 = vpop.f32.mrf.mxu2 }
 0x785   :  { %v2629_v43 = vadd.f32 %v2623_v26, %v2588_v39 }
 0x78c   :  { %v2626_v2 = vpop.f32.mrf.mxu2 }
 0x78d   :  { %v2630_v54 = vadd.f32 %v2626_v2, %v2589_v47  ;;  %v2852_v2 = vld [vmem:[%s4985_s9 + $0x8] sm:$0xff] }
 0x78e   :  { %v2705_v8 = vpop.f32.mrf.mxu0  ;;  %2882 = vmatpush.msrb.mxu0 %v2852_v2 }
 0x794   :  { %v2664_v51 = vpop.f32.mrf.mxu2 }
 0x795   :  { %v2670_v35 = vadd.f32 %v2664_v51, %v2629_v43 }
 0x796   :  { %v2708_v9 = vpop.f32.mrf.mxu0 }
 0x797   :  { %v4870_v3 = vadd.f32 %v2705_v8, %v2670_v35 }
 0x799   :  { %v2734_v46 = vmul.f32 %v4870_v3, %v4870_v3  ;;  %v2725_v55 = vsel %vm2724_vm15, %v4870_v3, 0.0 }
 0x79b   :  { %v2736_v38 = vsel %vm2724_vm15, %v2734_v46, 0.0  ;;  %v2896_v46 = vld [vmem:[%s4986_s10 + $0x40] sm:$0xff] }
 0x79c   :  { %v2667_v16 = vpop.f32.mrf.mxu2 }
 0x79d   :  { %v2671_v41 = vadd.f32 %v2667_v16, %v2630_v54 }
 0x79f   :  { %v4874_v7 = vadd.f32 %v2708_v9, %v2671_v41  ;;  %v44_v9 = vld [vmem:[%s4987_s11 + $0x10] sm:$0xff]  ;;  %v2851_v41 = vld [vmem:[%s4985_s9] sm:$0xff] }
 0x7a0   :  { %2883 = vmatpush.msrb.mxu0 %v2851_v41 }
 0x7a1   :  { %v2726_v25 = vsel %vm2724_vm15, %v4874_v7, 0.0  ;;  %v2735_v13 = vmul.f32 %v4874_v7, %v4874_v7 }
 0x7a2   :  { %v2727_v50 = vadd.f32 %v2726_v25, %v2725_v55  ;;  %v2897_v55 = vld [vmem:[%s4986_s10 + $0x48] sm:$0xff]  ;;  %v2894_v25 = vld [vmem:[%s4986_s10 + $0x30] sm:$0xff] }
 0x7a3   :  { %v2737_v40 = vsel %vm2724_vm15, %v2735_v13, 0.0  ;;  %v2892_v13 = vld [vmem:[%s4986_s10 + $0x20] sm:$0xff] }
 0x7a4   :  { %v2728_v61 = vrot.slane %v2727_v50, 4  ;;  %v2738_v44 = vadd.f32 %v2737_v40, %v2736_v38  ;;  %v2890_v38 = vld [vmem:[%s4986_s10 + $0x10] sm:$0xff]  ;;  %v2895_v40 = vld [vmem:[%s4986_s10 + $0x38] sm:$0xff] }
 0x7a6   :  { %v2729_v63 = vadd.f32 %v2728_v61, %v2727_v50  ;;  %v2739_v24 = vrot.slane %v2738_v44, 4  ;;  %v2888_v61 = vld [vmem:[%s4986_s10] sm:$0xff] }
 0x7a8   :  { %v2730_v53 = vrot.slane %v2729_v63, 2  ;;  %v2740_v59 = vadd.f32 %v2739_v24, %v2738_v44  ;;  %v2893_v44 = vld [vmem:[%s4986_s10 + $0x28] sm:$0xff] }
 0x7a9   :  { %v2889_v24 = vld [vmem:[%s4986_s10 + $0x8] sm:$0xff] }
 0x7aa   :  { %v2731_v19 = vadd.f32 %v2730_v53, %v2729_v63  ;;  %v2741_v49 = vrot.slane %v2740_v59, 2  ;;  %v2891_v63 = vld [vmem:[%s4986_s10 + $0x18] sm:$0xff]  ;;  %v2863_v53 = vrot.slane %v4599_v34, 6 }
 0x7ac   :  { %v2732_v29 = vrot.slane %v2731_v19, 1  ;;  %v2742_v45 = vadd.f32 %v2741_v49, %v2740_v59  ;;  %v43_v49 = vld [vmem:[%s4987_s11 + $0x8] sm:$0xff] }
 0x7ae   :  { %v2733_v15 = vadd.f32 %v2732_v29, %v2731_v19  ;;  %v2743_v23 = vrot.slane %v2742_v45, 1  ;;  %v2902_v29 = vrot.slane %v43_v49, 7 }
 0x7b0   :  { %3271 = vmatmul.msk.f32.vlgmr.msra.gmra.mxu1 %vm2724_vm15, %v2733_v15  ;;  %v2744_v42 = vadd.f32 %v2743_v23, %v2742_v45  ;;  %v2901_v23 = vrot.slane %v4599_v34, 7 }
 0x7b2   :  { %3272 = vmatmul.msk.f32.vlgmr.msrb.gmra.mxu3 %vm2724_vm15, %v2744_v42  ;;  %v2959_v42 = vlaneseq }
 0x7b4   :  { %vm2961_vm4 = vcmp.lt.s32.totalorder %v2959_v42, 256 }
 0x82d   :  { %v2765_v10 = vpop.f32.mrf.mxu1 }
 0x82e   :  { %v2791_v27 = vmul.f32 0.055555556, %v2765_v10 }
 0x830   :  { %v2793_v0 = vmul.f32 %v2791_v27, %v2791_v27 }
 0x835   :  { %v2788_v12 = vpop.f32.mrf.mxu3 }
 0x836   :  { %v2792_v5 = vmul.f32 0.055555556, %v2788_v12 }
 0x838   :  { %v2794_v52 = vsub.f32 %v2792_v5, %v2793_v0 }
 0x83a   :  { %v2795_v11 = vmax.f32 %v2794_v52, 0.0 }
 0x83c   :  { %v2796_v36 = vadd.f32 1e-05, %v2795_v11 }
 0x83e   :  { %3328 = vrsqrt.f32 %v2796_v36  ;;  %vm2803_vm1 = vweird.f32 %v2796_v36 }
 0x844   :  { %v3329_v28 = vpop.eup %3328 }
 0x845   :  { %v2798_v17 = vmul.f32 %v3329_v28, %v2796_v36  ;;  %vm2804_vm0 = vweird.f32 %v3329_v28 }
 0x846   :  { %vm2805_vm2 = vmor %vm2803_vm1, %vm2804_vm0 }
 0x847   :  { %v2799_v37 = vmul.f32 %v3329_v28, %v2798_v17 }
 0x849   :  { %v2800_v60 = vmul.f32 0.5, %v2799_v37 }
 0x84b   :  { %v2801_v6 = vsub.f32 1.5, %v2800_v60 }
 0x84d   :  { %v2802_v4 = vmul.f32 %v3329_v28, %v2801_v6 }
 0x84f   :  { %v2806_v21 = vsel %vm2805_vm2, %v3329_v28, %v2802_v4 }
 0x850   :  { %v2808_v31 = vrot.slane %v2806_v21, 4 }
 0x852   :  { %v2810_v22 = vmul.f32 %v4599_v34, %v2808_v31 }
 0x854   :  { %v2812_v26 = vrot.slane %v2810_v22, 4  ;;  %v2819_v39 = vperm.slane %v2810_v22, 4 }
 0x856   :  { %v2814_v30 = vmul.f32 %v2812_v26, %v2791_v27  ;;  %v2821_v62 = vmul.f32 %v2819_v39, %v4874_v7  ;;  %v2820_v56 = vmul.f32 %v2819_v39, %v4870_v3  ;;  %v2898_v3 = vld [vmem:[%s4986_s10 + $0x50] sm:$0xf]  ;;  %v2899_v7 = vld [vmem:[%s4986_s10 + $0x58] sm:$0xf]  ;;  %s3357_s10 = smov [#allocation2]  }
 0x857   :  { %3277 = vmatpush.msk.msrb.mxu1 %vm2089_vm9, %v2899_v7  ;;  %s2969_s6 = sshll.u32 %s3357_s10, 4  ;;  %s2970_s6 = int_to_ptr.vmem [resolvable:$true] %s2969_s6 }
 0x858   :  { %v2816_v8 = vrot.slane %v2814_v30, 3 }
 0x859   :  { %2945 = vmatpush.msrb.mxu1 %v2897_v55 }
 0x85a   :  { %v2818_v51 = vsub.f32 %v4599_v34, %v2816_v8 }
 0x85b   :  { %2946 = vmatpush.msrb.mxu1 %v2895_v40 }
 0x85c   :  { %v2822_v43 = vperm.slane %v2818_v51, 5 }
 0x85d   :  { %2947 = vmatpush.msrb.mxu1 %v2893_v44 }
 0x85e   :  { %v2824_v35 = vadd.f32 %v2822_v43, %v2821_v62  ;;  %v2823_v47 = vadd.f32 %v2822_v43, %v2820_v56 }
 0x85f   :  { %2948 = vmatpush.msrb.mxu1 %v2891_v63 }
 0x860   :  { %v2826_v54 = vmax.f32 %v2824_v35, 0.0  ;;  %v2825_v16 = vmax.f32 %v2823_v47, 0.0 }
 0x861   :  { %2949 = vmatpush.msrb.mxu1 %v2889_v24 }
 0x862   :  { %2845 = vmatpush.msra.mxu2 %v2826_v54 }
 0x864   :  { %2846 = vmatpush.msra.mxu2 %v2825_v16 }
 0x865   :  { %3273 = vmatmul.msk.f32.vlgmr.msra.gmra.mxu2 %vm2827_vm3, %v44_v9 }
 0x866   :  { %3275 = vmatpush.msk.msrb.mxu2 %vm2089_vm9, %v2898_v3 }
 0x868   :  { %2925 = vmatpush.msrb.mxu2 %v2896_v46 }
 0x86a   :  { %2926 = vmatpush.msrb.mxu2 %v2894_v25 }
 0x86c   :  { %2927 = vmatpush.msrb.mxu2 %v2892_v13 }
 0x86e   :  { %2928 = vmatpush.msrb.mxu2 %v2890_v38 }
 0x870   :  { %2929 = vmatpush.msrb.mxu2 %v2888_v61 }
 0x8e8   :  { %v2848_v50 = vpop.f32.mrf.mxu2 }
 0x8e9   :  { %3274 = vmatmul.msk.f32.vlgmr.msrb.gmra.mxu0 %vm2724_vm15, %v2848_v50 }
 0x966   :  { %v2885_v59 = vpop.f32.mrf.mxu0 }
 0x967   :  { %v2886_v19 = vadd.f32 %v2885_v59, %v2863_v53 }
 0x969   :  { %3276 = vmatmul.msk.f32.vlgmr.msrb.gmra.mxu2 %vm2040_vm10, %v2886_v19  ;;  %3278 = vmatmul.msk.f32.vlgmr.msrb.gmra.mxu1 %vm2040_vm10, %v2886_v19 }
 0x9e6   :  { %v2951_v45 = vpop.f32.mrf.mxu1 }
 0x9e7   :  { %v2952_v15 = vadd.f32 %v2951_v45, %v2902_v29 }
 0x9e9   :  { %v2956_v27 = vrot.slane %v2952_v15, 7 }
 0x9ec   :  { %v2931_v10 = vpop.f32.mrf.mxu2 }
 0x9ed   :  { %v2932_v12 = vadd.f32 %v2931_v10, %v2901_v23 }
 0x9ef   :  { %v2957_v0 = vsel %vm976_vm7, %v2932_v12, %v2956_v27 }
 0x9f0   :  { %2963 = vst.msk [vmem:[#allocation2] sm:$0x3] %vm2961_vm4, %v2957_v0 }
 0x9f1   :  { %2974 = dma.vmem_to_hbm [thread:$0]  %s2970_s6, 32, %s2972_s23, [#allocation3]  }
 0x9f2   :  { %3355 = dma.done.wait [#allocation3], 32  }
 0x9f3   :  { %3356 = vsyncadd [#allocation3], 4294967264 }
 0x9f4   :  { %2979 = vsyncpa [#allocation3], 1 }

</bundles_post_ra>
